<compile_context>
chip_gen: v7x
topology: tpu7x:2x2x1
jax: 0.10.0
libtpu: 0.0.40
codegen_flags: <defaults>
</compile_context>

<pallas_src>
import functools

import jax
import jax.numpy as jnp
from jax.experimental import pallas as pl
from jax.experimental.pallas import tpu as pltpu


def fused_add_conv1x1_bn_kernel(a_ref, b_ref, w_ref, gb_ref, o_ref, *, p_valid, eps):
    # a_ref, b_ref : (Cin, Ppad)  residual inputs, channels-major, zero-padded past p_valid
    # w_ref        : (Ct,  Cin)   1x1 conv weight tile (native PyTorch (Cout, Cin) layout)
    # gb_ref       : (Ct,  2)     column 0 = BN gamma, column 1 = BN beta
    # o_ref        : (Ct,  Ppad)  lane-dense output tile (padded columns sliced off outside)
    x = a_ref[...] + b_ref[...]                                        # residual add (VPU)
    y = jnp.dot(w_ref[...], x, preferred_element_type=jnp.float32)     # 1x1 conv == matmul (MXU)

    ct, ppad = y.shape
    inv_p = 1.0 / p_valid                                              # stats over valid pixels only
    ones_p = jnp.ones((ppad, 1), jnp.float32)

    # Padded x columns are exact zeros -> padded y columns are exact zeros, so a plain
    # column sum of y equals the sum over the valid pixels.  Route the reduction through
    # the MXU (matvec with ones) instead of a lane-axis XLU reduce over the full y tile.
    sum_y = jnp.dot(y, ones_p, preferred_element_type=jnp.float32)     # (Ct, 1)
    mean = sum_y * inv_p

    # Two-pass (centered) variance; padded columns masked to exact zero so they do not
    # contribute (y - mean) = -mean there.
    valid = jax.lax.broadcasted_iota(jnp.int32, (ct, ppad), 1) < p_valid
    d = jnp.where(valid, y - mean, 0.0)
    sum_d2 = jnp.dot(d * d, ones_p, preferred_element_type=jnp.float32)  # (Ct, 1), MXU
    var = sum_d2 * inv_p                                               # biased variance (training BN)
    inv_std = jax.lax.rsqrt(var + eps)                                 # EUP

    gamma = gb_ref[:, 0:1]                                             # (Ct, 1)
    beta = gb_ref[:, 1:2]                                              # (Ct, 1)
    scale = inv_std * gamma
    shift = beta - mean * scale
    o_ref[...] = y * scale + shift                                     # unmasked lane-dense stores


def fused_add_conv1x1_bn(x263, x249, w, gamma, beta, eps=1e-5):
    """x263, x249: (N, Cin, H, W) f32; w: (Cout, Cin); gamma, beta: (Cout,).
    Returns (N, Cout, H, W) f32."""
    n, cin, h, wdim = x263.shape
    cout = w.shape[0]
    p = n * h * wdim
    ppad = ((p + 127) // 128) * 128                                    # lane-dense pixel axis

    # Channels-major flatten.  For N == 1 this is a free contiguous reshape (no transpose).
    if n == 1:
        a = x263.reshape(cin, p)
        b = x249.reshape(cin, p)
    else:
        a = jnp.moveaxis(x263, 1, 0).reshape(cin, p)
        b = jnp.moveaxis(x249, 1, 0).reshape(cin, p)

    if ppad != p:
        # Exact zeros -> zero y columns -> batch statistics unchanged (inv_p stays 1/p).
        a = jnp.pad(a, ((0, 0), (0, ppad - p)))
        b = jnp.pad(b, ((0, 0), (0, ppad - p)))

    gb = jnp.stack([gamma, beta], axis=1).astype(jnp.float32)          # (Cout, 2)

    # Two Cout tiles: v7x -> one per TensorCore; v5e/v6e -> 2-step pipelined loop that
    # overlaps weight-load / output-store with compute.  Keep sublane alignment of tiles.
    nc = 2 if cout % 16 == 0 else 1
    tc = cout // nc

    flops = 2 * cout * cin * ppad + 4 * cout * ppad                    # conv matmul + 2 matvecs
    bytes_accessed = 4 * (2 * cin * ppad + cout * cin + 2 * cout + cout * ppad)

    kernel = functools.partial(fused_add_conv1x1_bn_kernel, p_valid=p, eps=eps)

    out_flat = pl.pallas_call(
        kernel,
        out_shape=jax.ShapeDtypeStruct((cout, ppad), jnp.float32),
        grid=(nc,),
        in_specs=[
            pl.BlockSpec((cin, ppad), lambda i: (0, 0)),
            pl.BlockSpec((cin, ppad), lambda i: (0, 0)),
            pl.BlockSpec((tc, cin), lambda i: (i, 0)),
            pl.BlockSpec((tc, 2), lambda i: (i, 0)),
        ],
        out_specs=pl.BlockSpec((tc, ppad), lambda i: (i, 0)),
        compiler_params=pltpu.CompilerParams(dimension_semantics=("parallel",)),
        cost_estimate=pl.CostEstimate(
            flops=flops, transcendentals=cout, bytes_accessed=bytes_accessed),
    )(a, b, w, gb)

    out = out_flat[:, :p] if ppad != p else out_flat
    if n == 1:
        return out.reshape(1, cout, h, wdim)
    return jnp.moveaxis(out.reshape(cout, n, h, wdim), 0, 1)


def reference(x263, x249, w, gamma, beta, eps=1e-5):
    x = x263 + x249
    y = jnp.einsum("nchw,oc->nohw", x, w)
    mean = jnp.mean(y, axis=(0, 2, 3), keepdims=True)
    var = jnp.mean((y - mean) ** 2, axis=(0, 2, 3), keepdims=True)
    return (y - mean) / jnp.sqrt(var + eps) * gamma.reshape(1, -1, 1, 1) + beta.reshape(1, -1, 1, 1)


if __name__ == "__main__":
    N, CIN, COUT, H, W = 1, 136, 816, 14, 14

    key = jax.random.PRNGKey(0)
    k1, k2, k3, k4, k5 = jax.random.split(key, 5)

    x263 = jax.random.normal(k1, (N, CIN, H, W), dtype=jnp.float32)
    x249 = jax.random.normal(k2, (N, CIN, H, W), dtype=jnp.float32)

    # Deterministic params (Conv2d weight ~ small normal; non-trivial BN affine params).
    conv_w = jax.random.normal(k3, (COUT, CIN), dtype=jnp.float32) * 0.05   # (Cout, Cin)
    gamma = 1.0 + 0.1 * jax.random.normal(k4, (COUT,), dtype=jnp.float32)
    beta = 0.1 * jax.random.normal(k5, (COUT,), dtype=jnp.float32)

    fn = jax.jit(fused_add_conv1x1_bn)
    out = fn(x263, x249, conv_w, gamma, beta)
    out = jax.block_until_ready(out)

    ref = reference(x263, x249, conv_w, gamma, beta)
    assert out.shape == (N, COUT, H, W)
    assert jnp.allclose(out, ref, atol=1e-3, rtol=1e-3), float(jnp.max(jnp.abs(out - ref)))

    print("KERNEL_OK")
</pallas_src>

<mosaic_0001>
module attributes {stable_mosaic.version = 11 : i64} {
  func.func @fused_add_conv1x1_bn_kernel(%arg0: i32, %arg1: memref<136x256xf32, #tpu.memory_space<vmem>>, %arg2: memref<136x256xf32, #tpu.memory_space<vmem>>, %arg3: memref<408x136xf32, #tpu.memory_space<vmem>>, %arg4: memref<408x2xf32, #tpu.memory_space<vmem>>, %arg5: memref<408x256xf32, #tpu.memory_space<vmem>>) attributes {dimension_semantics = [#tpu.dimension_semantics<parallel>], iteration_bounds = array<i64: 2>, scalar_prefetch = 0 : i64, scratch_operands = 0 : i64, tpu.core_type = #tpu.core_type<tc>, window_params = [{pipeline_mode = #tpu.pipeline_mode<synchronous>, transform_indices = @transform_0, window_bounds = array<i64: 136, 256>}, {pipeline_mode = #tpu.pipeline_mode<synchronous>, transform_indices = @transform_1, window_bounds = array<i64: 136, 256>}, {transform_indices = @transform_2, window_bounds = array<i64: 408, 136>}, {transform_indices = @transform_3, window_bounds = array<i64: 408, 2>}, {transform_indices = @transform_4, window_bounds = array<i64: 408, 256>}]} {
    %c0 = arith.constant 0 : index
    %c0_0 = arith.constant 0 : index
    %0 = vector.load %arg1[%c0, %c0_0] : memref<136x256xf32, #tpu.memory_space<vmem>>, vector<136x256xf32>
    %c0_1 = arith.constant 0 : index
    %c0_2 = arith.constant 0 : index
    %1 = vector.load %arg2[%c0_1, %c0_2] : memref<136x256xf32, #tpu.memory_space<vmem>>, vector<136x256xf32>
    %2 = arith.addf %0, %1 : vector<136x256xf32>
    %c0_3 = arith.constant 0 : index
    %c0_4 = arith.constant 0 : index
    %3 = vector.load %arg3[%c0_3, %c0_4] : memref<408x136xf32, #tpu.memory_space<vmem>>, vector<408x136xf32>
    %cst = arith.constant dense<0.000000e+00> : vector<408x256xf32>
    %4 = tpu.matmul %3, %2, %cst {dimension_numbers = #tpu.dot_dimension_numbers<[1], [0], [0], [1], [0, 0, 1, 1], [], []>} : vector<408x136xf32>, vector<136x256xf32>, vector<408x256xf32> -> vector<408x256xf32>
    %cst_5 = arith.constant 1.000000e+00 : f32
    %5 = vector.broadcast %cst_5 : f32 to vector<256x1xf32>
    %cst_6 = arith.constant dense<0.000000e+00> : vector<408x1xf32>
    %6 = tpu.matmul %4, %5, %cst_6 {dimension_numbers = #tpu.dot_dimension_numbers<[1], [0], [0], [1], [0, 0, 1, 1], [], []>} : vector<408x256xf32>, vector<256x1xf32>, vector<408x1xf32> -> vector<408x1xf32>
    %cst_7 = arith.constant 0.00510204071 : f32
    %7 = vector.broadcast %cst_7 : f32 to vector<408x1xf32>
    %8 = arith.mulf %6, %7 : vector<408x1xf32>
    %9 = tpu.iota {dimensions = array<i32: 1>} : vector<408x256xi32>
    %c196_i32 = arith.constant 196 : i32
    %10 = vector.broadcast %c196_i32 : i32 to vector<408x256xi32>
    %11 = arith.cmpi slt, %9, %10 : vector<408x256xi32>
    %12 = vector.broadcast %8 : vector<408x1xf32> to vector<408x256xf32>
    %13 = arith.subf %4, %12 : vector<408x256xf32>
    %cst_8 = arith.constant 0.000000e+00 : f32
    %14 = vector.broadcast %cst_8 : f32 to vector<408x256xf32>
    %15 = arith.select %11, %13, %14 : vector<408x256xi1>, vector<408x256xf32>
    %16 = arith.mulf %15, %15 : vector<408x256xf32>
    %cst_9 = arith.constant dense<0.000000e+00> : vector<408x1xf32>
    %17 = tpu.matmul %16, %5, %cst_9 {dimension_numbers = #tpu.dot_dimension_numbers<[1], [0], [0], [1], [0, 0, 1, 1], [], []>} : vector<408x256xf32>, vector<256x1xf32>, vector<408x1xf32> -> vector<408x1xf32>
    %cst_10 = arith.constant 0.00510204071 : f32
    %18 = vector.broadcast %cst_10 : f32 to vector<408x1xf32>
    %19 = arith.mulf %17, %18 : vector<408x1xf32>
    %cst_11 = arith.constant 9.99999974E-6 : f32
    %20 = vector.broadcast %cst_11 : f32 to vector<408x1xf32>
    %21 = arith.addf %19, %20 : vector<408x1xf32>
    %22 = math.rsqrt %21 : vector<408x1xf32>
    %c0_12 = arith.constant 0 : index
    %c0_13 = arith.constant 0 : index
    %23 = vector.load %arg4[%c0_12, %c0_13] : memref<408x2xf32, #tpu.memory_space<vmem>>, vector<408x1xf32>
    %c0_14 = arith.constant 0 : index
    %c1 = arith.constant 1 : index
    %24 = vector.load %arg4[%c0_14, %c1] : memref<408x2xf32, #tpu.memory_space<vmem>>, vector<408x1xf32>
    %25 = arith.mulf %22, %23 : vector<408x1xf32>
    %26 = arith.mulf %8, %25 : vector<408x1xf32>
    %27 = arith.subf %24, %26 : vector<408x1xf32>
    %28 = vector.broadcast %25 : vector<408x1xf32> to vector<408x256xf32>
    %29 = arith.mulf %4, %28 : vector<408x256xf32>
    %30 = vector.broadcast %27 : vector<408x1xf32> to vector<408x256xf32>
    %31 = arith.addf %29, %30 : vector<408x256xf32>
    %c0_15 = arith.constant 0 : index
    %c0_16 = arith.constant 0 : index
    %32 = vector.load %arg5[%c0_15, %c0_16] : memref<408x256xf32, #tpu.memory_space<vmem>>, vector<408x256xf32>
    tpu.vector_store %arg5[%c0_15, %c0_16], %31 {strides = array<i32>} : memref<408x256xf32, #tpu.memory_space<vmem>>, vector<408x256xf32>,
    return
  }
  func.func @transform_0(%arg0: i32) -> (i32, i32) {
    %c0_i32 = arith.constant 0 : i32
    %c0_i32_0 = arith.constant 0 : i32
    %c0_i32_1 = arith.constant 0 : i32
    return %c0_i32, %c0_i32_0 : i32, i32
  }
  func.func @transform_1(%arg0: i32) -> (i32, i32) {
    %c0_i32 = arith.constant 0 : i32
    %c0_i32_0 = arith.constant 0 : i32
    %c0_i32_1 = arith.constant 0 : i32
    return %c0_i32, %c0_i32_0 : i32, i32
  }
  func.func @transform_2(%arg0: i32) -> (i32, i32) {
    %c0_i32 = arith.constant 0 : i32
    %c0_i32_0 = arith.constant 0 : i32
    return %arg0, %c0_i32 : i32, i32
  }
  func.func @transform_3(%arg0: i32) -> (i32, i32) {
    %c0_i32 = arith.constant 0 : i32
    %c0_i32_0 = arith.constant 0 : i32
    return %arg0, %c0_i32 : i32, i32
  }
  func.func @transform_4(%arg0: i32) -> (i32, i32) {
    %c0_i32 = arith.constant 0 : i32
    %c0_i32_0 = arith.constant 0 : i32
    return %arg0, %c0_i32 : i32, i32
  }
}

</mosaic_0001>

<bundles_post_ra>
// kernel: fused_add_conv1x1_bn.1
= control target key start
LH: loop header
LB: loop body
LE: loop exit
PB: predicated region body
PF: predicated region fallthrough
CT: control target
= control target key end

     0   :  { %s4037_s15 = smov 0   ;;  %s6118_s0 = inlined_call_operand.vmem [shape: f32[136,256], index: 0, kind: input, shape index: {}]   ;;  %s6119_s1 = inlined_call_operand.vmem [shape: f32[136,256], index: 1, kind: input, shape index: {}]   ;;  %s6120_s2 = inlined_call_operand.vmem [shape: f32[816,136], index: 2, kind: input, shape index: {}]   ;;  %s6121_s3 = inlined_call_operand.vmem [shape: f32[816,2], index: 3, kind: input, shape index: {}]   ;;  %s6122_s4 = inlined_call_operand.vmem [shape: f32[816,256], index: 4, kind: output, shape index: {}]  }
   0x1 LB: > { %s3661_s16 = sadd.s32 4294967295, %s4005_s15   ;;  %p3665_p0 = scmp.ge.s32.totalorder %s4005_s15, 1  ;;  %s4005_s15 = sphi %s4037_s15, %s14_s15  }
   0x2   : > { %p175_p1 = scmp.lt.s32.totalorder %s4005_s15, 3 }
   0x4   : > { %p176_p2 = pnand %p3665_p0, %p175_p1 }
   0x6   : > { %179 = sbr.rel (%p176_p2) target bundleno = 1366 (0x556), region = 36 }
   0xd   : > { %v229_v0 = vld [vmem:[%s6118_s0 + $0x8] sm:$0xff]  ;;  %v231_v1 = vld [vmem:[%s6118_s0 + $0x18] sm:$0xff]  ;;  %v228_v5 = vld [vmem:[%s6118_s0] sm:$0xff]  ;;  %s4090_s23 = smul.u32 51, %s3661_s16  ;;  %vm432_vm0 = vcmask 64512   ;;  %s4010_s18 = smov 1  }
   0xe   : > { %v263_v2 = vld [vmem:[%s6119_s1 + $0x8] sm:$0xff]  ;;  %v265_v3 = vld [vmem:[%s6119_s1 + $0x18] sm:$0xff]  ;;  %v230_v6 = vld [vmem:[%s6118_s0 + $0x10] sm:$0xff] }
   0xf   : > { %v297_v4 = vadd.f32 %v263_v2, %v229_v0  ;;  %v299_v7 = vadd.f32 %v265_v3, %v231_v1  ;;  %v262_v8 = vld [vmem:[%s6119_s1] sm:$0xff]  ;;  %v264_v9 = vld [vmem:[%s6119_s1 + $0x10] sm:$0xff]  ;;  %v233_v10 = vld [vmem:[%s6118_s0 + $0x28] sm:$0xff]  ;;  %p209_p3 = scmp.lt.s32.totalorder %s4090_s23, 101 }
  0x10   : > { %v296_v11 = vadd.f32 %v262_v8, %v228_v5  ;;  %v298_v12 = vadd.f32 %v264_v9, %v230_v6  ;;  %v235_v13 = vld [vmem:[%s6118_s0 + $0x38] sm:$0xff]  ;;  %v267_v14 = vld [vmem:[%s6119_s1 + $0x28] sm:$0xff]  ;;  %v232_v19 = vld [vmem:[%s6118_s0 + $0x20] sm:$0xff] }
  0x11   : > { %v269_v15 = vld [vmem:[%s6119_s1 + $0x38] sm:$0xff]  ;;  %v3726_v16 = vpack.c.bf16 %v299_v7, %v297_v4  ;;  %v301_v17 = vadd.f32 %v267_v14, %v233_v10  ;;  %v234_v20 = vld [vmem:[%s6118_s0 + $0x30] sm:$0xff]  ;;  %v266_v21 = vld [vmem:[%s6119_s1 + $0x20] sm:$0xff]  ;;  %s6745_s23 = smov (!%p209_p3, %s4090_s23), 101 }
  0x12   : > { %v303_v18 = vadd.f32 %v269_v15, %v235_v13  ;;  %v3728_v22 = vpack.c.bf16 %v298_v12, %v296_v11  ;;  %v268_v23 = vld [vmem:[%s6119_s1 + $0x30] sm:$0xff]  ;;  %v300_v24 = vadd.f32 %v266_v21, %v232_v19  ;;  %v237_v25 = vld [vmem:[%s6118_s0 + $0x48] sm:$0xff]  ;;  %v239_v26 = vld [vmem:[%s6118_s0 + $0x58] sm:$0xff]  ;;  %s3724_s19 = sshll.u32 %s6745_s23, 4 }
  0x13   : > { %3727 = vmatprep.subr.bf16.mxu0 %v3726_v16  ;;  %v302_v28 = vadd.f32 %v268_v23, %v234_v20  ;;  %v271_v29 = vld [vmem:[%s6119_s1 + $0x48] sm:$0xff]  ;;  %v273_v30 = vld [vmem:[%s6119_s1 + $0x58] sm:$0xff]  ;;  %v236_v31 = vld [vmem:[%s6118_s0 + $0x40] sm:$0xff]  ;;  %3822 = vmatprep.subr.bf16.mxu1 %v3726_v16  ;;  %s4221_s6 = scalar_lea.vmem %s6120_s2, %s3724_s19  ;;  %s5673_s22 = scalar_lea.vmem %s6122_s4, %s3724_s19 }
  0x14   : > { %v3730_v27 = vpack.c.bf16 %v303_v18, %v301_v17  ;;  %3729 = vmatpush1.bf16.msra.mxu0 %v3728_v22  ;;  %v305_v32 = vadd.f32 %v271_v29, %v237_v25  ;;  %v307_v33 = vadd.f32 %v273_v30, %v239_v26  ;;  %v238_v34 = vld [vmem:[%s6118_s0 + $0x50] sm:$0xff]  ;;  %v270_v35 = vld [vmem:[%s6119_s1 + $0x40] sm:$0xff]  ;;  %3831 = vmatpush1.bf16.msra.mxu1 %v3728_v22  ;;  %v241_v40 = vld [vmem:[%s6118_s0 + $0x68] sm:$0xff] }
  0x15   : > { %v272_v36 = vld [vmem:[%s6119_s1 + $0x50] sm:$0xff]  ;;  %v3732_v37 = vpack.c.bf16 %v302_v28, %v300_v24  ;;  %v304_v38 = vadd.f32 %v270_v35, %v236_v31  ;;  %v243_v41 = vld [vmem:[%s6118_s0 + $0x78] sm:$0xff]  ;;  %v275_v42 = vld [vmem:[%s6119_s1 + $0x68] sm:$0xff] }
  0x16   : > { %3731 = vmatprep.subr.bf16.mxu0 %v3730_v27  ;;  %v306_v39 = vadd.f32 %v272_v36, %v238_v34  ;;  %3823 = vmatprep.subr.bf16.mxu1 %v3730_v27  ;;  %v3734_v43 = vpack.c.bf16 %v307_v33, %v305_v32  ;;  %v277_v44 = vld [vmem:[%s6119_s1 + $0x78] sm:$0xff]  ;;  %v309_v45 = vadd.f32 %v275_v42, %v241_v40  ;;  %v240_v46 = vld [vmem:[%s6118_s0 + $0x60] sm:$0xff]  ;;  %v242_v47 = vld [vmem:[%s6118_s0 + $0x70] sm:$0xff] }
  0x17   : > { %v311_v48 = vadd.f32 %v277_v44, %v243_v41  ;;  %v274_v49 = vld [vmem:[%s6119_s1 + $0x60] sm:$0xff]  ;;  %v276_v50 = vld [vmem:[%s6119_s1 + $0x70] sm:$0xff]  ;;  %v245_v51 = vld [vmem:[%s6118_s0 + $0x88] sm:$0xff] }
  0x18   : > { %3733 = vmatpush1.bf16.msra.mxu0 %v3732_v37  ;;  %v3736_v52 = vpack.c.bf16 %v306_v39, %v304_v38  ;;  %v308_v53 = vadd.f32 %v274_v49, %v240_v46  ;;  %v310_v54 = vadd.f32 %v276_v50, %v242_v47  ;;  %v247_v55 = vld [vmem:[%s6118_s0 + $0x98] sm:$0xff]  ;;  %v279_v56 = vld [vmem:[%s6119_s1 + $0x88] sm:$0xff]  ;;  %3832 = vmatpush1.bf16.msra.mxu1 %v3732_v37  ;;  %v244_v61 = vld [vmem:[%s6118_s0 + $0x80] sm:$0xff] }
  0x19   : > { %v281_v57 = vld [vmem:[%s6119_s1 + $0x98] sm:$0xff]  ;;  %3735 = vmatprep.subr.bf16.mxu0 %v3734_v43  ;;  %v3738_v58 = vpack.c.bf16 %v311_v48, %v309_v45  ;;  %v313_v59 = vadd.f32 %v279_v56, %v245_v51  ;;  %v246_v62 = vld [vmem:[%s6118_s0 + $0x90] sm:$0xff]  ;;  %v278_v63 = vld [vmem:[%s6119_s1 + $0x80] sm:$0xff]  ;;  %3824 = vmatprep.subr.bf16.mxu1 %v3734_v43 }
  0x1a   : > { %v315_v60 = vadd.f32 %v281_v57, %v247_v55  ;;  %v280_v0 = vld [vmem:[%s6119_s1 + $0x90] sm:$0xff]  ;;  %v249_v1 = vld [vmem:[%s6118_s0 + $0xa8] sm:$0xff]  ;;  %v251_v2 = vld [vmem:[%s6118_s0 + $0xb8] sm:$0xff]  ;;  %v3740_v5 = vpack.c.bf16 %v310_v54, %v308_v53  ;;  %v312_v6 = vadd.f32 %v278_v63, %v244_v61 }
  0x1b   : > { %v283_v3 = vld [vmem:[%s6119_s1 + $0xa8] sm:$0xff]  ;;  %v285_v4 = vld [vmem:[%s6119_s1 + $0xb8] sm:$0xff]  ;;  %v314_v7 = vadd.f32 %v280_v0, %v246_v62  ;;  %v248_v8 = vld [vmem:[%s6118_s0 + $0xa0] sm:$0xff]  ;;  %v4007_v62 = vmov 0.0|0.0   ;;  %v4008_v0 = vmov 1.0|1.0  }
  0x1c   : > { %3737 = vmatpush1.bf16.msra.mxu0 %v3736_v52  ;;  %v250_v9 = vld [vmem:[%s6118_s0 + $0xb0] sm:$0xff]  ;;  %3833 = vmatpush1.bf16.msra.mxu1 %v3736_v52  ;;  %v3742_v10 = vpack.c.bf16 %v315_v60, %v313_v59  ;;  %v317_v11 = vadd.f32 %v283_v3, %v249_v1  ;;  %v319_v12 = vadd.f32 %v285_v4, %v251_v2  ;;  %v282_v13 = vld [vmem:[%s6119_s1 + $0xa0] sm:$0xff]  ;;  %v253_v15 = vld [vmem:[%s6118_s0 + $0xc8] sm:$0xff] }
  0x1d   : > { %3739 = vmatprep.subr.bf16.mxu0 %v3738_v58  ;;  %v284_v14 = vld [vmem:[%s6119_s1 + $0xb0] sm:$0xff]  ;;  %3825 = vmatprep.subr.bf16.mxu1 %v3738_v58  ;;  %v255_v16 = vld [vmem:[%s6118_s0 + $0xd8] sm:$0xff]  ;;  %v287_v17 = vld [vmem:[%s6119_s1 + $0xc8] sm:$0xff]  ;;  %v3744_v19 = vpack.c.bf16 %v314_v7, %v312_v6  ;;  %v316_v20 = vadd.f32 %v282_v13, %v248_v8 }
  0x1e   : > { %v289_v18 = vld [vmem:[%s6119_s1 + $0xd8] sm:$0xff]  ;;  %v318_v21 = vadd.f32 %v284_v14, %v250_v9  ;;  %v252_v22 = vld [vmem:[%s6118_s0 + $0xc0] sm:$0xff]  ;;  %v254_v23 = vld [vmem:[%s6118_s0 + $0xd0] sm:$0xff]  ;;  %v3746_v24 = vpack.c.bf16 %v319_v12, %v317_v11  ;;  %v321_v25 = vadd.f32 %v287_v17, %v253_v15 }
  0x1f   : > { %v323_v26 = vadd.f32 %v289_v18, %v255_v16  ;;  %v286_v27 = vld [vmem:[%s6119_s1 + $0xc0] sm:$0xff]  ;;  %v288_v28 = vld [vmem:[%s6119_s1 + $0xd0] sm:$0xff]  ;;  %v257_v29 = vld [vmem:[%s6118_s0 + $0xe8] sm:$0xff] }
  0x20   : > { %3741 = vmatpush1.bf16.msra.mxu0 %v3740_v5  ;;  %3834 = vmatpush1.bf16.msra.mxu1 %v3740_v5  ;;  %v259_v30 = vld [vmem:[%s6118_s0 + $0xf8] sm:$0xff]  ;;  %v291_v31 = vld [vmem:[%s6119_s1 + $0xe8] sm:$0xff]  ;;  %v3748_v34 = vpack.c.bf16 %v318_v21, %v316_v20  ;;  %v320_v35 = vadd.f32 %v286_v27, %v252_v22  ;;  %v322_v36 = vadd.f32 %v288_v28, %v254_v23  ;;  %v256_v37 = vld [vmem:[%s6118_s0 + $0xe0] sm:$0xff] }
  0x21   : > { %3743 = vmatprep.subr.bf16.mxu0 %v3742_v10  ;;  %3826 = vmatprep.subr.bf16.mxu1 %v3742_v10  ;;  %v293_v32 = vld [vmem:[%s6119_s1 + $0xf8] sm:$0xff]  ;;  %v331_v33 = vld [vmem:[%s4221_s6 + $0x8] sm:$0xff]  ;;  %v3750_v38 = vpack.c.bf16 %v323_v26, %v321_v25  ;;  %v325_v39 = vadd.f32 %v291_v31, %v257_v29  ;;  %v258_v41 = vld [vmem:[%s6118_s0 + $0xf0] sm:$0xff] }
  0x22   : > { %3671 = vmatprep.mubr.msk.f32.mxu0 %vm432_vm0, %v331_v33  ;;  %v327_v40 = vadd.f32 %v293_v32, %v259_v30  ;;  %v290_v42 = vld [vmem:[%s6119_s1 + $0xe0] sm:$0xff]  ;;  %v292_v43 = vld [vmem:[%s6119_s1 + $0xf0] sm:$0xff]  ;;  %v3752_v44 = vpack.c.bf16 %v322_v36, %v320_v35  ;;  %v261_v48 = vld [vmem:[%s6118_s0 + $0x108] sm:$0xff] }
  0x23   : > { %v324_v45 = vadd.f32 %v290_v42, %v256_v37  ;;  %v326_v46 = vadd.f32 %v292_v43, %v258_v41  ;;  %v295_v49 = vld [vmem:[%s6119_s1 + $0x108] sm:$0xff]  ;;  %v260_v52 = vld [vmem:[%s6118_s0 + $0x100] sm:$0xff]  ;;  %v333_v56 = vld [vmem:[%s4221_s6 + $0x18] sm:$0xff] }
  0x24   : > { %3745 = vmatpush1.bf16.msra.mxu0 %v3744_v19  ;;  %3835 = vmatpush1.bf16.msra.mxu1 %v3744_v19  ;;  %v3754_v47 = vpack.c.bf16 %v327_v40, %v325_v39  ;;  %v329_v51 = vadd.f32 %v295_v49, %v261_v48  ;;  %v294_v53 = vld [vmem:[%s6119_s1 + $0x100] sm:$0xff]  ;;  %v383_v57 = vld [vmem:[%s4221_s6 + $0x1a8] sm:$0xff]  ;;  %v385_v59 = vld [vmem:[%s4221_s6 + $0x1b8] sm:$0xff] }
  0x25   : > { %3747 = vmatprep.subr.bf16.mxu0 %v3746_v24  ;;  %3827 = vmatprep.subr.bf16.mxu1 %v3746_v24  ;;  %v3756_v50 = vpack.c.bf16 %v326_v46, %v324_v45  ;;  %v328_v54 = vadd.f32 %v294_v53, %v260_v52  ;;  %v330_v55 = vld [vmem:[%s4221_s6] sm:$0xff]  ;;  %v332_v60 = vld [vmem:[%s4221_s6 + $0x10] sm:$0xff]  ;;  %v335_v61 = vld [vmem:[%s4221_s6 + $0x28] sm:$0xff] }
  0x26   : > { %v382_v58 = vld [vmem:[%s4221_s6 + $0x1a0] sm:$0xff]  ;;  %3697 = vmatprep.mubr.msk.f32.mxu1 %vm432_vm0, %v383_v57  ;;  %v384_v63 = vld [vmem:[%s4221_s6 + $0x1b0] sm:$0xff]  ;;  %v387_v1 = vld [vmem:[%s4221_s6 + $0x1c8] sm:$0xff] }
  0x27   : > { %v334_v2 = vld [vmem:[%s4221_s6 + $0x20] sm:$0xff]  ;;  %v337_v3 = vld [vmem:[%s4221_s6 + $0x38] sm:$0xff]  ;;  %v336_v6 = vld [vmem:[%s4221_s6 + $0x30] sm:$0xff] }
  0x28   : > { %3749 = vmatpush1.bf16.msra.mxu0 %v3748_v34  ;;  %3836 = vmatpush1.bf16.msra.mxu1 %v3748_v34  ;;  %v386_v4 = vld [vmem:[%s4221_s6 + $0x1c0] sm:$0xff]  ;;  %v389_v5 = vld [vmem:[%s4221_s6 + $0x1d8] sm:$0xff]  ;;  %v339_v7 = vld [vmem:[%s4221_s6 + $0x48] sm:$0xff] }
  0x29   : > { %3751 = vmatprep.subr.bf16.mxu0 %v3750_v38  ;;  %3828 = vmatprep.subr.bf16.mxu1 %v3750_v38  ;;  %v388_v8 = vld [vmem:[%s4221_s6 + $0x1d0] sm:$0xff]  ;;  %v391_v9 = vld [vmem:[%s4221_s6 + $0x1e8] sm:$0xff]  ;;  %v338_v10 = vld [vmem:[%s4221_s6 + $0x40] sm:$0xff] }
  0x2a   : > { %v341_v11 = vld [vmem:[%s4221_s6 + $0x58] sm:$0xff]  ;;  %v390_v12 = vld [vmem:[%s4221_s6 + $0x1e0] sm:$0xff]  ;;  %v340_v14 = vld [vmem:[%s4221_s6 + $0x50] sm:$0xff] }
  0x2b   : > { %v393_v13 = vld [vmem:[%s4221_s6 + $0x1f8] sm:$0xff]  ;;  %v343_v15 = vld [vmem:[%s4221_s6 + $0x68] sm:$0xff]  ;;  %v392_v16 = vld [vmem:[%s4221_s6 + $0x1f0] sm:$0xff] }
  0x2c   : > { %3753 = vmatpush1.bf16.msra.mxu0 %v3752_v44  ;;  %3837 = vmatpush1.bf16.msra.mxu1 %v3752_v44  ;;  %v395_v17 = vld [vmem:[%s4221_s6 + $0x208] sm:$0xff]  ;;  %v342_v18 = vld [vmem:[%s4221_s6 + $0x60] sm:$0xff]  ;;  %v345_v19 = vld [vmem:[%s4221_s6 + $0x78] sm:$0xff] }
  0x2d   : > { %3755 = vmatprep.subr.bf16.mxu0 %v3754_v47  ;;  %3829 = vmatprep.subr.bf16.mxu1 %v3754_v47  ;;  %v394_v20 = vld [vmem:[%s4221_s6 + $0x200] sm:$0xff]  ;;  %v397_v21 = vld [vmem:[%s4221_s6 + $0x218] sm:$0xff]  ;;  %v344_v22 = vld [vmem:[%s4221_s6 + $0x70] sm:$0xff] }
  0x2e   : > { %v347_v23 = vld [vmem:[%s4221_s6 + $0x88] sm:$0xff]  ;;  %v396_v24 = vld [vmem:[%s4221_s6 + $0x210] sm:$0xff]  ;;  %v346_v26 = vld [vmem:[%s4221_s6 + $0x80] sm:$0xff] }
  0x2f   : > { %v399_v25 = vld [vmem:[%s4221_s6 + $0x228] sm:$0xff]  ;;  %v349_v27 = vld [vmem:[%s4221_s6 + $0x98] sm:$0xff]  ;;  %v398_v28 = vld [vmem:[%s4221_s6 + $0x220] sm:$0xff] }
  0x30   : > { %3757 = vmatpush1.bf16.msra.mxu0 %v3756_v50  ;;  %3838 = vmatpush1.bf16.msra.mxu1 %v3756_v50  ;;  %v401_v29 = vld [vmem:[%s4221_s6 + $0x238] sm:$0xff]  ;;  %v348_v30 = vld [vmem:[%s4221_s6 + $0x90] sm:$0xff]  ;;  %v351_v31 = vld [vmem:[%s4221_s6 + $0xa8] sm:$0xff] }
  0x31   : > { %618 = vmatprep.subr.mxu0 %v329_v51  ;;  %3830 = vmatprep.subr.mxu1 %v329_v51  ;;  %v400_v32 = vld [vmem:[%s4221_s6 + $0x230] sm:$0xff]  ;;  %v403_v33 = vld [vmem:[%s4221_s6 + $0x248] sm:$0xff]  ;;  %v350_v34 = vld [vmem:[%s4221_s6 + $0xa0] sm:$0xff] }
  0x32   : > { %v353_v35 = vld [vmem:[%s4221_s6 + $0xb8] sm:$0xff]  ;;  %v402_v36 = vld [vmem:[%s4221_s6 + $0x240] sm:$0xff]  ;;  %v352_v38 = vld [vmem:[%s4221_s6 + $0xb0] sm:$0xff] }
  0x33   : > { %v405_v37 = vld [vmem:[%s4221_s6 + $0x258] sm:$0xff]  ;;  %v355_v39 = vld [vmem:[%s4221_s6 + $0xc8] sm:$0xff]  ;;  %v404_v40 = vld [vmem:[%s4221_s6 + $0x250] sm:$0xff] }
  0x34   : > { %619 = vmatpush1.msra.mxu0 %v328_v54  ;;  %3839 = vmatpush1.msra.mxu1 %v328_v54  ;;  %v407_v41 = vld [vmem:[%s4221_s6 + $0x268] sm:$0xff]  ;;  %v354_v42 = vld [vmem:[%s4221_s6 + $0xc0] sm:$0xff]  ;;  %v357_v43 = vld [vmem:[%s4221_s6 + $0xd8] sm:$0xff] }
  0x35   : > { %651 = vmatmul.mubr.f32.vlgmr.msra.gmra.mrb[0].mxu0 %v330_v55  ;;  %807 = vmatmul.mubr.f32.vlgmr.msra.gmra.mrb[0].mxu1 %v382_v58  ;;  %v406_v44 = vld [vmem:[%s4221_s6 + $0x260] sm:$0xff]  ;;  %v409_v45 = vld [vmem:[%s4221_s6 + $0x278] sm:$0xff]  ;;  %v356_v46 = vld [vmem:[%s4221_s6 + $0xd0] sm:$0xff] }
  0x36   : > { %3672 = vmatprep.mubr.msk.f32.mxu0 %vm432_vm0, %v333_v56  ;;  %3758 = vmatprep.subr.bf16.mxu1 %v4007_v62  ;;  %v359_v47 = vld [vmem:[%s4221_s6 + $0xe8] sm:$0xff]  ;;  %v408_v48 = vld [vmem:[%s4221_s6 + $0x270] sm:$0xff]  ;;  %v358_v50 = vld [vmem:[%s4221_s6 + $0xe0] sm:$0xff] }
  0x37   : > { %3698 = vmatprep.mubr.msk.f32.mxu1 %vm432_vm0, %v385_v59  ;;  %3759 = vmatpush1.bf16.msra.mxu1 %v4008_v0  ;;  %v411_v49 = vld [vmem:[%s4221_s6 + $0x288] sm:$0xff]  ;;  %v361_v51 = vld [vmem:[%s4221_s6 + $0xf8] sm:$0xff]  ;;  %v410_v52 = vld [vmem:[%s4221_s6 + $0x280] sm:$0xff] }
  0x38   : > { %3760 = vmatprep.subr.bf16.mxu1 %v4007_v62  ;;  %3790 = vmatprep.subr.bf16.mxu0 %v4007_v62  ;;  %v413_v53 = vld [vmem:[%s4221_s6 + $0x298] sm:$0xff]  ;;  %v360_v54 = vld [vmem:[%s4221_s6 + $0xf0] sm:$0xff]  ;;  %v363_v55 = vld [vmem:[%s4221_s6 + $0x108] sm:$0xff] }
  0x39   : > { %657 = vmatmul.mubr.f32.gmra.mrb[2].mxu0 %v332_v60  ;;  %813 = vmatmul.mubr.f32.gmra.mrb[2].mxu1 %v384_v63  ;;  %v412_v56 = vld [vmem:[%s4221_s6 + $0x290] sm:$0xff]  ;;  %v415_v57 = vld [vmem:[%s4221_s6 + $0x2a8] sm:$0xff]  ;;  %v362_v58 = vld [vmem:[%s4221_s6 + $0x100] sm:$0xff] }
  0x3a   : > { %3673 = vmatprep.mubr.msk.f32.mxu0 %vm432_vm0, %v335_v61  ;;  %3791 = vmatpush1.bf16.msra.mxu0 %v4008_v0  ;;  %v365_v59 = vld [vmem:[%s4221_s6 + $0x118] sm:$0xff]  ;;  %v414_v60 = vld [vmem:[%s4221_s6 + $0x2a0] sm:$0xff]  ;;  %v364_v63 = vld [vmem:[%s4221_s6 + $0x110] sm:$0xff] }
  0x3b   : > { %3699 = vmatprep.mubr.msk.f32.mxu1 %vm432_vm0, %v387_v1  ;;  %3761 = vmatpush1.bf16.msra.mxu1 %v4008_v0  ;;  %v417_v61 = vld [vmem:[%s4221_s6 + $0x2b8] sm:$0xff]  ;;  %v367_v1 = vld [vmem:[%s4221_s6 + $0x128] sm:$0xff] }
  0x3c   : > { %3762 = vmatprep.subr.bf16.mxu1 %v4007_v62  ;;  %3792 = vmatprep.subr.bf16.mxu0 %v4007_v62 }
  0x3d   : > { %663 = vmatmul.mubr.f32.gmra.mrb[4].mxu0 %v334_v2  ;;  %819 = vmatmul.mubr.f32.gmra.mrb[4].mxu1 %v386_v4  ;;  %v416_v2 = vld [vmem:[%s4221_s6 + $0x2b0] sm:$0xff]  ;;  %v369_v4 = vld [vmem:[%s4221_s6 + $0x138] sm:$0xff] }
  0x3e   : > { %3674 = vmatprep.mubr.msk.f32.mxu0 %vm432_vm0, %v337_v3  ;;  %3793 = vmatpush1.bf16.msra.mxu0 %v4008_v0  ;;  %v419_v3 = vld [vmem:[%s4221_s6 + $0x2c8] sm:$0xff] }
  0x3f   : > { %3700 = vmatprep.mubr.msk.f32.mxu1 %vm432_vm0, %v389_v5  ;;  %3763 = vmatpush1.bf16.msra.mxu1 %v4008_v0  ;;  %v418_v5 = vld [vmem:[%s4221_s6 + $0x2c0] sm:$0xff] }
  0x40   : > { %3764 = vmatprep.subr.bf16.mxu1 %v4007_v62  ;;  %3794 = vmatprep.subr.bf16.mxu0 %v4007_v62 }
  0x41   : > { %669 = vmatmul.mubr.f32.gmra.mrb[6].mxu0 %v336_v6  ;;  %825 = vmatmul.mubr.f32.gmra.mrb[6].mxu1 %v388_v8  ;;  %v368_v6 = vld [vmem:[%s4221_s6 + $0x130] sm:$0xff] }
  0x42   : > { %3675 = vmatprep.mubr.msk.f32.mxu0 %vm432_vm0, %v339_v7  ;;  %3795 = vmatpush1.bf16.msra.mxu0 %v4008_v0  ;;  %v371_v7 = vld [vmem:[%s4221_s6 + $0x148] sm:$0xff]  ;;  %v420_v8 = vld [vmem:[%s4221_s6 + $0x2d0] sm:$0xff] }
  0x43   : > { %3701 = vmatprep.mubr.msk.f32.mxu1 %vm432_vm0, %v391_v9  ;;  %3765 = vmatpush1.bf16.msra.mxu1 %v4008_v0  ;;  %v423_v9 = vld [vmem:[%s4221_s6 + $0x2e8] sm:$0xff] }
  0x44   : > { %3766 = vmatprep.subr.bf16.mxu1 %v4007_v62  ;;  %3796 = vmatprep.subr.bf16.mxu0 %v4007_v62 }
  0x45   : > { %675 = vmatmul.mubr.f32.gmra.mrb[8].mxu0 %v338_v10  ;;  %831 = vmatmul.mubr.f32.gmra.mrb[8].mxu1 %v390_v12  ;;  %v370_v10 = vld [vmem:[%s4221_s6 + $0x140] sm:$0xff] }
  0x46   : > { %3676 = vmatprep.mubr.msk.f32.mxu0 %vm432_vm0, %v341_v11  ;;  %3797 = vmatpush1.bf16.msra.mxu0 %v4008_v0  ;;  %v373_v11 = vld [vmem:[%s4221_s6 + $0x158] sm:$0xff]  ;;  %v422_v12 = vld [vmem:[%s4221_s6 + $0x2e0] sm:$0xff] }
  0x47   : > { %3702 = vmatprep.mubr.msk.f32.mxu1 %vm432_vm0, %v393_v13  ;;  %3767 = vmatpush1.bf16.msra.mxu1 %v4008_v0  ;;  %v425_v13 = vld [vmem:[%s4221_s6 + $0x2f8] sm:$0xff] }
  0x48   : > { %3768 = vmatprep.subr.bf16.mxu1 %v4007_v62  ;;  %3798 = vmatprep.subr.bf16.mxu0 %v4007_v62 }
  0x49   : > { %681 = vmatmul.mubr.f32.gmra.mrb[10].mxu0 %v340_v14  ;;  %837 = vmatmul.mubr.f32.gmra.mrb[10].mxu1 %v392_v16  ;;  %v372_v14 = vld [vmem:[%s4221_s6 + $0x150] sm:$0xff] }
  0x4a   : > { %3677 = vmatprep.mubr.msk.f32.mxu0 %vm432_vm0, %v343_v15  ;;  %3799 = vmatpush1.bf16.msra.mxu0 %v4008_v0  ;;  %v375_v15 = vld [vmem:[%s4221_s6 + $0x168] sm:$0xff]  ;;  %v424_v16 = vld [vmem:[%s4221_s6 + $0x2f0] sm:$0xff] }
  0x4b   : > { %3703 = vmatprep.mubr.msk.f32.mxu1 %vm432_vm0, %v395_v17  ;;  %3769 = vmatpush1.bf16.msra.mxu1 %v4008_v0  ;;  %v427_v17 = vld [vmem:[%s4221_s6 + $0x308] sm:$0xff] }
  0x4c   : > { %3770 = vmatprep.subr.bf16.mxu1 %v4007_v62  ;;  %3800 = vmatprep.subr.bf16.mxu0 %v4007_v62 }
  0x4d   : > { %687 = vmatmul.mubr.f32.gmra.mrb[12].mxu0 %v342_v18  ;;  %843 = vmatmul.mubr.f32.gmra.mrb[12].mxu1 %v394_v20  ;;  %v374_v18 = vld [vmem:[%s4221_s6 + $0x160] sm:$0xff] }
  0x4e   : > { %3678 = vmatprep.mubr.msk.f32.mxu0 %vm432_vm0, %v345_v19  ;;  %3801 = vmatpush1.bf16.msra.mxu0 %v4008_v0  ;;  %v377_v19 = vld [vmem:[%s4221_s6 + $0x178] sm:$0xff]  ;;  %v426_v20 = vld [vmem:[%s4221_s6 + $0x300] sm:$0xff] }
  0x4f   : > { %3704 = vmatprep.mubr.msk.f32.mxu1 %vm432_vm0, %v397_v21  ;;  %3771 = vmatpush1.bf16.msra.mxu1 %v4008_v0  ;;  %v429_v21 = vld [vmem:[%s4221_s6 + $0x318] sm:$0xff] }
  0x50   : > { %3772 = vmatprep.subr.bf16.mxu1 %v4007_v62  ;;  %3802 = vmatprep.subr.bf16.mxu0 %v4007_v62 }
  0x51   : > { %693 = vmatmul.mubr.f32.gmra.mrb[14].mxu0 %v344_v22  ;;  %849 = vmatmul.mubr.f32.gmra.mrb[14].mxu1 %v396_v24  ;;  %v376_v22 = vld [vmem:[%s4221_s6 + $0x170] sm:$0xff] }
  0x52   : > { %3679 = vmatprep.mubr.msk.f32.mxu0 %vm432_vm0, %v347_v23  ;;  %3803 = vmatpush1.bf16.msra.mxu0 %v4008_v0  ;;  %v379_v23 = vld [vmem:[%s4221_s6 + $0x188] sm:$0xff]  ;;  %v428_v24 = vld [vmem:[%s4221_s6 + $0x310] sm:$0xff] }
  0x53   : > { %3705 = vmatprep.mubr.msk.f32.mxu1 %vm432_vm0, %v399_v25  ;;  %3773 = vmatpush1.bf16.msra.mxu1 %v4008_v0  ;;  %v431_v25 = vld [vmem:[%s4221_s6 + $0x328] sm:$0xff] }
  0x54   : > { %3774 = vmatprep.subr.bf16.mxu1 %v4007_v62  ;;  %3804 = vmatprep.subr.bf16.mxu0 %v4007_v62 }
  0x55   : > { %699 = vmatmul.mubr.f32.gmra.mrb[16].mxu0 %v346_v26  ;;  %855 = vmatmul.mubr.f32.gmra.mrb[16].mxu1 %v398_v28  ;;  %v378_v26 = vld [vmem:[%s4221_s6 + $0x180] sm:$0xff] }
  0x56   : > { %3680 = vmatprep.mubr.msk.f32.mxu0 %vm432_vm0, %v349_v27  ;;  %3805 = vmatpush1.bf16.msra.mxu0 %v4008_v0  ;;  %v381_v27 = vld [vmem:[%s4221_s6 + $0x198] sm:$0xff]  ;;  %v430_v28 = vld [vmem:[%s4221_s6 + $0x320] sm:$0xff] }
  0x57   : > { %3706 = vmatprep.mubr.msk.f32.mxu1 %vm432_vm0, %v401_v29  ;;  %3775 = vmatpush1.bf16.msra.mxu1 %v4008_v0  ;;  %v380_v29 = vld [vmem:[%s4221_s6 + $0x190] sm:$0xff] }
  0x58   : > { %3776 = vmatprep.subr.bf16.mxu1 %v4007_v62  ;;  %3806 = vmatprep.subr.bf16.mxu0 %v4007_v62 }
  0x59   : > { %705 = vmatmul.mubr.f32.gmra.mrb[18].mxu0 %v348_v30  ;;  %861 = vmatmul.mubr.f32.gmra.mrb[18].mxu1 %v400_v32 }
  0x5a   : > { %3681 = vmatprep.mubr.msk.f32.mxu0 %vm432_vm0, %v351_v31  ;;  %3807 = vmatpush1.bf16.msra.mxu0 %v4008_v0 }
  0x5b   : > { %3707 = vmatprep.mubr.msk.f32.mxu1 %vm432_vm0, %v403_v33  ;;  %3777 = vmatpush1.bf16.msra.mxu1 %v4008_v0 }
  0x5c   : > { %3778 = vmatprep.subr.bf16.mxu1 %v4007_v62  ;;  %3808 = vmatprep.subr.bf16.mxu0 %v4007_v62 }
  0x5d   : > { %711 = vmatmul.mubr.f32.gmra.mrb[20].mxu0 %v350_v34  ;;  %867 = vmatmul.mubr.f32.gmra.mrb[20].mxu1 %v402_v36 }
  0x5e   : > { %3682 = vmatprep.mubr.msk.f32.mxu0 %vm432_vm0, %v353_v35  ;;  %3809 = vmatpush1.bf16.msra.mxu0 %v4008_v0 }
  0x5f   : > { %3708 = vmatprep.mubr.msk.f32.mxu1 %vm432_vm0, %v405_v37  ;;  %3779 = vmatpush1.bf16.msra.mxu1 %v4008_v0 }
  0x60   : > { %3780 = vmatprep.subr.bf16.mxu1 %v4007_v62  ;;  %3810 = vmatprep.subr.bf16.mxu0 %v4007_v62 }
  0x61   : > { %717 = vmatmul.mubr.f32.gmra.mrb[22].mxu0 %v352_v38  ;;  %873 = vmatmul.mubr.f32.gmra.mrb[22].mxu1 %v404_v40 }
  0x62   : > { %3683 = vmatprep.mubr.msk.f32.mxu0 %vm432_vm0, %v355_v39  ;;  %3811 = vmatpush1.bf16.msra.mxu0 %v4008_v0 }
  0x63   : > { %3709 = vmatprep.mubr.msk.f32.mxu1 %vm432_vm0, %v407_v41  ;;  %3781 = vmatpush1.bf16.msra.mxu1 %v4008_v0 }
  0x64   : > { %3782 = vmatprep.subr.bf16.mxu1 %v4007_v62  ;;  %3812 = vmatprep.subr.bf16.mxu0 %v4007_v62 }
  0x65   : > { %723 = vmatmul.mubr.f32.gmra.mrb[24].mxu0 %v354_v42  ;;  %879 = vmatmul.mubr.f32.gmra.mrb[24].mxu1 %v406_v44 }
  0x66   : > { %3684 = vmatprep.mubr.msk.f32.mxu0 %vm432_vm0, %v357_v43  ;;  %3813 = vmatpush1.bf16.msra.mxu0 %v4008_v0 }
  0x67   : > { %3710 = vmatprep.mubr.msk.f32.mxu1 %vm432_vm0, %v409_v45  ;;  %3783 = vmatpush1.bf16.msra.mxu1 %v4008_v0 }
  0x68   : > { %3784 = vmatprep.subr.bf16.mxu1 %v4007_v62  ;;  %3814 = vmatprep.subr.bf16.mxu0 %v4007_v62 }
  0x69   : > { %729 = vmatmul.mubr.f32.gmra.mrb[26].mxu0 %v356_v46  ;;  %885 = vmatmul.mubr.f32.gmra.mrb[26].mxu1 %v408_v48 }
  0x6a   : > { %3685 = vmatprep.mubr.msk.f32.mxu0 %vm432_vm0, %v359_v47  ;;  %3815 = vmatpush1.bf16.msra.mxu0 %v4008_v0 }
  0x6b   : > { %3711 = vmatprep.mubr.msk.f32.mxu1 %vm432_vm0, %v411_v49  ;;  %3785 = vmatpush1.bf16.msra.mxu1 %v4008_v0 }
  0x6c   : > { %3786 = vmatprep.subr.bf16.mxu1 %v4007_v62  ;;  %3816 = vmatprep.subr.bf16.mxu0 %v4007_v62 }
  0x6d   : > { %735 = vmatmul.mubr.f32.gmra.mrb[28].mxu0 %v358_v50  ;;  %891 = vmatmul.mubr.f32.gmra.mrb[28].mxu1 %v410_v52 }
  0x6e   : > { %3686 = vmatprep.mubr.msk.f32.mxu0 %vm432_vm0, %v361_v51  ;;  %3817 = vmatpush1.bf16.msra.mxu0 %v4008_v0 }
  0x6f   : > { %3712 = vmatprep.mubr.msk.f32.mxu1 %vm432_vm0, %v413_v53  ;;  %3787 = vmatpush1.bf16.msra.mxu1 %v4008_v0 }
  0x70   : > { %3788 = vmatprep.subr.bf16.mxu1 %v4007_v62  ;;  %3818 = vmatprep.subr.bf16.mxu0 %v4007_v62 }
  0x71   : > { %741 = vmatmul.mubr.f32.gmra.mrb[30].mxu0 %v360_v54  ;;  %897 = vmatmul.mubr.f32.gmra.mrb[30].mxu1 %v412_v56 }
  0x72   : > { %3687 = vmatprep.mubr.msk.f32.mxu0 %vm432_vm0, %v363_v55  ;;  %3819 = vmatpush1.bf16.msra.mxu0 %v4008_v0 }
  0x73   : > { %3713 = vmatprep.mubr.msk.f32.mxu1 %vm432_vm0, %v415_v57  ;;  %3789 = vmatpush1.bf16.msra.mxu1 %v4008_v0 }
  0x74   : > { %3820 = vmatprep.subr.bf16.mxu0 %v4007_v62  ;;  %v366_v62 = vld [vmem:[%s4221_s6 + $0x120] sm:$0xff] }
  0x75   : > { %747 = vmatmul.mubr.f32.gmra.mrb[32].mxu0 %v362_v58  ;;  %903 = vmatmul.mubr.f32.gmra.mrb[32].mxu1 %v414_v60 }
  0x76   : > { %3688 = vmatprep.mubr.msk.f32.mxu0 %vm432_vm0, %v365_v59  ;;  %3821 = vmatpush1.bf16.msra.mxu0 %v4008_v0  ;;  %v421_v0 = vld [vmem:[%s4221_s6 + $0x2d8] sm:$0xff]  ;;  %s3668_s6 = sshll.u32 %s6745_s23, 3 }
  0x77   : > { %3714 = vmatprep.mubr.msk.f32.mxu1 %vm432_vm0, %v417_v61  ;;  %s5154_s17 = scalar_lea.vmem %s6121_s3, %s3668_s6 }
  0x79   : > { %753 = vmatmul.mubr.f32.gmra.mrb[34].mxu0 %v364_v63  ;;  %909 = vmatmul.mubr.f32.gmra.mrb[34].mxu1 %v416_v2 }
  0x7a   : > { %3689 = vmatprep.mubr.msk.f32.mxu0 %vm432_vm0, %v367_v1  ;;  %3715 = vmatprep.mubr.msk.f32.mxu1 %vm432_vm0, %v419_v3 }
  0x7d   : > { %759 = vmatmul.mubr.f32.gmra.mrb[36].mxu0 %v366_v62  ;;  %915 = vmatmul.mubr.f32.gmra.mrb[36].mxu1 %v418_v5 }
  0x7e   : > { %3690 = vmatprep.mubr.msk.f32.mxu0 %vm432_vm0, %v369_v4  ;;  %3716 = vmatprep.mubr.msk.f32.mxu1 %vm432_vm0, %v421_v0 }
  0x81   : > { %765 = vmatmul.mubr.f32.gmra.mrb[38].mxu0 %v368_v6  ;;  %921 = vmatmul.mubr.f32.gmra.mrb[38].mxu1 %v420_v8 }
  0x82   : > { %3691 = vmatprep.mubr.msk.f32.mxu0 %vm432_vm0, %v371_v7  ;;  %3717 = vmatprep.mubr.msk.f32.mxu1 %vm432_vm0, %v423_v9 }
  0x85   : > { %771 = vmatmul.mubr.f32.gmra.mrb[40].mxu0 %v370_v10  ;;  %927 = vmatmul.mubr.f32.gmra.mrb[40].mxu1 %v422_v12 }
  0x86   : > { %3692 = vmatprep.mubr.msk.f32.mxu0 %vm432_vm0, %v373_v11  ;;  %3718 = vmatprep.mubr.msk.f32.mxu1 %vm432_vm0, %v425_v13 }
  0x89   : > { %777 = vmatmul.mubr.f32.gmra.mrb[42].mxu0 %v372_v14  ;;  %933 = vmatmul.mubr.f32.gmra.mrb[42].mxu1 %v424_v16 }
  0x8a   : > { %3693 = vmatprep.mubr.msk.f32.mxu0 %vm432_vm0, %v375_v15  ;;  %3719 = vmatprep.mubr.msk.f32.mxu1 %vm432_vm0, %v427_v17 }
  0x8d   : > { %783 = vmatmul.mubr.f32.gmra.mrb[44].mxu0 %v374_v18  ;;  %939 = vmatmul.mubr.f32.gmra.mrb[44].mxu1 %v426_v20 }
  0x8e   : > { %3694 = vmatprep.mubr.msk.f32.mxu0 %vm432_vm0, %v377_v19  ;;  %3720 = vmatprep.mubr.msk.f32.mxu1 %vm432_vm0, %v429_v21 }
  0x91   : > { %789 = vmatmul.mubr.f32.gmra.mrb[46].mxu0 %v376_v22  ;;  %945 = vmatmul.mubr.f32.gmra.mrb[46].mxu1 %v428_v24 }
  0x92   : > { %3695 = vmatprep.mubr.msk.f32.mxu0 %vm432_vm0, %v379_v23  ;;  %3721 = vmatprep.mubr.msk.f32.mxu1 %vm432_vm0, %v431_v25 }
  0x95   : > { %795 = vmatmul.mubr.f32.gmra.mrb[48].mxu0 %v378_v26  ;;  %951 = vmatmul.mubr.f32.gmra.mrb[48].mxu1 %v430_v28 }
  0x96   : > { %3696 = vmatprep.mubr.msk.f32.mxu0 %vm432_vm0, %v381_v27 }
  0x99   : > { %801 = vmatmul.mubr.f32.gmra.mrb[50].mxu0 %v380_v29 }
 0x108   : > { %v4482_v30 = vpop.f32.mrb[0].mxu0  ;;  %v4487_v32 = vpop.f32.mrb[0].mxu1 }
 0x109   : > { %6348 = vst [vmem:[#allocation2_spill] sm:$0xff] %v4482_v30  ;;  %v4484_v31 = vpop.f32.mrb[1].mxu0  ;;  %6350 = vst [vmem:[#allocation4_spill] sm:$0xff] %v4487_v32  ;;  %v4490_v33 = vpop.f32.mrb[1].mxu1 }
 0x10a   : > { %6349 = vst [vmem:[#allocation3_spill] sm:$0xff] %v4484_v31  ;;  %1021 = vmatprep.mubr.f32.mxu1 %v4484_v31  ;;  %6351 = vst [vmem:[#allocation5_spill] sm:$0xff] %v4490_v33 }
 0x10b   : > { %1022 = vmatmul.mubr.f32.vlgmr.msra.gmra.mrb[50].mxu1 %v4482_v30 }
 0x10c   : > { %v4492_v34 = vpop.f32.mrb[2].mxu0  ;;  %v4497_v36 = vpop.f32.mrb[2].mxu1 }
 0x10d   : > { %6352 = vst [vmem:[#allocation6_spill] sm:$0xff] %v4492_v34  ;;  %v4494_v35 = vpop.f32.mrb[3].mxu0  ;;  %6354 = vst [vmem:[#allocation8_spill] sm:$0xff] %v4497_v36  ;;  %v4500_v37 = vpop.f32.mrb[3].mxu1 }
 0x10e   : > { %6353 = vst [vmem:[#allocation7_spill] sm:$0xff] %v4494_v35  ;;  %1026 = vmatprep.mubr.f32.mxu1 %v4494_v35  ;;  %6355 = vst [vmem:[#allocation9_spill] sm:$0xff] %v4500_v37 }
 0x10f   : > { %1027 = vmatmul.mubr.f32.gmra.mrb[52].mxu1 %v4492_v34 }
 0x110   : > { %v4502_v38 = vpop.f32.mrb[4].mxu0  ;;  %v4507_v40 = vpop.f32.mrb[4].mxu1 }
 0x111   : > { %6356 = vst [vmem:[#allocation10_spill] sm:$0xff] %v4502_v38  ;;  %v4504_v39 = vpop.f32.mrb[5].mxu0  ;;  %v4510_v41 = vpop.f32.mrb[5].mxu1 }
 0x112   : > { %6357 = vst [vmem:[#allocation11_spill] sm:$0xff] %v4504_v39  ;;  %1031 = vmatprep.mubr.f32.mxu1 %v4504_v39 }
 0x113   : > { %1032 = vmatmul.mubr.f32.gmra.mrb[54].mxu1 %v4502_v38 }
 0x114   : > { %v4512_v42 = vpop.f32.mrb[6].mxu0  ;;  %v4517_v44 = vpop.f32.mrb[6].mxu1 }
 0x115   : > { %6358 = vst [vmem:[#allocation12_spill] sm:$0xff] %v4512_v42  ;;  %v4514_v43 = vpop.f32.mrb[7].mxu0  ;;  %v4520_v45 = vpop.f32.mrb[7].mxu1 }
 0x116   : > { %6359 = vst [vmem:[#allocation13_spill] sm:$0xff] %v4514_v43  ;;  %1036 = vmatprep.mubr.f32.mxu1 %v4514_v43 }
 0x117   : > { %1037 = vmatmul.mubr.f32.gmra.mrb[56].mxu1 %v4512_v42 }
 0x118   : > { %v4522_v46 = vpop.f32.mrb[8].mxu0  ;;  %v4527_v48 = vpop.f32.mrb[8].mxu1 }
 0x119   : > { %6360 = vst [vmem:[#allocation14_spill] sm:$0xff] %v4522_v46  ;;  %v4524_v47 = vpop.f32.mrb[9].mxu0  ;;  %v4530_v49 = vpop.f32.mrb[9].mxu1 }
 0x11a   : > { %6361 = vst [vmem:[#allocation15_spill] sm:$0xff] %v4524_v47  ;;  %1041 = vmatprep.mubr.f32.mxu1 %v4524_v47 }
 0x11b   : > { %1042 = vmatmul.mubr.f32.gmra.mrb[58].mxu1 %v4522_v46 }
 0x11c   : > { %v4532_v50 = vpop.f32.mrb[10].mxu0  ;;  %v4537_v52 = vpop.f32.mrb[10].mxu1 }
 0x11d   : > { %6362 = vst [vmem:[#allocation16_spill] sm:$0xff] %v4532_v50  ;;  %v4534_v51 = vpop.f32.mrb[11].mxu0  ;;  %v4540_v53 = vpop.f32.mrb[11].mxu1 }
 0x11e   : > { %6363 = vst [vmem:[#allocation17_spill] sm:$0xff] %v4534_v51  ;;  %1046 = vmatprep.mubr.f32.mxu1 %v4534_v51 }
 0x11f   : > { %1047 = vmatmul.mubr.f32.gmra.mrb[60].mxu1 %v4532_v50 }
 0x120   : > { %v4542_v54 = vpop.f32.mrb[12].mxu0  ;;  %v4547_v56 = vpop.f32.mrb[12].mxu1 }
 0x121   : > { %6364 = vst [vmem:[#allocation18_spill] sm:$0xff] %v4542_v54  ;;  %v4544_v55 = vpop.f32.mrb[13].mxu0  ;;  %v4550_v57 = vpop.f32.mrb[13].mxu1 }
 0x122   : > { %6365 = vst [vmem:[#allocation19_spill] sm:$0xff] %v4544_v55  ;;  %1051 = vmatprep.mubr.f32.mxu1 %v4544_v55 }
 0x123   : > { %1052 = vmatmul.mubr.f32.gmra.mrb[62].mxu1 %v4542_v54 }
 0x124   : > { %v4552_v58 = vpop.f32.mrb[14].mxu0  ;;  %v4557_v60 = vpop.f32.mrb[14].mxu1 }
 0x125   : > { %6366 = vst [vmem:[#allocation20_spill] sm:$0xff] %v4552_v58  ;;  %v4554_v59 = vpop.f32.mrb[15].mxu0  ;;  %6368 = vst [vmem:[#allocation22_spill] sm:$0xff] %v4557_v60  ;;  %v4560_v61 = vpop.f32.mrb[15].mxu1 }
 0x126   : > { %6367 = vst [vmem:[#allocation21_spill] sm:$0xff] %v4554_v59  ;;  %1056 = vmatprep.mubr.f32.mxu1 %v4554_v59  ;;  %6369 = vst [vmem:[#allocation23_spill] sm:$0xff] %v4560_v61 }
 0x127   : > { %1057 = vmatmul.mubr.f32.gmra.mrb[64].mxu1 %v4552_v58 }
 0x128   : > { %v4562_v63 = vpop.f32.mrb[16].mxu0  ;;  %v4567_v2 = vpop.f32.mrb[16].mxu1 }
 0x129   : > { %6370 = vst [vmem:[#allocation24_spill] sm:$0xff] %v4562_v63  ;;  %v4564_v1 = vpop.f32.mrb[17].mxu0  ;;  %6372 = vst [vmem:[#allocation26_spill] sm:$0xff] %v4567_v2  ;;  %v4570_v3 = vpop.f32.mrb[17].mxu1 }
 0x12a   : > { %6371 = vst [vmem:[#allocation25_spill] sm:$0xff] %v4564_v1  ;;  %1061 = vmatprep.mubr.f32.mxu1 %v4564_v1  ;;  %6373 = vst [vmem:[#allocation27_spill] sm:$0xff] %v4570_v3 }
 0x12b   : > { %1062 = vmatmul.mubr.f32.gmra.mrb[66].mxu1 %v4562_v63 }
 0x12c   : > { %v4572_v62 = vpop.f32.mrb[18].mxu0  ;;  %v4577_v5 = vpop.f32.mrb[18].mxu1 }
 0x12d   : > { %6374 = vst [vmem:[#allocation28_spill] sm:$0xff] %v4572_v62  ;;  %v4574_v4 = vpop.f32.mrb[19].mxu0  ;;  %6376 = vst [vmem:[#allocation30_spill] sm:$0xff] %v4577_v5  ;;  %v4580_v0 = vpop.f32.mrb[19].mxu1 }
 0x12e   : > { %6375 = vst [vmem:[#allocation29_spill] sm:$0xff] %v4574_v4  ;;  %1066 = vmatprep.mubr.f32.mxu1 %v4574_v4  ;;  %6377 = vst [vmem:[#allocation31_spill] sm:$0xff] %v4580_v0 }
 0x12f   : > { %1067 = vmatmul.mubr.f32.gmra.mrb[68].mxu1 %v4572_v62 }
 0x130   : > { %v4582_v6 = vpop.f32.mrb[20].mxu0  ;;  %v4587_v8 = vpop.f32.mrb[20].mxu1 }
 0x131   : > { %6378 = vst [vmem:[#allocation32_spill] sm:$0xff] %v4582_v6  ;;  %v4584_v7 = vpop.f32.mrb[21].mxu0  ;;  %6380 = vst [vmem:[#allocation34_spill] sm:$0xff] %v4587_v8  ;;  %v4590_v9 = vpop.f32.mrb[21].mxu1 }
 0x132   : > { %6379 = vst [vmem:[#allocation33_spill] sm:$0xff] %v4584_v7  ;;  %1071 = vmatprep.mubr.f32.mxu1 %v4584_v7  ;;  %6381 = vst [vmem:[#allocation35_spill] sm:$0xff] %v4590_v9 }
 0x133   : > { %1072 = vmatmul.mubr.f32.gmra.mrb[70].mxu1 %v4582_v6 }
 0x134   : > { %v4592_v10 = vpop.f32.mrb[22].mxu0  ;;  %v4597_v12 = vpop.f32.mrb[22].mxu1 }
 0x135   : > { %6382 = vst [vmem:[#allocation36_spill] sm:$0xff] %v4592_v10  ;;  %v4594_v11 = vpop.f32.mrb[23].mxu0  ;;  %6384 = vst [vmem:[#allocation38_spill] sm:$0xff] %v4597_v12  ;;  %v4600_v13 = vpop.f32.mrb[23].mxu1 }
 0x136   : > { %6383 = vst [vmem:[#allocation37_spill] sm:$0xff] %v4594_v11  ;;  %1076 = vmatprep.mubr.f32.mxu1 %v4594_v11  ;;  %6385 = vst [vmem:[#allocation39_spill] sm:$0xff] %v4600_v13 }
 0x137   : > { %1077 = vmatmul.mubr.f32.gmra.mrb[72].mxu1 %v4592_v10 }
 0x138   : > { %v4602_v14 = vpop.f32.mrb[24].mxu0  ;;  %v4607_v16 = vpop.f32.mrb[24].mxu1 }
 0x139   : > { %6386 = vst [vmem:[#allocation40_spill] sm:$0xff] %v4602_v14  ;;  %v4604_v15 = vpop.f32.mrb[25].mxu0  ;;  %6388 = vst [vmem:[#allocation42_spill] sm:$0xff] %v4607_v16  ;;  %v4610_v17 = vpop.f32.mrb[25].mxu1 }
 0x13a   : > { %6387 = vst [vmem:[#allocation41_spill] sm:$0xff] %v4604_v15  ;;  %1081 = vmatprep.mubr.f32.mxu1 %v4604_v15  ;;  %6389 = vst [vmem:[#allocation43_spill] sm:$0xff] %v4610_v17 }
 0x13b   : > { %1082 = vmatmul.mubr.f32.gmra.mrb[74].mxu1 %v4602_v14 }
 0x13c   : > { %v4612_v18 = vpop.f32.mrb[26].mxu0  ;;  %v4617_v20 = vpop.f32.mrb[26].mxu1 }
 0x13d   : > { %6390 = vst [vmem:[#allocation44_spill] sm:$0xff] %v4612_v18  ;;  %v4614_v19 = vpop.f32.mrb[27].mxu0  ;;  %6392 = vst [vmem:[#allocation46_spill] sm:$0xff] %v4617_v20  ;;  %v4620_v21 = vpop.f32.mrb[27].mxu1 }
 0x13e   : > { %6391 = vst [vmem:[#allocation45_spill] sm:$0xff] %v4614_v19  ;;  %1086 = vmatprep.mubr.f32.mxu1 %v4614_v19  ;;  %6393 = vst [vmem:[#allocation47_spill] sm:$0xff] %v4620_v21 }
 0x13f   : > { %1087 = vmatmul.mubr.f32.gmra.mrb[76].mxu1 %v4612_v18 }
 0x140   : > { %v4622_v22 = vpop.f32.mrb[28].mxu0  ;;  %v4627_v24 = vpop.f32.mrb[28].mxu1 }
 0x141   : > { %6394 = vst [vmem:[#allocation48_spill] sm:$0xff] %v4622_v22  ;;  %v4624_v23 = vpop.f32.mrb[29].mxu0  ;;  %6396 = vst [vmem:[#allocation50_spill] sm:$0xff] %v4627_v24  ;;  %v4630_v25 = vpop.f32.mrb[29].mxu1 }
 0x142   : > { %6395 = vst [vmem:[#allocation49_spill] sm:$0xff] %v4624_v23  ;;  %1091 = vmatprep.mubr.f32.mxu1 %v4624_v23  ;;  %6397 = vst [vmem:[#allocation51_spill] sm:$0xff] %v4630_v25 }
 0x143   : > { %1092 = vmatmul.mubr.f32.gmra.mrb[78].mxu1 %v4622_v22 }
 0x144   : > { %v4632_v26 = vpop.f32.mrb[30].mxu0  ;;  %v4637_v28 = vpop.f32.mrb[30].mxu1 }
 0x145   : > { %6398 = vst [vmem:[#allocation52_spill] sm:$0xff] %v4632_v26  ;;  %v4634_v27 = vpop.f32.mrb[31].mxu0  ;;  %6400 = vst [vmem:[#allocation54_spill] sm:$0xff] %v4637_v28  ;;  %v4640_v29 = vpop.f32.mrb[31].mxu1 }
 0x146   : > { %6399 = vst [vmem:[#allocation53_spill] sm:$0xff] %v4634_v27  ;;  %1096 = vmatprep.mubr.f32.mxu1 %v4634_v27  ;;  %6401 = vst [vmem:[#allocation55_spill] sm:$0xff] %v4640_v29 }
 0x147   : > { %1097 = vmatmul.mubr.f32.gmra.mrb[80].mxu1 %v4632_v26 }
 0x148   : > { %v4642_v19 = vpop.f32.mrb[32].mxu0  ;;  %v4647_v22 = vpop.f32.mrb[32].mxu1 }
 0x149   : > { %6402 = vst [vmem:[#allocation56_spill] sm:$0xff] %v4642_v19  ;;  %v4644_v23 = vpop.f32.mrb[33].mxu0  ;;  %6404 = vst [vmem:[#allocation58_spill] sm:$0xff] %v4647_v22  ;;  %v4650_v18 = vpop.f32.mrb[33].mxu1 }
 0x14a   : > { %6403 = vst [vmem:[#allocation57_spill] sm:$0xff] %v4644_v23  ;;  %1101 = vmatprep.mubr.f32.mxu1 %v4644_v23  ;;  %6405 = vst [vmem:[#allocation59_spill] sm:$0xff] %v4650_v18 }
 0x14b   : > { %1102 = vmatmul.mubr.f32.gmra.mrb[82].mxu1 %v4642_v19 }
 0x14c   : > { %v4652_v15 = vpop.f32.mrb[34].mxu0  ;;  %v4657_v26 = vpop.f32.mrb[34].mxu1 }
 0x14d   : > { %6406 = vst [vmem:[#allocation60_spill] sm:$0xff] %v4652_v15  ;;  %v4654_v27 = vpop.f32.mrb[35].mxu0  ;;  %6408 = vst [vmem:[#allocation62_spill] sm:$0xff] %v4657_v26  ;;  %v4660_v14 = vpop.f32.mrb[35].mxu1 }
 0x14e   : > { %6407 = vst [vmem:[#allocation61_spill] sm:$0xff] %v4654_v27  ;;  %1106 = vmatprep.mubr.f32.mxu1 %v4654_v27  ;;  %6409 = vst [vmem:[#allocation63_spill] sm:$0xff] %v4660_v14 }
 0x14f   : > { %1107 = vmatmul.mubr.f32.gmra.mrb[84].mxu1 %v4652_v15 }
 0x150   : > { %v4662_v11 = vpop.f32.mrb[36].mxu0  ;;  %v4667_v19 = vpop.f32.mrb[36].mxu1 }
 0x151   : > { %6410 = vst [vmem:[#allocation64_spill] sm:$0xff] %v4662_v11  ;;  %v4664_v23 = vpop.f32.mrb[37].mxu0  ;;  %6412 = vst [vmem:[#allocation66_spill] sm:$0xff] %v4667_v19  ;;  %v4670_v10 = vpop.f32.mrb[37].mxu1 }
 0x152   : > { %6411 = vst [vmem:[#allocation65_spill] sm:$0xff] %v4664_v23  ;;  %1111 = vmatprep.mubr.f32.mxu1 %v4664_v23  ;;  %6413 = vst [vmem:[#allocation67_spill] sm:$0xff] %v4670_v10 }
 0x153   : > { %1112 = vmatmul.mubr.f32.gmra.mrb[86].mxu1 %v4662_v11 }
 0x154   : > { %v4672_v7 = vpop.f32.mrb[38].mxu0  ;;  %v4677_v15 = vpop.f32.mrb[38].mxu1 }
 0x155   : > { %6414 = vst [vmem:[#allocation68_spill] sm:$0xff] %v4672_v7  ;;  %v4674_v27 = vpop.f32.mrb[39].mxu0  ;;  %6416 = vst [vmem:[#allocation70_spill] sm:$0xff] %v4677_v15  ;;  %v4680_v6 = vpop.f32.mrb[39].mxu1 }
 0x156   : > { %6415 = vst [vmem:[#allocation69_spill] sm:$0xff] %v4674_v27  ;;  %1116 = vmatprep.mubr.f32.mxu1 %v4674_v27  ;;  %6417 = vst [vmem:[#allocation71_spill] sm:$0xff] %v4680_v6 }
 0x157   : > { %1117 = vmatmul.mubr.f32.gmra.mrb[88].mxu1 %v4672_v7 }
 0x158   : > { %v4682_v4 = vpop.f32.mrb[40].mxu0  ;;  %v4687_v11 = vpop.f32.mrb[40].mxu1 }
 0x159   : > { %6418 = vst [vmem:[#allocation72_spill] sm:$0xff] %v4682_v4  ;;  %v4684_v23 = vpop.f32.mrb[41].mxu0  ;;  %6420 = vst [vmem:[#allocation74_spill] sm:$0xff] %v4687_v11  ;;  %v4690_v62 = vpop.f32.mrb[41].mxu1 }
 0x15a   : > { %6419 = vst [vmem:[#allocation73_spill] sm:$0xff] %v4684_v23  ;;  %1121 = vmatprep.mubr.f32.mxu1 %v4684_v23  ;;  %6421 = vst [vmem:[#allocation75_spill] sm:$0xff] %v4690_v62  ;;  %v6187_v23 = vmov 0  }
 0x15b   : > { %1122 = vmatmul.mubr.f32.gmra.mrb[90].mxu1 %v4682_v4  ;;  %3853 = vset.pattern.permute.xlu0 %v6187_v23 }
 0x15c   : > { %v4692_v1 = vpop.f32.mrb[42].mxu0  ;;  %v4697_v7 = vpop.f32.mrb[42].mxu1  ;;  %3854 = vset.pattern.permute.xlu1 %v6187_v23 }
 0x15d   : > { %6422 = vst [vmem:[#allocation76_spill] sm:$0xff] %v4692_v1  ;;  %v4694_v27 = vpop.f32.mrb[43].mxu0  ;;  %6424 = vst [vmem:[#allocation78_spill] sm:$0xff] %v4697_v7  ;;  %v4700_v63 = vpop.f32.mrb[43].mxu1 }
 0x15e   : > { %6423 = vst [vmem:[#allocation77_spill] sm:$0xff] %v4694_v27  ;;  %1126 = vmatprep.mubr.f32.mxu1 %v4694_v27  ;;  %6425 = vst [vmem:[#allocation79_spill] sm:$0xff] %v4700_v63 }
 0x15f   : > { %1127 = vmatmul.mubr.f32.gmra.mrb[92].mxu1 %v4692_v1 }
 0x160   : > { %v4702_v59 = vpop.f32.mrb[44].mxu0  ;;  %v4709_v58 = vpop.f32.mrb[44].mxu1 }
 0x161   : > { %6426 = vst [vmem:[#allocation80_spill] sm:$0xff] %v4702_v59  ;;  %v4706_v4 = vpop.f32.mrb[45].mxu0  ;;  %6428 = vst [vmem:[#allocation82_spill] sm:$0xff] %v4709_v58  ;;  %v4712_v27 = vpop.f32.mrb[45].mxu1 }
 0x162   : > { %6427 = vst [vmem:[#allocation81_spill] sm:$0xff] %v4706_v4  ;;  %1131 = vmatprep.mubr.f32.mxu1 %v4706_v4  ;;  %6429 = vst [vmem:[#allocation83_spill] sm:$0xff] %v4712_v27 }
 0x163   : > { %1132 = vmatmul.mubr.f32.gmra.mrb[94].mxu1 %v4702_v59 }
 0x164   : > { %v4714_v1 = vpop.f32.mrb[46].mxu0  ;;  %v4719_v54 = vpop.f32.mrb[46].mxu1 }
 0x165   : > { %6430 = vst [vmem:[#allocation84_spill] sm:$0xff] %v4714_v1  ;;  %v4716_v55 = vpop.f32.mrb[47].mxu0  ;;  %6432 = vst [vmem:[#allocation86_spill] sm:$0xff] %v4719_v54  ;;  %v4722_v23 = vpop.f32.mrb[47].mxu1 }
 0x166   : > { %6431 = vst [vmem:[#allocation85_spill] sm:$0xff] %v4716_v55  ;;  %1136 = vmatprep.mubr.f32.mxu1 %v4716_v55  ;;  %6433 = vst [vmem:[#allocation87_spill] sm:$0xff] %v4722_v23 }
 0x167   : > { %1137 = vmatmul.mubr.f32.gmra.mrb[96].mxu1 %v4714_v1 }
 0x168   : > { %v4724_v51 = vpop.f32.mrb[48].mxu0  ;;  %v4729_v59 = vpop.f32.mrb[48].mxu1 }
 0x169   : > { %6434 = vst [vmem:[#allocation88_spill] sm:$0xff] %v4724_v51  ;;  %v4726_v4 = vpop.f32.mrb[49].mxu0  ;;  %6436 = vst [vmem:[#allocation90_spill] sm:$0xff] %v4729_v59  ;;  %v4732_v50 = vpop.f32.mrb[49].mxu1 }
 0x16a   : > { %6435 = vst [vmem:[#allocation89_spill] sm:$0xff] %v4726_v4  ;;  %1141 = vmatprep.mubr.f32.mxu1 %v4726_v4  ;;  %6437 = vst [vmem:[#allocation91_spill] sm:$0xff] %v4732_v50 }
 0x16b   : > { %1142 = vmatmul.mubr.f32.gmra.mrb[98].mxu1 %v4724_v51 }
 0x16c   : > { %v4734_v47 = vpop.f32.mrb[50].mxu0 }
 0x16d   : > { %6438 = vst [vmem:[#allocation92_spill] sm:$0xff] %v4734_v47  ;;  %v4736_v55 = vpop.f32.mrb[51].mxu0 }
 0x16e   : > { %6439 = vst [vmem:[#allocation93_spill] sm:$0xff] %v4736_v55  ;;  %1146 = vmatprep.mubr.f32.mxu1 %v4736_v55 }
 0x16f   : > { %1147 = vmatmul.mubr.f32.gmra.mrb[100].mxu1 %v4734_v47 }
 0x170   : > { %1151 = vmatprep.mubr.f32.mxu1 %v4490_v33 }
 0x173   : > { %1152 = vmatmul.mubr.f32.gmra.mrb[102].mxu1 %v4487_v32 }
 0x174   : > { %1156 = vmatprep.mubr.f32.mxu1 %v4500_v37 }
 0x177   : > { %1157 = vmatmul.mubr.f32.gmra.mrb[104].mxu1 %v4497_v36 }
 0x178   : > { %1161 = vmatprep.mubr.f32.mxu1 %v4510_v41 }
 0x17b   : > { %1162 = vmatmul.mubr.f32.gmra.mrb[106].mxu1 %v4507_v40 }
 0x17c   : > { %1166 = vmatprep.mubr.f32.mxu1 %v4520_v45 }
 0x17f   : > { %1167 = vmatmul.mubr.f32.gmra.mrb[108].mxu1 %v4517_v44 }
 0x180   : > { %1171 = vmatprep.mubr.f32.mxu1 %v4530_v49 }
 0x183   : > { %1172 = vmatmul.mubr.f32.gmra.mrb[110].mxu1 %v4527_v48 }
 0x184   : > { %1176 = vmatprep.mubr.f32.mxu1 %v4540_v53 }
 0x187   : > { %1177 = vmatmul.mubr.f32.gmra.mrb[112].mxu1 %v4537_v52 }
 0x188   : > { %1181 = vmatprep.mubr.f32.mxu1 %v4550_v57 }
 0x18b   : > { %1182 = vmatmul.mubr.f32.gmra.mrb[114].mxu1 %v4547_v56 }
 0x18c   : > { %1186 = vmatprep.mubr.f32.mxu1 %v4560_v61 }
 0x18f   : > { %1187 = vmatmul.mubr.f32.gmra.mrb[116].mxu1 %v4557_v60 }
 0x190   : > { %1191 = vmatprep.mubr.f32.mxu1 %v4570_v3 }
 0x193   : > { %1192 = vmatmul.mubr.f32.gmra.mrb[118].mxu1 %v4567_v2 }
 0x194   : > { %1196 = vmatprep.mubr.f32.mxu1 %v4580_v0 }
 0x197   : > { %1197 = vmatmul.mubr.f32.gmra.mrb[120].mxu1 %v4577_v5 }
 0x198   : > { %1201 = vmatprep.mubr.f32.mxu1 %v4590_v9 }
 0x19b   : > { %1202 = vmatmul.mubr.f32.gmra.mrb[122].mxu1 %v4587_v8 }
 0x19c   : > { %1206 = vmatprep.mubr.f32.mxu1 %v4600_v13 }
 0x19f   : > { %1207 = vmatmul.mubr.f32.gmra.mrb[124].mxu1 %v4597_v12 }
 0x1a0   : > { %1211 = vmatprep.mubr.f32.mxu1 %v4610_v17 }
 0x1a3   : > { %1212 = vmatmul.mubr.f32.gmra.mrb[126].mxu1 %v4607_v16 }
 0x1a4   : > { %1216 = vmatprep.mubr.f32.mxu1 %v4620_v21 }
 0x1a7   : > { %1217 = vmatmul.mubr.f32.gmra.mrb[128].mxu1 %v4617_v20 }
 0x1a8   : > { %1221 = vmatprep.mubr.f32.mxu1 %v4630_v25 }
 0x1ab   : > { %1222 = vmatmul.mubr.f32.gmra.mrb[130].mxu1 %v4627_v24 }
 0x1ac   : > { %1226 = vmatprep.mubr.f32.mxu1 %v4640_v29 }
 0x1af   : > { %1227 = vmatmul.mubr.f32.gmra.mrb[132].mxu1 %v4637_v28 }
 0x1b0   : > { %1231 = vmatprep.mubr.f32.mxu1 %v4650_v18 }
 0x1b3   : > { %1232 = vmatmul.mubr.f32.gmra.mrb[134].mxu1 %v4647_v22 }
 0x1b4   : > { %1236 = vmatprep.mubr.f32.mxu1 %v4660_v14 }
 0x1b7   : > { %1237 = vmatmul.mubr.f32.gmra.mrb[136].mxu1 %v4657_v26 }
 0x1b8   : > { %1241 = vmatprep.mubr.f32.mxu1 %v4670_v10 }
 0x1bb   : > { %1242 = vmatmul.mubr.f32.gmra.mrb[138].mxu1 %v4667_v19 }
 0x1bc   : > { %1246 = vmatprep.mubr.f32.mxu1 %v4680_v6 }
 0x1bf   : > { %1247 = vmatmul.mubr.f32.gmra.mrb[140].mxu1 %v4677_v15  ;;  %v1328_v15 = vlaneseq }
 0x1c0   : > { %1251 = vmatprep.mubr.f32.mxu1 %v4690_v62 }
 0x1c3   : > { %1252 = vmatmul.mubr.f32.gmra.mrb[142].mxu1 %v4687_v11 }
 0x1c4   : > { %1256 = vmatprep.mubr.f32.mxu1 %v4700_v63 }
 0x1c7   : > { %1257 = vmatmul.mubr.f32.gmra.mrb[144].mxu1 %v4697_v7 }
 0x1c8   : > { %1261 = vmatprep.mubr.f32.mxu1 %v4712_v27 }
 0x1cb   : > { %1262 = vmatmul.mubr.f32.gmra.mrb[146].mxu1 %v4709_v58 }
 0x1cc   : > { %1266 = vmatprep.mubr.f32.mxu1 %v4722_v23 }
 0x1cf   : > { %1267 = vmatmul.mubr.f32.gmra.mrb[148].mxu1 %v4719_v54 }
 0x1d0   : > { %1271 = vmatprep.mubr.f32.mxu1 %v4732_v50 }
 0x1d3   : > { %1272 = vmatmul.mubr.f32.gmra.mrb[150].mxu1 %v4729_v59 }
 0x1de   : > { %v1023_v6 = vpop.f32.mrb[50].mxu1 }
 0x1df   : > { %v4790_v62 = vmul.f32 0.0051020407, %v1023_v6  ;;  %v1025_v11 = vpop.f32.mrb[51].mxu1 }
 0x1e1   : > { %6440 = vst [vmem:[#allocation94_spill] sm:$0xff] %v4790_v62  ;;  %1335 = vperm.xlu0 %3853, %v4790_v62  }
 0x1e2   : > { %v1028_v63 = vpop.f32.mrb[52].mxu1 }
 0x1e3   : > { %v4793_v7 = vmul.f32 0.0051020407, %v1028_v63  ;;  %v1030_v27 = vpop.f32.mrb[53].mxu1 }
 0x1e5   : > { %6441 = vst [vmem:[#allocation95_spill] sm:$0xff] %v4793_v7  ;;  %1340 = vperm.xlu0 %3853, %v4793_v7  }
 0x1e6   : > { %v1033_v58 = vpop.f32.mrb[54].mxu1 }
 0x1e7   : > { %v4796_v23 = vmul.f32 0.0051020407, %v1033_v58  ;;  %v1035_v54 = vpop.f32.mrb[55].mxu1 }
 0x1e9   : > { %6442 = vst [vmem:[#allocation96_spill] sm:$0xff] %v4796_v23  ;;  %1345 = vperm.xlu1 %3854, %v4796_v23  }
 0x1ea   : > { %v1038_v50 = vpop.f32.mrb[56].mxu1 }
 0x1eb   : > { %v4799_v59 = vmul.f32 0.0051020407, %v1038_v50  ;;  %v1040_v6 = vpop.f32.mrb[57].mxu1 }
 0x1ed   : > { %6443 = vst [vmem:[#allocation97_spill] sm:$0xff] %v4799_v59  ;;  %1350 = vperm.xlu1 %3854, %v4799_v59  }
 0x1ee   : > { %v1043_v11 = vpop.f32.mrb[58].mxu1 }
 0x1ef   : > { %v4802_v62 = vmul.f32 0.0051020407, %v1043_v11  ;;  %v1045_v63 = vpop.f32.mrb[59].mxu1 }
 0x1f1   : > { %6444 = vst [vmem:[#allocation98_spill] sm:$0xff] %v4802_v62  ;;  %1355 = vperm.xlu0 %3853, %v4802_v62  }
 0x1f2   : > { %v1048_v27 = vpop.f32.mrb[60].mxu1 }
 0x1f3   : > { %v4805_v7 = vmul.f32 0.0051020407, %v1048_v27  ;;  %v1050_v58 = vpop.f32.mrb[61].mxu1 }
 0x1f5   : > { %6445 = vst [vmem:[#allocation99_spill] sm:$0xff] %v4805_v7  ;;  %1360 = vperm.xlu1 %3854, %v4805_v7  }
 0x1f6   : > { %v1053_v54 = vpop.f32.mrb[62].mxu1 }
 0x1f7   : > { %v4808_v23 = vmul.f32 0.0051020407, %v1053_v54  ;;  %v1055_v50 = vpop.f32.mrb[63].mxu1 }
 0x1f9   : > { %6446 = vst [vmem:[#allocation100_spill] sm:$0xff] %v4808_v23  ;;  %1365 = vperm.xlu0 %3853, %v4808_v23  }
 0x1fa   : > { %v1058_v6 = vpop.f32.mrb[64].mxu1 }
 0x1fb   : > { %v4811_v59 = vmul.f32 0.0051020407, %v1058_v6  ;;  %v1060_v11 = vpop.f32.mrb[65].mxu1 }
 0x1fd   : > { %6447 = vst [vmem:[#allocation101_spill] sm:$0xff] %v4811_v59  ;;  %1370 = vperm.xlu1 %3854, %v4811_v59  }
 0x1fe   : > { %v1063_v63 = vpop.f32.mrb[66].mxu1 }
 0x1ff   : > { %v4814_v62 = vmul.f32 0.0051020407, %v1063_v63  ;;  %v1065_v27 = vpop.f32.mrb[67].mxu1 }
 0x201   : > { %6448 = vst [vmem:[#allocation102_spill] sm:$0xff] %v4814_v62  ;;  %1375 = vperm.xlu0 %3853, %v4814_v62  }
 0x202   : > { %v1068_v58 = vpop.f32.mrb[68].mxu1 }
 0x203   : > { %v4817_v7 = vmul.f32 0.0051020407, %v1068_v58  ;;  %v1070_v54 = vpop.f32.mrb[69].mxu1 }
 0x205   : > { %6449 = vst [vmem:[#allocation103_spill] sm:$0xff] %v4817_v7  ;;  %1380 = vperm.xlu1 %3854, %v4817_v7  }
 0x206   : > { %v1073_v50 = vpop.f32.mrb[70].mxu1 }
 0x207   : > { %v4820_v23 = vmul.f32 0.0051020407, %v1073_v50  ;;  %v1075_v6 = vpop.f32.mrb[71].mxu1 }
 0x209   : > { %6450 = vst [vmem:[#allocation104_spill] sm:$0xff] %v4820_v23  ;;  %1385 = vperm.xlu0 %3853, %v4820_v23  }
 0x20a   : > { %v1078_v11 = vpop.f32.mrb[72].mxu1 }
 0x20b   : > { %v4823_v59 = vmul.f32 0.0051020407, %v1078_v11  ;;  %v1080_v63 = vpop.f32.mrb[73].mxu1 }
 0x20d   : > { %6451 = vst [vmem:[#allocation105_spill] sm:$0xff] %v4823_v59  ;;  %1390 = vperm.xlu1 %3854, %v4823_v59  }
 0x20e   : > { %v1083_v27 = vpop.f32.mrb[74].mxu1 }
 0x20f   : > { %v4826_v62 = vmul.f32 0.0051020407, %v1083_v27  ;;  %v1085_v58 = vpop.f32.mrb[75].mxu1 }
 0x211   : > { %6452 = vst [vmem:[#allocation106_spill] sm:$0xff] %v4826_v62  ;;  %1395 = vperm.xlu0 %3853, %v4826_v62  }
 0x212   : > { %v1088_v54 = vpop.f32.mrb[76].mxu1 }
 0x213   : > { %v4829_v7 = vmul.f32 0.0051020407, %v1088_v54  ;;  %v1090_v50 = vpop.f32.mrb[77].mxu1 }
 0x215   : > { %6453 = vst [vmem:[#allocation107_spill] sm:$0xff] %v4829_v7  ;;  %1400 = vperm.xlu1 %3854, %v4829_v7  }
 0x216   : > { %v1093_v6 = vpop.f32.mrb[78].mxu1 }
 0x217   : > { %v4832_v23 = vmul.f32 0.0051020407, %v1093_v6  ;;  %v1095_v11 = vpop.f32.mrb[79].mxu1 }
 0x219   : > { %6454 = vst [vmem:[#allocation108_spill] sm:$0xff] %v4832_v23  ;;  %1405 = vperm.xlu0 %3853, %v4832_v23  }
 0x21a   : > { %v1098_v63 = vpop.f32.mrb[80].mxu1 }
 0x21b   : > { %v4835_v59 = vmul.f32 0.0051020407, %v1098_v63  ;;  %v1100_v27 = vpop.f32.mrb[81].mxu1 }
 0x21d   : > { %6455 = vst [vmem:[#allocation109_spill] sm:$0xff] %v4835_v59  ;;  %1410 = vperm.xlu1 %3854, %v4835_v59  }
 0x21e   : > { %v1103_v58 = vpop.f32.mrb[82].mxu1 }
 0x21f   : > { %v4838_v62 = vmul.f32 0.0051020407, %v1103_v58  ;;  %v1105_v54 = vpop.f32.mrb[83].mxu1 }
 0x221   : > { %6456 = vst [vmem:[#allocation110_spill] sm:$0xff] %v4838_v62  ;;  %1415 = vperm.xlu0 %3853, %v4838_v62  }
 0x222   : > { %v1108_v50 = vpop.f32.mrb[84].mxu1 }
 0x223   : > { %v4841_v7 = vmul.f32 0.0051020407, %v1108_v50  ;;  %v1110_v6 = vpop.f32.mrb[85].mxu1 }
 0x225   : > { %6457 = vst [vmem:[#allocation111_spill] sm:$0xff] %v4841_v7  ;;  %1420 = vperm.xlu1 %3854, %v4841_v7  }
 0x226   : > { %v1113_v11 = vpop.f32.mrb[86].mxu1 }
 0x227   : > { %v4844_v23 = vmul.f32 0.0051020407, %v1113_v11  ;;  %v1115_v63 = vpop.f32.mrb[87].mxu1 }
 0x229   : > { %6458 = vst [vmem:[#allocation112_spill] sm:$0xff] %v4844_v23  ;;  %1425 = vperm.xlu0 %3853, %v4844_v23  }
 0x22a   : > { %v1118_v27 = vpop.f32.mrb[88].mxu1 }
 0x22b   : > { %v4847_v59 = vmul.f32 0.0051020407, %v1118_v27  ;;  %v1120_v58 = vpop.f32.mrb[89].mxu1 }
 0x22d   : > { %6459 = vst [vmem:[#allocation113_spill] sm:$0xff] %v4847_v59  ;;  %1430 = vperm.xlu1 %3854, %v4847_v59  }
 0x22e   : > { %v1123_v54 = vpop.f32.mrb[90].mxu1 }
 0x22f   : > { %v4850_v62 = vmul.f32 0.0051020407, %v1123_v54  ;;  %v1125_v50 = vpop.f32.mrb[91].mxu1 }
 0x231   : > { %6460 = vst [vmem:[#allocation114_spill] sm:$0xff] %v4850_v62  ;;  %1435 = vperm.xlu0 %3853, %v4850_v62  }
 0x232   : > { %v1128_v6 = vpop.f32.mrb[92].mxu1 }
 0x233   : > { %v4853_v7 = vmul.f32 0.0051020407, %v1128_v6  ;;  %v1130_v11 = vpop.f32.mrb[93].mxu1 }
 0x235   : > { %6461 = vst [vmem:[#allocation115_spill] sm:$0xff] %v4853_v7  ;;  %1440 = vperm.xlu1 %3854, %v4853_v7  }
 0x236   : > { %v1133_v63 = vpop.f32.mrb[94].mxu1 }
 0x237   : > { %v4856_v23 = vmul.f32 0.0051020407, %v1133_v63  ;;  %v1135_v27 = vpop.f32.mrb[95].mxu1 }
 0x239   : > { %6462 = vst [vmem:[#allocation116_spill] sm:$0xff] %v4856_v23  ;;  %1445 = vperm.xlu0 %3853, %v4856_v23  }
 0x23a   : > { %v1138_v58 = vpop.f32.mrb[96].mxu1 }
 0x23b   : > { %v4859_v59 = vmul.f32 0.0051020407, %v1138_v58  ;;  %v1140_v54 = vpop.f32.mrb[97].mxu1 }
 0x23d   : > { %6463 = vst [vmem:[#allocation117_spill] sm:$0xff] %v4859_v59  ;;  %1450 = vperm.xlu1 %3854, %v4859_v59  }
 0x23e   : > { %v1143_v50 = vpop.f32.mrb[98].mxu1 }
 0x23f   : > { %v4862_v62 = vmul.f32 0.0051020407, %v1143_v50  ;;  %v1145_v6 = vpop.f32.mrb[99].mxu1 }
 0x241   : > { %6464 = vst [vmem:[#allocation118_spill] sm:$0xff] %v4862_v62  ;;  %1455 = vperm.xlu0 %3853, %v4862_v62  }
 0x242   : > { %v1148_v11 = vpop.f32.mrb[100].mxu1 }
 0x243   : > { %v4865_v7 = vmul.f32 0.0051020407, %v1148_v11  ;;  %v1150_v63 = vpop.f32.mrb[101].mxu1 }
 0x245   : > { %6465 = vst [vmem:[#allocation119_spill] sm:$0xff] %v4865_v7  ;;  %1460 = vperm.xlu1 %3854, %v4865_v7  }
 0x246   : > { %v1153_v27 = vpop.f32.mrb[102].mxu1 }
 0x247   : > { %v4868_v23 = vmul.f32 0.0051020407, %v1153_v27  ;;  %v1155_v58 = vpop.f32.mrb[103].mxu1 }
 0x249   : > { %6466 = vst [vmem:[#allocation120_spill] sm:$0xff] %v4868_v23  ;;  %1465 = vperm.xlu0 %3853, %v4868_v23  }
 0x24a   : > { %v1158_v54 = vpop.f32.mrb[104].mxu1 }
 0x24b   : > { %v4871_v59 = vmul.f32 0.0051020407, %v1158_v54  ;;  %v1160_v50 = vpop.f32.mrb[105].mxu1 }
 0x24c   : > { %v1329_v50 = vand.u32 127, %v1328_v15 }
 0x24d   : > { %6467 = vst [vmem:[#allocation121_spill] sm:$0xff] %v4871_v59  ;;  %1470 = vperm.xlu1 %3854, %v4871_v59  }
 0x24e   : > { %v1163_v6 = vpop.f32.mrb[106].mxu1  ;;  %v4885_v10 = vadd.s32 128, %v1329_v50 }
 0x24f   : > { %v4874_v62 = vmul.f32 0.0051020407, %v1163_v6  ;;  %v1165_v11 = vpop.f32.mrb[107].mxu1 }
 0x250   : > { %vm1332_vm1 = vcmp.lt.s32.totalorder %v4885_v10, 196 }
 0x251   : > { %6468 = vst [vmem:[#allocation122_spill] sm:$0xff] %v4874_v62  ;;  %1475 = vperm.xlu0 %3853, %v4874_v62  }
 0x252   : > { %v1168_v63 = vpop.f32.mrb[108].mxu1 }
 0x253   : > { %v4877_v7 = vmul.f32 0.0051020407, %v1168_v63  ;;  %v1170_v27 = vpop.f32.mrb[109].mxu1 }
 0x255   : > { %6469 = vst [vmem:[#allocation123_spill] sm:$0xff] %v4877_v7  ;;  %1480 = vperm.xlu1 %3854, %v4877_v7  }
 0x256   : > { %v1173_v58 = vpop.f32.mrb[110].mxu1 }
 0x257   : > { %v4880_v23 = vmul.f32 0.0051020407, %v1173_v58  ;;  %v1175_v54 = vpop.f32.mrb[111].mxu1 }
 0x259   : > { %6470 = vst [vmem:[#allocation124_spill] sm:$0xff] %v4880_v23  ;;  %1485 = vperm.xlu0 %3853, %v4880_v23  }
 0x25a   : > { %v1178_v59 = vpop.f32.mrb[112].mxu1 }
 0x25b   : > { %v4883_v6 = vmul.f32 0.0051020407, %v1178_v59  ;;  %v1180_v11 = vpop.f32.mrb[113].mxu1 }
 0x25d   : > { %6471 = vst [vmem:[#allocation125_spill] sm:$0xff] %v4883_v6  ;;  %1490 = vperm.xlu1 %3854, %v4883_v6  }
 0x25e   : > { %v1183_v63 = vpop.f32.mrb[114].mxu1 }
 0x25f   : > { %v4888_v27 = vmul.f32 0.0051020407, %v1183_v63  ;;  %v1185_v62 = vpop.f32.mrb[115].mxu1 }
 0x260   : > { %v1336_v7 = vpop.permute.xlu0 %1335 }
 0x261   : > { %v1588_v58 = vsub.f32 %v4482_v30, %v1336_v7  ;;  %v1589_v15 = vsub.f32 %v4484_v31, %v1336_v7  ;;  %1495 = vperm.xlu0 %3853, %v4888_v27  }
 0x262   : > { %v1188_v59 = vpop.f32.mrb[116].mxu1 }
 0x263   : > { %v4894_v54 = vmul.f32 0.0051020407, %v1188_v59  ;;  %v1190_v50 = vpop.f32.mrb[117].mxu1  ;;  %v1691_v11 = vsel %vm1332_vm1, %v1589_v15, 0.0  ;;  %v1792_v23 = vmul.f32 %v1588_v58, %v1588_v58 }
 0x264   : > { %v1341_v6 = vpop.permute.xlu0 %1340  ;;  %v1793_v63 = vmul.f32 %v1691_v11, %v1691_v11 }
 0x265   : > { %v1590_v62 = vsub.f32 %v4492_v34, %v1341_v6  ;;  %v1591_v19 = vsub.f32 %v4494_v35, %v1341_v6  ;;  %1500 = vperm.xlu1 %3854, %v4894_v54  }
 0x266   : > { %v1193_v30 = vpop.f32.mrb[118].mxu1  ;;  %1958 = vmatprep.mubr.f32.mxu0 %v1793_v63 }
 0x267   : > { %v4901_v7 = vmul.f32 0.0051020407, %v1193_v30  ;;  %1959 = vmatmul.mubr.f32.vlgmr.msra.gmra.mrb[52].mxu0 %v1792_v23  ;;  %v1195_v59 = vpop.f32.mrb[119].mxu1  ;;  %v1693_v50 = vsel %vm1332_vm1, %v1591_v19, 0.0  ;;  %v1794_v6 = vmul.f32 %v1590_v62, %v1590_v62 }
 0x268   : > { %v1346_v31 = vpop.permute.xlu1 %1345  ;;  %v1795_v15 = vmul.f32 %v1693_v50, %v1693_v50 }
 0x269   : > { %v1592_v11 = vsub.f32 %v4502_v38, %v1346_v31  ;;  %v1593_v58 = vsub.f32 %v4504_v39, %v1346_v31  ;;  %1505 = vperm.xlu0 %3853, %v4901_v7   ;;  %v6476_v38 = vld [vmem:[#allocation17_spill] sm:$0xff] }
 0x26a   : > { %v1198_v35 = vpop.f32.mrb[120].mxu1  ;;  %1963 = vmatprep.mubr.f32.mxu0 %v1795_v15 }
 0x26b   : > { %v4908_v34 = vmul.f32 0.0051020407, %v1198_v35  ;;  %1964 = vmatmul.mubr.f32.gmra.mrb[54].mxu0 %v1794_v6  ;;  %v1200_v30 = vpop.f32.mrb[121].mxu1  ;;  %v1695_v23 = vsel %vm1332_vm1, %v1593_v58, 0.0  ;;  %v1796_v31 = vmul.f32 %v1592_v11, %v1592_v11 }
 0x26c   : > { %v1351_v63 = vpop.permute.xlu1 %1350  ;;  %v1797_v19 = vmul.f32 %v1695_v23, %v1695_v23  ;;  %v6473_v23 = vld [vmem:[#allocation15_spill] sm:$0xff] }
 0x26d   : > { %v1594_v59 = vsub.f32 %v4512_v42, %v1351_v63  ;;  %v1595_v50 = vsub.f32 %v4514_v43, %v1351_v63  ;;  %1510 = vperm.xlu1 %3854, %v4908_v34  }
 0x26e   : > { %v1203_v39 = vpop.f32.mrb[122].mxu1  ;;  %1968 = vmatprep.mubr.f32.mxu0 %v1797_v19 }
 0x26f   : > { %v4915_v62 = vmul.f32 0.0051020407, %v1203_v39  ;;  %1969 = vmatmul.mubr.f32.gmra.mrb[56].mxu0 %v1796_v31  ;;  %v1205_v35 = vpop.f32.mrb[123].mxu1  ;;  %v1697_v15 = vsel %vm1332_vm1, %v1595_v50, 0.0  ;;  %v1798_v63 = vmul.f32 %v1594_v59, %v1594_v59 }
 0x270   : > { %v1356_v6 = vpop.permute.xlu0 %1355  ;;  %v1799_v58 = vmul.f32 %v1697_v15, %v1697_v15  ;;  %v6475_v35 = vld [vmem:[#allocation16_spill] sm:$0xff] }
 0x271   : > { %6472 = vst [vmem:[#allocation126_spill] sm:$0xff] %v4915_v62  ;;  %v1596_v30 = vsub.f32 %v4522_v46, %v1356_v6  ;;  %v1597_v42 = vsub.f32 %v6473_v23, %v1356_v6  ;;  %1515 = vperm.xlu0 %3853, %v4915_v62   ;;  %v6479_v62 = vld [vmem:[#allocation19_spill] sm:$0xff] }
 0x272   : > { %v1208_v43 = vpop.f32.mrb[124].mxu1  ;;  %1973 = vmatprep.mubr.f32.mxu0 %v1799_v58 }
 0x273   : > { %v4922_v11 = vmul.f32 0.0051020407, %v1208_v43  ;;  %1974 = vmatmul.mubr.f32.gmra.mrb[58].mxu0 %v1798_v63  ;;  %v1210_v39 = vpop.f32.mrb[125].mxu1  ;;  %v1699_v19 = vsel %vm1332_vm1, %v1597_v42, 0.0  ;;  %v1800_v6 = vmul.f32 %v1596_v30, %v1596_v30 }
 0x274   : > { %v1361_v31 = vpop.permute.xlu1 %1360  ;;  %v1801_v50 = vmul.f32 %v1699_v19, %v1699_v19  ;;  %v6478_v39 = vld [vmem:[#allocation18_spill] sm:$0xff] }
 0x275   : > { %6474 = vst [vmem:[#allocation127_spill] sm:$0xff] %v4922_v11  ;;  %v1598_v15 = vsub.f32 %v6475_v35, %v1361_v31  ;;  %v1599_v46 = vsub.f32 %v6476_v38, %v1361_v31  ;;  %1520 = vperm.xlu1 %3854, %v4922_v11   ;;  %v6482_v11 = vld [vmem:[#allocation21_spill] sm:$0xff] }
 0x276   : > { %v1213_v23 = vpop.f32.mrb[126].mxu1  ;;  %1978 = vmatprep.mubr.f32.mxu0 %v1801_v50 }
 0x277   : > { %v4929_v59 = vmul.f32 0.0051020407, %v1213_v23  ;;  %1979 = vmatmul.mubr.f32.gmra.mrb[60].mxu0 %v1800_v6  ;;  %v1215_v43 = vpop.f32.mrb[127].mxu1  ;;  %v1701_v58 = vsel %vm1332_vm1, %v1599_v46, 0.0  ;;  %v1802_v31 = vmul.f32 %v1598_v15, %v1598_v15 }
 0x278   : > { %v1366_v63 = vpop.permute.xlu0 %1365  ;;  %v1803_v42 = vmul.f32 %v1701_v58, %v1701_v58  ;;  %v6481_v43 = vld [vmem:[#allocation20_spill] sm:$0xff] }
 0x279   : > { %6477 = vst [vmem:[#allocation128_spill] sm:$0xff] %v4929_v59  ;;  %v1600_v19 = vsub.f32 %v6478_v39, %v1366_v63  ;;  %v1601_v35 = vsub.f32 %v6479_v62, %v1366_v63  ;;  %1525 = vperm.xlu0 %3853, %v4929_v59   ;;  %v6485_v59 = vld [vmem:[#allocation25_spill] sm:$0xff] }
 0x27a   : > { %v1218_v38 = vpop.f32.mrb[128].mxu1  ;;  %1983 = vmatprep.mubr.f32.mxu0 %v1803_v42 }
 0x27b   : > { %v4936_v30 = vmul.f32 0.0051020407, %v1218_v38  ;;  %1984 = vmatmul.mubr.f32.gmra.mrb[62].mxu0 %v1802_v31  ;;  %v1220_v23 = vpop.f32.mrb[129].mxu1  ;;  %v1703_v50 = vsel %vm1332_vm1, %v1601_v35, 0.0  ;;  %v1804_v63 = vmul.f32 %v1600_v19, %v1600_v19 }
 0x27c   : > { %v1371_v6 = vpop.permute.xlu1 %1370  ;;  %v1805_v46 = vmul.f32 %v1703_v50, %v1703_v50  ;;  %v6484_v23 = vld [vmem:[#allocation24_spill] sm:$0xff] }
 0x27d   : > { %6480 = vst [vmem:[#allocation129_spill] sm:$0xff] %v4936_v30  ;;  %v1602_v58 = vsub.f32 %v6481_v43, %v1371_v6  ;;  %v1603_v39 = vsub.f32 %v6482_v11, %v1371_v6  ;;  %1530 = vperm.xlu1 %3854, %v4936_v30   ;;  %v6488_v30 = vld [vmem:[#allocation29_spill] sm:$0xff] }
 0x27e   : > { %v1223_v62 = vpop.f32.mrb[130].mxu1  ;;  %1988 = vmatprep.mubr.f32.mxu0 %v1805_v46 }
 0x27f   : > { %v4943_v15 = vmul.f32 0.0051020407, %v1223_v62  ;;  %1989 = vmatmul.mubr.f32.gmra.mrb[64].mxu0 %v1804_v63  ;;  %v1225_v38 = vpop.f32.mrb[131].mxu1  ;;  %v1705_v42 = vsel %vm1332_vm1, %v1603_v39, 0.0  ;;  %v1806_v6 = vmul.f32 %v1602_v58, %v1602_v58 }
 0x280   : > { %v1376_v31 = vpop.permute.xlu0 %1375  ;;  %v1807_v35 = vmul.f32 %v1705_v42, %v1705_v42  ;;  %v6487_v38 = vld [vmem:[#allocation28_spill] sm:$0xff] }
 0x281   : > { %6483 = vst [vmem:[#allocation130_spill] sm:$0xff] %v4943_v15  ;;  %v1604_v50 = vsub.f32 %v6484_v23, %v1376_v31  ;;  %v1605_v43 = vsub.f32 %v6485_v59, %v1376_v31  ;;  %1535 = vperm.xlu0 %3853, %v4943_v15   ;;  %v6491_v15 = vld [vmem:[#allocation33_spill] sm:$0xff] }
 0x282   : > { %v1228_v11 = vpop.f32.mrb[132].mxu1  ;;  %1993 = vmatprep.mubr.f32.mxu0 %v1807_v35 }
 0x283   : > { %v4950_v19 = vmul.f32 0.0051020407, %v1228_v11  ;;  %1994 = vmatmul.mubr.f32.gmra.mrb[66].mxu0 %v1806_v6  ;;  %v1230_v62 = vpop.f32.mrb[133].mxu1  ;;  %v1707_v46 = vsel %vm1332_vm1, %v1605_v43, 0.0  ;;  %v1808_v31 = vmul.f32 %v1604_v50, %v1604_v50 }
 0x284   : > { %v1381_v63 = vpop.permute.xlu1 %1380  ;;  %v1809_v39 = vmul.f32 %v1707_v46, %v1707_v46  ;;  %v6490_v62 = vld [vmem:[#allocation32_spill] sm:$0xff] }
 0x285   : > { %6486 = vst [vmem:[#allocation131_spill] sm:$0xff] %v4950_v19  ;;  %v1606_v42 = vsub.f32 %v6487_v38, %v1381_v63  ;;  %v1607_v23 = vsub.f32 %v6488_v30, %v1381_v63  ;;  %1540 = vperm.xlu1 %3854, %v4950_v19   ;;  %v6494_v19 = vld [vmem:[#allocation37_spill] sm:$0xff] }
 0x286   : > { %v1233_v59 = vpop.f32.mrb[134].mxu1  ;;  %1998 = vmatprep.mubr.f32.mxu0 %v1809_v39 }
 0x287   : > { %v4957_v58 = vmul.f32 0.0051020407, %v1233_v59  ;;  %1999 = vmatmul.mubr.f32.gmra.mrb[68].mxu0 %v1808_v31  ;;  %v1235_v11 = vpop.f32.mrb[135].mxu1  ;;  %v1709_v35 = vsel %vm1332_vm1, %v1607_v23, 0.0  ;;  %v1810_v63 = vmul.f32 %v1606_v42, %v1606_v42 }
 0x288   : > { %v1386_v6 = vpop.permute.xlu0 %1385  ;;  %v1811_v43 = vmul.f32 %v1709_v35, %v1709_v35  ;;  %v6493_v11 = vld [vmem:[#allocation36_spill] sm:$0xff] }
 0x289   : > { %6489 = vst [vmem:[#allocation132_spill] sm:$0xff] %v4957_v58  ;;  %v1608_v46 = vsub.f32 %v6490_v62, %v1386_v6  ;;  %v1609_v38 = vsub.f32 %v6491_v15, %v1386_v6  ;;  %1545 = vperm.xlu0 %3853, %v4957_v58   ;;  %v6497_v58 = vld [vmem:[#allocation41_spill] sm:$0xff] }
 0x28a   : > { %v1238_v30 = vpop.f32.mrb[136].mxu1  ;;  %2003 = vmatprep.mubr.f32.mxu0 %v1811_v43 }
 0x28b   : > { %v4964_v50 = vmul.f32 0.0051020407, %v1238_v30  ;;  %2004 = vmatmul.mubr.f32.gmra.mrb[70].mxu0 %v1810_v63  ;;  %v1240_v59 = vpop.f32.mrb[137].mxu1  ;;  %v1711_v39 = vsel %vm1332_vm1, %v1609_v38, 0.0  ;;  %v1812_v6 = vmul.f32 %v1608_v46, %v1608_v46 }
 0x28c   : > { %v1391_v31 = vpop.permute.xlu1 %1390  ;;  %v1813_v23 = vmul.f32 %v1711_v39, %v1711_v39  ;;  %v6496_v59 = vld [vmem:[#allocation40_spill] sm:$0xff] }
 0x28d   : > { %6492 = vst [vmem:[#allocation133_spill] sm:$0xff] %v4964_v50  ;;  %v1610_v35 = vsub.f32 %v6493_v11, %v1391_v31  ;;  %v1611_v62 = vsub.f32 %v6494_v19, %v1391_v31  ;;  %1550 = vperm.xlu1 %3854, %v4964_v50   ;;  %v6500_v50 = vld [vmem:[#allocation45_spill] sm:$0xff] }
 0x28e   : > { %v1243_v15 = vpop.f32.mrb[138].mxu1  ;;  %2008 = vmatprep.mubr.f32.mxu0 %v1813_v23 }
 0x28f   : > { %v4971_v42 = vmul.f32 0.0051020407, %v1243_v15  ;;  %2009 = vmatmul.mubr.f32.gmra.mrb[72].mxu0 %v1812_v6  ;;  %v1245_v30 = vpop.f32.mrb[139].mxu1  ;;  %v1713_v43 = vsel %vm1332_vm1, %v1611_v62, 0.0  ;;  %v1814_v31 = vmul.f32 %v1610_v35, %v1610_v35 }
 0x290   : > { %v1396_v63 = vpop.permute.xlu0 %1395  ;;  %v1815_v38 = vmul.f32 %v1713_v43, %v1713_v43  ;;  %v6499_v30 = vld [vmem:[#allocation44_spill] sm:$0xff] }
 0x291   : > { %6495 = vst [vmem:[#allocation134_spill] sm:$0xff] %v4971_v42  ;;  %v1612_v39 = vsub.f32 %v6496_v59, %v1396_v63  ;;  %v1613_v11 = vsub.f32 %v6497_v58, %v1396_v63  ;;  %1555 = vperm.xlu0 %3853, %v4971_v42   ;;  %v6503_v42 = vld [vmem:[#allocation49_spill] sm:$0xff] }
 0x292   : > { %v1248_v19 = vpop.f32.mrb[140].mxu1  ;;  %2013 = vmatprep.mubr.f32.mxu0 %v1815_v38 }
 0x293   : > { %v4978_v46 = vmul.f32 0.0051020407, %v1248_v19  ;;  %2014 = vmatmul.mubr.f32.gmra.mrb[74].mxu0 %v1814_v31  ;;  %v1250_v15 = vpop.f32.mrb[141].mxu1  ;;  %v1715_v23 = vsel %vm1332_vm1, %v1613_v11, 0.0  ;;  %v1816_v63 = vmul.f32 %v1612_v39, %v1612_v39 }
 0x294   : > { %v1401_v6 = vpop.permute.xlu1 %1400  ;;  %v1817_v62 = vmul.f32 %v1715_v23, %v1715_v23  ;;  %v6502_v15 = vld [vmem:[#allocation48_spill] sm:$0xff] }
 0x295   : > { %6498 = vst [vmem:[#allocation135_spill] sm:$0xff] %v4978_v46  ;;  %v1614_v43 = vsub.f32 %v6499_v30, %v1401_v6  ;;  %v1615_v59 = vsub.f32 %v6500_v50, %v1401_v6  ;;  %1560 = vperm.xlu1 %3854, %v4978_v46   ;;  %v6506_v46 = vld [vmem:[#allocation53_spill] sm:$0xff] }
 0x296   : > { %v1253_v58 = vpop.f32.mrb[142].mxu1  ;;  %2018 = vmatprep.mubr.f32.mxu0 %v1817_v62 }
 0x297   : > { %v4985_v35 = vmul.f32 0.0051020407, %v1253_v58  ;;  %2019 = vmatmul.mubr.f32.gmra.mrb[76].mxu0 %v1816_v63  ;;  %v1255_v19 = vpop.f32.mrb[143].mxu1  ;;  %v1717_v38 = vsel %vm1332_vm1, %v1615_v59, 0.0  ;;  %v1818_v6 = vmul.f32 %v1614_v43, %v1614_v43 }
 0x298   : > { %v1406_v31 = vpop.permute.xlu0 %1405  ;;  %v1819_v11 = vmul.f32 %v1717_v38, %v1717_v38  ;;  %v6505_v19 = vld [vmem:[#allocation52_spill] sm:$0xff] }
 0x299   : > { %6501 = vst [vmem:[#allocation136_spill] sm:$0xff] %v4985_v35  ;;  %v1616_v23 = vsub.f32 %v6502_v15, %v1406_v31  ;;  %v1617_v30 = vsub.f32 %v6503_v42, %v1406_v31  ;;  %1565 = vperm.xlu0 %3853, %v4985_v35   ;;  %v6509_v35 = vld [vmem:[#allocation57_spill] sm:$0xff] }
 0x29a   : > { %v1258_v50 = vpop.f32.mrb[144].mxu1  ;;  %2023 = vmatprep.mubr.f32.mxu0 %v1819_v11 }
 0x29b   : > { %v4992_v39 = vmul.f32 0.0051020407, %v1258_v50  ;;  %2024 = vmatmul.mubr.f32.gmra.mrb[78].mxu0 %v1818_v6  ;;  %v1260_v58 = vpop.f32.mrb[145].mxu1  ;;  %v1719_v62 = vsel %vm1332_vm1, %v1617_v30, 0.0  ;;  %v1820_v31 = vmul.f32 %v1616_v23, %v1616_v23 }
 0x29c   : > { %v1411_v63 = vpop.permute.xlu1 %1410  ;;  %v1821_v59 = vmul.f32 %v1719_v62, %v1719_v62  ;;  %v6508_v58 = vld [vmem:[#allocation56_spill] sm:$0xff] }
 0x29d   : > { %6504 = vst [vmem:[#allocation137_spill] sm:$0xff] %v4992_v39  ;;  %v1618_v38 = vsub.f32 %v6505_v19, %v1411_v63  ;;  %v1619_v15 = vsub.f32 %v6506_v46, %v1411_v63  ;;  %1570 = vperm.xlu1 %3854, %v4992_v39   ;;  %v6512_v39 = vld [vmem:[#allocation61_spill] sm:$0xff] }
 0x29e   : > { %v1263_v42 = vpop.f32.mrb[146].mxu1  ;;  %2028 = vmatprep.mubr.f32.mxu0 %v1821_v59 }
 0x29f   : > { %v4999_v43 = vmul.f32 0.0051020407, %v1263_v42  ;;  %2029 = vmatmul.mubr.f32.gmra.mrb[80].mxu0 %v1820_v31  ;;  %v1265_v50 = vpop.f32.mrb[147].mxu1  ;;  %v1721_v11 = vsel %vm1332_vm1, %v1619_v15, 0.0  ;;  %v1822_v63 = vmul.f32 %v1618_v38, %v1618_v38 }
 0x2a0   : > { %v1416_v6 = vpop.permute.xlu0 %1415  ;;  %v1823_v30 = vmul.f32 %v1721_v11, %v1721_v11  ;;  %v6511_v50 = vld [vmem:[#allocation60_spill] sm:$0xff] }
 0x2a1   : > { %6507 = vst [vmem:[#allocation138_spill] sm:$0xff] %v4999_v43  ;;  %v1620_v62 = vsub.f32 %v6508_v58, %v1416_v6  ;;  %v1621_v19 = vsub.f32 %v6509_v35, %v1416_v6  ;;  %1575 = vperm.xlu0 %3853, %v4999_v43   ;;  %v6515_v43 = vld [vmem:[#allocation65_spill] sm:$0xff] }
 0x2a2   : > { %v1268_v46 = vpop.f32.mrb[148].mxu1  ;;  %2033 = vmatprep.mubr.f32.mxu0 %v1823_v30 }
 0x2a3   : > { %v5006_v23 = vmul.f32 0.0051020407, %v1268_v46  ;;  %2034 = vmatmul.mubr.f32.gmra.mrb[82].mxu0 %v1822_v63  ;;  %v1270_v42 = vpop.f32.mrb[149].mxu1  ;;  %v1723_v59 = vsel %vm1332_vm1, %v1621_v19, 0.0  ;;  %v1824_v6 = vmul.f32 %v1620_v62, %v1620_v62 }
 0x2a4   : > { %v1421_v31 = vpop.permute.xlu1 %1420  ;;  %v1825_v15 = vmul.f32 %v1723_v59, %v1723_v59  ;;  %v6514_v42 = vld [vmem:[#allocation64_spill] sm:$0xff] }
 0x2a5   : > { %6510 = vst [vmem:[#allocation139_spill] sm:$0xff] %v5006_v23  ;;  %v1622_v11 = vsub.f32 %v6511_v50, %v1421_v31  ;;  %v1623_v58 = vsub.f32 %v6512_v39, %v1421_v31  ;;  %1580 = vperm.xlu1 %3854, %v5006_v23  }
 0x2a6   : > { %v1273_v35 = vpop.f32.mrb[150].mxu1  ;;  %2038 = vmatprep.mubr.f32.mxu0 %v1825_v15 }
 0x2a7   : > { %v5013_v38 = vmul.f32 0.0051020407, %v1273_v35  ;;  %2039 = vmatmul.mubr.f32.gmra.mrb[84].mxu0 %v1824_v6  ;;  %v1725_v46 = vsel %vm1332_vm1, %v1623_v58, 0.0  ;;  %v1275_v30 = vpop.f32.mrb[151].mxu1  ;;  %v1826_v31 = vmul.f32 %v1622_v11, %v1622_v11  ;;  %v6516_v6 = vld [vmem:[#allocation68_spill] sm:$0xff]  ;;  %v6517_v58 = vld [vmem:[#allocation69_spill] sm:$0xff] }
 0x2a8   : > { %v1426_v63 = vpop.permute.xlu0 %1425  ;;  %v1827_v19 = vmul.f32 %v1725_v46, %v1725_v46  ;;  %v6518_v11 = vld [vmem:[#allocation72_spill] sm:$0xff] }
 0x2a9   : > { %6513 = vst [vmem:[#allocation140_spill] sm:$0xff] %v5013_v38  ;;  %v1624_v59 = vsub.f32 %v6514_v42, %v1426_v63  ;;  %v1625_v50 = vsub.f32 %v6515_v43, %v1426_v63  ;;  %1585 = vperm.xlu0 %3853, %v5013_v38  }
 0x2aa   : > { %2043 = vmatprep.mubr.f32.mxu0 %v1827_v19 }
 0x2ab   : > { %2044 = vmatmul.mubr.f32.gmra.mrb[86].mxu0 %v1826_v31  ;;  %v1727_v35 = vsel %vm1332_vm1, %v1625_v50, 0.0  ;;  %v1828_v23 = vmul.f32 %v1624_v59, %v1624_v59  ;;  %v6519_v31 = vld [vmem:[#allocation73_spill] sm:$0xff]  ;;  %v6520_v59 = vld [vmem:[#allocation76_spill] sm:$0xff] }
 0x2ac   : > { %v1431_v62 = vpop.permute.xlu1 %1430  ;;  %v1829_v15 = vmul.f32 %v1727_v35, %v1727_v35 }
 0x2ad   : > { %v1626_v39 = vsub.f32 %v6516_v6, %v1431_v62  ;;  %v1627_v30 = vsub.f32 %v6517_v58, %v1431_v62 }
 0x2ae   : > { %2048 = vmatprep.mubr.f32.mxu0 %v1829_v15 }
 0x2af   : > { %2049 = vmatmul.mubr.f32.gmra.mrb[88].mxu0 %v1828_v23  ;;  %v1729_v46 = vsel %vm1332_vm1, %v1627_v30, 0.0  ;;  %v1830_v38 = vmul.f32 %v1626_v39, %v1626_v39  ;;  %v6521_v23 = vld [vmem:[#allocation77_spill] sm:$0xff]  ;;  %v6522_v39 = vld [vmem:[#allocation80_spill] sm:$0xff] }
 0x2b0   : > { %v1436_v63 = vpop.permute.xlu0 %1435  ;;  %v1831_v43 = vmul.f32 %v1729_v46, %v1729_v46 }
 0x2b1   : > { %v1628_v19 = vsub.f32 %v6518_v11, %v1436_v63  ;;  %v1629_v42 = vsub.f32 %v6519_v31, %v1436_v63 }
 0x2b2   : > { %2053 = vmatprep.mubr.f32.mxu0 %v1831_v43 }
 0x2b3   : > { %2054 = vmatmul.mubr.f32.gmra.mrb[90].mxu0 %v1830_v38  ;;  %v1731_v50 = vsel %vm1332_vm1, %v1629_v42, 0.0  ;;  %v1832_v6 = vmul.f32 %v1628_v19, %v1628_v19  ;;  %v6523_v38 = vld [vmem:[#allocation81_spill] sm:$0xff] }
 0x2b4   : > { %v1441_v35 = vpop.permute.xlu1 %1440  ;;  %v1833_v62 = vmul.f32 %v1731_v50, %v1731_v50 }
 0x2b5   : > { %v1630_v15 = vsub.f32 %v6520_v59, %v1441_v35  ;;  %v1631_v58 = vsub.f32 %v6521_v23, %v1441_v35 }
 0x2b6   : > { %2058 = vmatprep.mubr.f32.mxu0 %v1833_v62 }
 0x2b7   : > { %2059 = vmatmul.mubr.f32.gmra.mrb[92].mxu0 %v1832_v6  ;;  %v1733_v30 = vsel %vm1332_vm1, %v1631_v58, 0.0  ;;  %v1834_v11 = vmul.f32 %v1630_v15, %v1630_v15  ;;  %v6524_v6 = vld [vmem:[#allocation85_spill] sm:$0xff] }
 0x2b8   : > { %v1446_v46 = vpop.permute.xlu0 %1445  ;;  %v1835_v63 = vmul.f32 %v1733_v30, %v1733_v30 }
 0x2b9   : > { %v1632_v43 = vsub.f32 %v6522_v39, %v1446_v46  ;;  %v1633_v31 = vsub.f32 %v6523_v38, %v1446_v46 }
 0x2ba   : > { %2063 = vmatprep.mubr.f32.mxu0 %v1835_v63 }
 0x2bb   : > { %2064 = vmatmul.mubr.f32.gmra.mrb[94].mxu0 %v1834_v11  ;;  %v1735_v42 = vsel %vm1332_vm1, %v1633_v31, 0.0  ;;  %v1836_v23 = vmul.f32 %v1632_v43, %v1632_v43 }
 0x2bc   : > { %v1451_v50 = vpop.permute.xlu1 %1450  ;;  %v1837_v35 = vmul.f32 %v1735_v42, %v1735_v42 }
 0x2bd   : > { %v1634_v19 = vsub.f32 %v4714_v1, %v1451_v50  ;;  %v1635_v62 = vsub.f32 %v6524_v6, %v1451_v50 }
 0x2be   : > { %2068 = vmatprep.mubr.f32.mxu0 %v1837_v35 }
 0x2bf   : > { %2069 = vmatmul.mubr.f32.gmra.mrb[96].mxu0 %v1836_v23  ;;  %v1737_v58 = vsel %vm1332_vm1, %v1635_v62, 0.0  ;;  %v1838_v63 = vmul.f32 %v1634_v19, %v1634_v19 }
 0x2c0   : > { %v1456_v30 = vpop.permute.xlu0 %1455  ;;  %v1839_v46 = vmul.f32 %v1737_v58, %v1737_v58 }
 0x2c1   : > { %v1636_v15 = vsub.f32 %v4724_v51, %v1456_v30  ;;  %v1637_v11 = vsub.f32 %v4726_v4, %v1456_v30 }
 0x2c2   : > { %2073 = vmatprep.mubr.f32.mxu0 %v1839_v46 }
 0x2c3   : > { %2074 = vmatmul.mubr.f32.gmra.mrb[98].mxu0 %v1838_v63  ;;  %v1739_v31 = vsel %vm1332_vm1, %v1637_v11, 0.0  ;;  %v1840_v35 = vmul.f32 %v1636_v15, %v1636_v15 }
 0x2c4   : > { %v1461_v42 = vpop.permute.xlu1 %1460  ;;  %v1841_v50 = vmul.f32 %v1739_v31, %v1739_v31 }
 0x2c5   : > { %v1638_v43 = vsub.f32 %v4734_v47, %v1461_v42  ;;  %v1639_v23 = vsub.f32 %v4736_v55, %v1461_v42 }
 0x2c6   : > { %2078 = vmatprep.mubr.f32.mxu0 %v1841_v50 }
 0x2c7   : > { %2079 = vmatmul.mubr.f32.gmra.mrb[100].mxu0 %v1840_v35  ;;  %v1741_v62 = vsel %vm1332_vm1, %v1639_v23, 0.0  ;;  %v1842_v63 = vmul.f32 %v1638_v43, %v1638_v43 }
 0x2c8   : > { %v1466_v58 = vpop.permute.xlu0 %1465  ;;  %v1843_v30 = vmul.f32 %v1741_v62, %v1741_v62 }
 0x2c9   : > { %v1640_v19 = vsub.f32 %v4487_v32, %v1466_v58  ;;  %v1641_v46 = vsub.f32 %v4490_v33, %v1466_v58 }
 0x2ca   : > { %2083 = vmatprep.mubr.f32.mxu0 %v1843_v30 }
 0x2cb   : > { %2084 = vmatmul.mubr.f32.gmra.mrb[102].mxu0 %v1842_v63  ;;  %v1743_v11 = vsel %vm1332_vm1, %v1641_v46, 0.0  ;;  %v1844_v35 = vmul.f32 %v1640_v19, %v1640_v19 }
 0x2cc   : > { %v1471_v31 = vpop.permute.xlu1 %1470  ;;  %v1845_v42 = vmul.f32 %v1743_v11, %v1743_v11 }
 0x2cd   : > { %v1642_v15 = vsub.f32 %v4497_v36, %v1471_v31  ;;  %v1643_v50 = vsub.f32 %v4500_v37, %v1471_v31 }
 0x2ce   : > { %2088 = vmatprep.mubr.f32.mxu0 %v1845_v42 }
 0x2cf   : > { %2089 = vmatmul.mubr.f32.gmra.mrb[104].mxu0 %v1844_v35  ;;  %v1745_v23 = vsel %vm1332_vm1, %v1643_v50, 0.0  ;;  %v1846_v63 = vmul.f32 %v1642_v15, %v1642_v15 }
 0x2d0   : > { %v1476_v62 = vpop.permute.xlu0 %1475  ;;  %v1847_v58 = vmul.f32 %v1745_v23, %v1745_v23 }
 0x2d1   : > { %v1644_v43 = vsub.f32 %v4507_v40, %v1476_v62  ;;  %v1645_v30 = vsub.f32 %v4510_v41, %v1476_v62 }
 0x2d2   : > { %2093 = vmatprep.mubr.f32.mxu0 %v1847_v58 }
 0x2d3   : > { %2094 = vmatmul.mubr.f32.gmra.mrb[106].mxu0 %v1846_v63  ;;  %v1747_v46 = vsel %vm1332_vm1, %v1645_v30, 0.0  ;;  %v1848_v35 = vmul.f32 %v1644_v43, %v1644_v43 }
 0x2d4   : > { %v1481_v11 = vpop.permute.xlu1 %1480  ;;  %v1849_v31 = vmul.f32 %v1747_v46, %v1747_v46 }
 0x2d5   : > { %v1646_v19 = vsub.f32 %v4517_v44, %v1481_v11  ;;  %v1647_v42 = vsub.f32 %v4520_v45, %v1481_v11 }
 0x2d6   : > { %2098 = vmatprep.mubr.f32.mxu0 %v1849_v31 }
 0x2d7   : > { %2099 = vmatmul.mubr.f32.gmra.mrb[108].mxu0 %v1848_v35  ;;  %v1749_v50 = vsel %vm1332_vm1, %v1647_v42, 0.0  ;;  %v1850_v63 = vmul.f32 %v1646_v19, %v1646_v19 }
 0x2d8   : > { %v1486_v23 = vpop.permute.xlu0 %1485  ;;  %v1851_v62 = vmul.f32 %v1749_v50, %v1749_v50 }
 0x2d9   : > { %v1648_v15 = vsub.f32 %v4527_v48, %v1486_v23  ;;  %v1649_v58 = vsub.f32 %v4530_v49, %v1486_v23 }
 0x2da   : > { %2103 = vmatprep.mubr.f32.mxu0 %v1851_v62 }
 0x2db   : > { %2104 = vmatmul.mubr.f32.gmra.mrb[110].mxu0 %v1850_v63  ;;  %v1751_v30 = vsel %vm1332_vm1, %v1649_v58, 0.0  ;;  %v1852_v35 = vmul.f32 %v1648_v15, %v1648_v15 }
 0x2dc   : > { %v1491_v46 = vpop.permute.xlu1 %1490  ;;  %v1853_v11 = vmul.f32 %v1751_v30, %v1751_v30 }
 0x2dd   : > { %v1650_v43 = vsub.f32 %v4537_v52, %v1491_v46  ;;  %v1651_v31 = vsub.f32 %v4540_v53, %v1491_v46 }
 0x2de   : > { %2108 = vmatprep.mubr.f32.mxu0 %v1853_v11 }
 0x2df   : > { %2109 = vmatmul.mubr.f32.gmra.mrb[112].mxu0 %v1852_v35  ;;  %v1753_v42 = vsel %vm1332_vm1, %v1651_v31, 0.0  ;;  %v1854_v63 = vmul.f32 %v1650_v43, %v1650_v43 }
 0x2e0   : > { %v1496_v50 = vpop.permute.xlu0 %1495  ;;  %v1855_v23 = vmul.f32 %v1753_v42, %v1753_v42 }
 0x2e1   : > { %v1652_v19 = vsub.f32 %v4547_v56, %v1496_v50  ;;  %v1653_v62 = vsub.f32 %v4550_v57, %v1496_v50 }
 0x2e2   : > { %2113 = vmatprep.mubr.f32.mxu0 %v1855_v23 }
 0x2e3   : > { %2114 = vmatmul.mubr.f32.gmra.mrb[114].mxu0 %v1854_v63  ;;  %v1755_v58 = vsel %vm1332_vm1, %v1653_v62, 0.0  ;;  %v1856_v35 = vmul.f32 %v1652_v19, %v1652_v19 }
 0x2e4   : > { %v1501_v30 = vpop.permute.xlu1 %1500  ;;  %v1857_v46 = vmul.f32 %v1755_v58, %v1755_v58 }
 0x2e5   : > { %v1654_v15 = vsub.f32 %v4557_v60, %v1501_v30  ;;  %v1655_v11 = vsub.f32 %v4560_v61, %v1501_v30  ;;  %v5344_v61 = vld [vmem:[%s5154_s17 + $0xf8] sm:$0xff]  ;;  %v6575_v60 = vmov 1  }
 0x2e6   : > { %2118 = vmatprep.mubr.f32.mxu0 %v1857_v46 }
 0x2e7   : > { %2119 = vmatmul.mubr.f32.gmra.mrb[116].mxu0 %v1856_v35  ;;  %v1757_v31 = vsel %vm1332_vm1, %v1655_v11, 0.0  ;;  %v1858_v63 = vmul.f32 %v1654_v15, %v1654_v15 }
 0x2e8   : > { %v1506_v42 = vpop.permute.xlu0 %1505  ;;  %v1859_v50 = vmul.f32 %v1757_v31, %v1757_v31 }
 0x2e9   : > { %v1656_v43 = vsub.f32 %v4567_v2, %v1506_v42  ;;  %v1657_v23 = vsub.f32 %v4570_v3, %v1506_v42 }
 0x2ea   : > { %2123 = vmatprep.mubr.f32.mxu0 %v1859_v50 }
 0x2eb   : > { %2124 = vmatmul.mubr.f32.gmra.mrb[118].mxu0 %v1858_v63  ;;  %v1759_v62 = vsel %vm1332_vm1, %v1657_v23, 0.0  ;;  %v1860_v35 = vmul.f32 %v1656_v43, %v1656_v43 }
 0x2ec   : > { %v1511_v58 = vpop.permute.xlu1 %1510  ;;  %v1861_v30 = vmul.f32 %v1759_v62, %v1759_v62 }
 0x2ed   : > { %v1658_v19 = vsub.f32 %v4577_v5, %v1511_v58  ;;  %v1659_v46 = vsub.f32 %v4580_v0, %v1511_v58 }
 0x2ee   : > { %2128 = vmatprep.mubr.f32.mxu0 %v1861_v30 }
 0x2ef   : > { %2129 = vmatmul.mubr.f32.gmra.mrb[120].mxu0 %v1860_v35  ;;  %v1761_v11 = vsel %vm1332_vm1, %v1659_v46, 0.0  ;;  %v1862_v63 = vmul.f32 %v1658_v19, %v1658_v19 }
 0x2f0   : > { %v1516_v31 = vpop.permute.xlu0 %1515  ;;  %v1863_v42 = vmul.f32 %v1761_v11, %v1761_v11 }
 0x2f1   : > { %v1660_v15 = vsub.f32 %v4587_v8, %v1516_v31  ;;  %v1661_v50 = vsub.f32 %v4590_v9, %v1516_v31 }
 0x2f2   : > { %2133 = vmatprep.mubr.f32.mxu0 %v1863_v42 }
 0x2f3   : > { %2134 = vmatmul.mubr.f32.gmra.mrb[122].mxu0 %v1862_v63  ;;  %v1763_v23 = vsel %vm1332_vm1, %v1661_v50, 0.0  ;;  %v1864_v35 = vmul.f32 %v1660_v15, %v1660_v15 }
 0x2f4   : > { %v1521_v62 = vpop.permute.xlu1 %1520  ;;  %v1865_v58 = vmul.f32 %v1763_v23, %v1763_v23 }
 0x2f5   : > { %v1662_v43 = vsub.f32 %v4597_v12, %v1521_v62  ;;  %v1663_v30 = vsub.f32 %v4600_v13, %v1521_v62 }
 0x2f6   : > { %2138 = vmatprep.mubr.f32.mxu0 %v1865_v58 }
 0x2f7   : > { %2139 = vmatmul.mubr.f32.gmra.mrb[124].mxu0 %v1864_v35  ;;  %v1765_v46 = vsel %vm1332_vm1, %v1663_v30, 0.0  ;;  %v1866_v63 = vmul.f32 %v1662_v43, %v1662_v43 }
 0x2f8   : > { %v1526_v11 = vpop.permute.xlu0 %1525  ;;  %v1867_v31 = vmul.f32 %v1765_v46, %v1765_v46 }
 0x2f9   : > { %v1664_v19 = vsub.f32 %v4607_v16, %v1526_v11  ;;  %v1665_v42 = vsub.f32 %v4610_v17, %v1526_v11 }
 0x2fa   : > { %2143 = vmatprep.mubr.f32.mxu0 %v1867_v31 }
 0x2fb   : > { %2144 = vmatmul.mubr.f32.gmra.mrb[126].mxu0 %v1866_v63  ;;  %v1767_v50 = vsel %vm1332_vm1, %v1665_v42, 0.0  ;;  %v1868_v35 = vmul.f32 %v1664_v19, %v1664_v19 }
 0x2fc   : > { %v1531_v23 = vpop.permute.xlu1 %1530  ;;  %v1869_v62 = vmul.f32 %v1767_v50, %v1767_v50 }
 0x2fd   : > { %v1666_v15 = vsub.f32 %v4617_v20, %v1531_v23  ;;  %v1667_v58 = vsub.f32 %v4620_v21, %v1531_v23 }
 0x2fe   : > { %2148 = vmatprep.mubr.f32.mxu0 %v1869_v62 }
 0x2ff   : > { %2149 = vmatmul.mubr.f32.gmra.mrb[128].mxu0 %v1868_v35  ;;  %v1769_v30 = vsel %vm1332_vm1, %v1667_v58, 0.0  ;;  %v1870_v63 = vmul.f32 %v1666_v15, %v1666_v15 }
 0x300   : > { %v1536_v46 = vpop.permute.xlu0 %1535  ;;  %v1871_v11 = vmul.f32 %v1769_v30, %v1769_v30 }
 0x301   : > { %v1668_v43 = vsub.f32 %v4627_v24, %v1536_v46  ;;  %v1669_v31 = vsub.f32 %v4630_v25, %v1536_v46 }
 0x302   : > { %2153 = vmatprep.mubr.f32.mxu0 %v1871_v11 }
 0x303   : > { %2154 = vmatmul.mubr.f32.gmra.mrb[130].mxu0 %v1870_v63  ;;  %v1771_v42 = vsel %vm1332_vm1, %v1669_v31, 0.0  ;;  %v1872_v35 = vmul.f32 %v1668_v43, %v1668_v43 }
 0x304   : > { %v1541_v50 = vpop.permute.xlu1 %1540  ;;  %v1873_v23 = vmul.f32 %v1771_v42, %v1771_v42 }
 0x305   : > { %v1670_v19 = vsub.f32 %v4637_v28, %v1541_v50  ;;  %v1671_v62 = vsub.f32 %v4640_v29, %v1541_v50 }
 0x306   : > { %2158 = vmatprep.mubr.f32.mxu0 %v1873_v23 }
 0x307   : > { %2159 = vmatmul.mubr.f32.gmra.mrb[132].mxu0 %v1872_v35  ;;  %v1773_v58 = vsel %vm1332_vm1, %v1671_v62, 0.0  ;;  %v1874_v63 = vmul.f32 %v1670_v19, %v1670_v19  ;;  %v6525_v19 = vld [vmem:[#allocation66_spill] sm:$0xff] }
 0x308   : > { %v1546_v30 = vpop.permute.xlu0 %1545  ;;  %v1875_v46 = vmul.f32 %v1773_v58, %v1773_v58 }
 0x309   : > { %v1672_v15 = vsub.f32 %v4647_v22, %v1546_v30  ;;  %v1673_v11 = vsub.f32 %v4650_v18, %v1546_v30 }
 0x30a   : > { %2163 = vmatprep.mubr.f32.mxu0 %v1875_v46 }
 0x30b   : > { %2164 = vmatmul.mubr.f32.gmra.mrb[134].mxu0 %v1874_v63  ;;  %v1775_v31 = vsel %vm1332_vm1, %v1673_v11, 0.0  ;;  %v1876_v35 = vmul.f32 %v1672_v15, %v1672_v15  ;;  %v6526_v63 = vld [vmem:[#allocation67_spill] sm:$0xff]  ;;  %v6527_v15 = vld [vmem:[#allocation70_spill] sm:$0xff] }
 0x30c   : > { %v1551_v42 = vpop.permute.xlu1 %1550  ;;  %v1877_v50 = vmul.f32 %v1775_v31, %v1775_v31 }
 0x30d   : > { %v1674_v43 = vsub.f32 %v4657_v26, %v1551_v42  ;;  %v1675_v23 = vsub.f32 %v4660_v14, %v1551_v42 }
 0x30e   : > { %2168 = vmatprep.mubr.f32.mxu0 %v1877_v50 }
 0x30f   : > { %2169 = vmatmul.mubr.f32.gmra.mrb[136].mxu0 %v1876_v35  ;;  %v1777_v62 = vsel %vm1332_vm1, %v1675_v23, 0.0  ;;  %v1878_v36 = vmul.f32 %v1674_v43, %v1674_v43  ;;  %v6528_v35 = vld [vmem:[#allocation71_spill] sm:$0xff]  ;;  %v6529_v43 = vld [vmem:[#allocation74_spill] sm:$0xff] }
 0x310   : > { %v1556_v58 = vpop.permute.xlu0 %1555  ;;  %v1879_v30 = vmul.f32 %v1777_v62, %v1777_v62 }
 0x311   : > { %v1676_v46 = vsub.f32 %v6525_v19, %v1556_v58  ;;  %v1677_v37 = vsub.f32 %v6526_v63, %v1556_v58 }
 0x312   : > { %2173 = vmatprep.mubr.f32.mxu0 %v1879_v30 }
 0x313   : > { %2174 = vmatmul.mubr.f32.gmra.mrb[138].mxu0 %v1878_v36  ;;  %v1779_v11 = vsel %vm1332_vm1, %v1677_v37, 0.0  ;;  %v1880_v47 = vmul.f32 %v1676_v46, %v1676_v46  ;;  %v6530_v36 = vld [vmem:[#allocation75_spill] sm:$0xff]  ;;  %v6531_v46 = vld [vmem:[#allocation78_spill] sm:$0xff] }
 0x314   : > { %v1561_v31 = vpop.permute.xlu1 %1560  ;;  %v1881_v42 = vmul.f32 %v1779_v11, %v1779_v11 }
 0x315   : > { %v1678_v50 = vsub.f32 %v6527_v15, %v1561_v31  ;;  %v1679_v55 = vsub.f32 %v6528_v35, %v1561_v31 }
 0x316   : > { %2178 = vmatprep.mubr.f32.mxu0 %v1881_v42 }
 0x317   : > { %2179 = vmatmul.mubr.f32.gmra.mrb[140].mxu0 %v1880_v47  ;;  %v1781_v23 = vsel %vm1332_vm1, %v1679_v55, 0.0  ;;  %v1882_v32 = vmul.f32 %v1678_v50, %v1678_v50  ;;  %v6532_v47 = vld [vmem:[#allocation79_spill] sm:$0xff]  ;;  %v6533_v50 = vld [vmem:[#allocation82_spill] sm:$0xff] }
 0x318   : > { %v1566_v62 = vpop.permute.xlu0 %1565  ;;  %v1883_v58 = vmul.f32 %v1781_v23, %v1781_v23 }
 0x319   : > { %v1680_v30 = vsub.f32 %v6529_v43, %v1566_v62  ;;  %v1681_v33 = vsub.f32 %v6530_v36, %v1566_v62 }
 0x31a   : > { %2183 = vmatprep.mubr.f32.mxu0 %v1883_v58 }
 0x31b   : > { %2184 = vmatmul.mubr.f32.gmra.mrb[142].mxu0 %v1882_v32  ;;  %v1783_v37 = vsel %vm1332_vm1, %v1681_v33, 0.0  ;;  %v1884_v1 = vmul.f32 %v1680_v30, %v1680_v30  ;;  %v6534_v32 = vld [vmem:[#allocation83_spill] sm:$0xff]  ;;  %v6535_v30 = vld [vmem:[#allocation86_spill] sm:$0xff] }
 0x31c   : > { %v1571_v11 = vpop.permute.xlu1 %1570  ;;  %v1885_v31 = vmul.f32 %v1783_v37, %v1783_v37 }
 0x31d   : > { %v1682_v42 = vsub.f32 %v6531_v46, %v1571_v11  ;;  %v1683_v6 = vsub.f32 %v6532_v47, %v1571_v11 }
 0x31e   : > { %2188 = vmatprep.mubr.f32.mxu0 %v1885_v31 }
 0x31f   : > { %2189 = vmatmul.mubr.f32.gmra.mrb[144].mxu0 %v1884_v1  ;;  %v1785_v55 = vsel %vm1332_vm1, %v1683_v6, 0.0  ;;  %v1886_v51 = vmul.f32 %v1682_v42, %v1682_v42  ;;  %v6536_v1 = vld [vmem:[#allocation87_spill] sm:$0xff]  ;;  %v6537_v42 = vld [vmem:[#allocation90_spill] sm:$0xff] }
 0x320   : > { %v1576_v23 = vpop.permute.xlu0 %1575  ;;  %v1887_v62 = vmul.f32 %v1785_v55, %v1785_v55 }
 0x321   : > { %v1684_v58 = vsub.f32 %v6533_v50, %v1576_v23  ;;  %v1685_v4 = vsub.f32 %v6534_v32, %v1576_v23 }
 0x322   : > { %2193 = vmatprep.mubr.f32.mxu0 %v1887_v62 }
 0x323   : > { %2194 = vmatmul.mubr.f32.gmra.mrb[146].mxu0 %v1886_v51  ;;  %v1787_v33 = vsel %vm1332_vm1, %v1685_v4, 0.0  ;;  %v1888_v38 = vmul.f32 %v1684_v58, %v1684_v58  ;;  %v6538_v51 = vld [vmem:[#allocation91_spill] sm:$0xff] }
 0x324   : > { %v1581_v37 = vpop.permute.xlu1 %1580  ;;  %v1889_v11 = vmul.f32 %v1787_v33, %v1787_v33 }
 0x325   : > { %v1686_v31 = vsub.f32 %v6535_v30, %v1581_v37  ;;  %v1687_v59 = vsub.f32 %v6536_v1, %v1581_v37 }
 0x326   : > { %2198 = vmatprep.mubr.f32.mxu0 %v1889_v11 }
 0x327   : > { %2199 = vmatmul.mubr.f32.gmra.mrb[148].mxu0 %v1888_v38  ;;  %v1789_v6 = vsel %vm1332_vm1, %v1687_v59, 0.0  ;;  %v1890_v32 = vmul.f32 %v1686_v31, %v1686_v31 }
 0x328   : > { %v1586_v55 = vpop.permute.xlu0 %1585  ;;  %v1891_v23 = vmul.f32 %v1789_v6, %v1789_v6 }
 0x329   : > { %v1688_v62 = vsub.f32 %v6537_v42, %v1586_v55  ;;  %v1689_v39 = vsub.f32 %v6538_v51, %v1586_v55 }
 0x32a   : > { %2203 = vmatprep.mubr.f32.mxu0 %v1891_v23 }
 0x32b   : > { %2204 = vmatmul.mubr.f32.gmra.mrb[150].mxu0 %v1890_v32  ;;  %v1791_v4 = vsel %vm1332_vm1, %v1689_v39, 0.0  ;;  %v1892_v58 = vmul.f32 %v1688_v62, %v1688_v62 }
 0x32c   : > { %v1893_v33 = vmul.f32 %v1791_v4, %v1791_v4 }
 0x32e   : > { %2208 = vmatprep.mubr.f32.mxu0 %v1893_v33  ;;  %v5157_v33 = vld [vmem:[%s5154_s17] sm:$0xff] }
 0x32f   : > { %2209 = vmatmul.mubr.f32.gmra.mrb[152].mxu0 %v1892_v58 }
 0x33a   : > { %v1960_v38 = vpop.f32.mrb[52].mxu0 }
 0x33b   : > { %v2214_v37 = vmul.f32 0.0051020407, %v1960_v38  ;;  %v1962_v59 = vpop.f32.mrb[53].mxu0 }
 0x33d   : > { %v2265_v11 = vadd.f32 1e-05, %v2214_v37 }
 0x33e   : > { %v1965_v6 = vpop.f32.mrb[54].mxu0 }
 0x33f   : > { %3897 = vrsqrt.f32 %v2265_v11  ;;  %v2215_v42 = vmul.f32 0.0051020407, %v1965_v6  ;;  %v1967_v1 = vpop.f32.mrb[55].mxu0  ;;  %v5161_v11 = vld [vmem:[%s5154_s17 + $0x8] sm:$0xff]  ;;  %v6539_v6 = vld [vmem:[#allocation94_spill] sm:$0xff] }
 0x341   : > { %v2266_v55 = vadd.f32 1e-05, %v2215_v42 }
 0x342   : > { %v1970_v31 = vpop.f32.mrb[56].mxu0 }
 0x343   : > { %3899 = vrsqrt.f32 %v2266_v55  ;;  %v2216_v32 = vmul.f32 0.0051020407, %v1970_v31  ;;  %v1972_v23 = vpop.f32.mrb[57].mxu0 }
 0x345   : > { %v2267_v10 = vadd.f32 1e-05, %v2216_v32 }
 0x346   : > { %v1975_v39 = vpop.f32.mrb[58].mxu0 }
 0x347   : > { %3901 = vrsqrt.f32 %v2267_v10  ;;  %v2217_v62 = vmul.f32 0.0051020407, %v1975_v39  ;;  %v1977_v4 = vpop.f32.mrb[59].mxu0 }
 0x348   : > { %v5167_v4 = vld [vmem:[%s5154_s17 + $0x10] sm:$0xff] }
 0x349   : > { %v3898_v1 = vpop.eup %3897  ;;  %v2268_v42 = vadd.f32 1e-05, %v2217_v62 }
 0x34a   : > { %v1980_v58 = vpop.f32.mrb[60].mxu0  ;;  %v2418_v38 = vmul.f32 %v3898_v1, %v5157_v33  ;;  %v6540_v1 = vld [vmem:[#allocation95_spill] sm:$0xff] }
 0x34b   : > { %3903 = vrsqrt.f32 %v2268_v42  ;;  %v2218_v37 = vmul.f32 0.0051020407, %v1980_v58  ;;  %v1982_v59 = vpop.f32.mrb[61].mxu0 }
 0x34c   : > { %2777 = vperm.xlu0 %3853, %v2418_v38   ;;  %v2469_v55 = vmul.f32 %v2418_v38, %v6539_v6 }
 0x34d   : > { %v3900_v31 = vpop.eup %3899  ;;  %v2269_v32 = vadd.f32 1e-05, %v2218_v37 }
 0x34e   : > { %v1985_v23 = vpop.f32.mrb[62].mxu0  ;;  %2571 = vrot.lane.b32.xlu1 %v2469_v55, %s4010_s18  ;;  %v2419_v10 = vmul.f32 %v3900_v31, %v5161_v11  ;;  %v5173_v55 = vld [vmem:[%s5154_s17 + $0x18] sm:$0xff]  ;;  %v6541_v31 = vld [vmem:[#allocation96_spill] sm:$0xff] }
 0x34f   : > { %3905 = vrsqrt.f32 %v2269_v32  ;;  %v2219_v39 = vmul.f32 0.0051020407, %v1985_v23  ;;  %v1987_v62 = vpop.f32.mrb[63].mxu0 }
 0x350   : > { %v2470_v42 = vmul.f32 %v2419_v10, %v6540_v1 }
 0x351   : > { %v3902_v58 = vpop.eup %3901  ;;  %v2270_v59 = vadd.f32 1e-05, %v2219_v39 }
 0x352   : > { %v1990_v51 = vpop.f32.mrb[64].mxu0  ;;  %2782 = vperm.xlu1 %3854, %v2419_v10   ;;  %2573 = vrot.lane.b32.xlu0 %v2470_v42, %s4010_s18  ;;  %v2420_v38 = vmul.f32 %v3902_v58, %v5167_v4  ;;  %v5179_v42 = vld [vmem:[%s5154_s17 + $0x20] sm:$0xff] }
 0x353   : > { %3907 = vrsqrt.f32 %v2270_v59  ;;  %v2220_v37 = vmul.f32 0.0051020407, %v1990_v51  ;;  %v1992_v6 = vpop.f32.mrb[65].mxu0  ;;  %v6542_v51 = vld [vmem:[#allocation97_spill] sm:$0xff] }
 0x354   : > { %v2471_v32 = vmul.f32 %v2420_v38, %v6541_v31  ;;  %6573 = vst [vmem:[#allocation97_spill] sm:$0xff] %v5344_v61 }
 0x355   : > { %v3904_v23 = vpop.eup %3903  ;;  %v2271_v62 = vadd.f32 1e-05, %v2220_v37 }
 0x356   : > { %v1995_v30 = vpop.f32.mrb[66].mxu0  ;;  %2575 = vrot.lane.b32.xlu1 %v2471_v32, %s4010_s18  ;;  %2787 = vperm.xlu0 %3853, %v2420_v38   ;;  %v2421_v10 = vmul.f32 %v3904_v23, %v5173_v55  ;;  %v5185_v32 = vld [vmem:[%s5154_s17 + $0x28] sm:$0xff] }
 0x357   : > { %3909 = vrsqrt.f32 %v2271_v62  ;;  %v2221_v39 = vmul.f32 0.0051020407, %v1995_v30  ;;  %v1997_v1 = vpop.f32.mrb[67].mxu0  ;;  %v6543_v30 = vld [vmem:[#allocation98_spill] sm:$0xff] }
 0x358   : > { %v2472_v58 = vmul.f32 %v2421_v10, %v6542_v51 }
 0x359   : > { %v3906_v59 = vpop.eup %3905  ;;  %v2272_v6 = vadd.f32 1e-05, %v2221_v39 }
 0x35a   : > { %v2000_v50 = vpop.f32.mrb[68].mxu0  ;;  %2792 = vperm.xlu1 %3854, %v2421_v10   ;;  %2577 = vrot.lane.b32.xlu0 %v2472_v58, %s4010_s18  ;;  %v2422_v37 = vmul.f32 %v3906_v59, %v5179_v42  ;;  %v5191_v58 = vld [vmem:[%s5154_s17 + $0x30] sm:$0xff] }
 0x35b   : > { %3911 = vrsqrt.f32 %v2272_v6  ;;  %v2222_v38 = vmul.f32 0.0051020407, %v2000_v50  ;;  %v2002_v31 = vpop.f32.mrb[69].mxu0  ;;  %v6544_v50 = vld [vmem:[#allocation99_spill] sm:$0xff] }
 0x35c   : > { %v2473_v23 = vmul.f32 %v2422_v37, %v6543_v30 }
 0x35d   : > { %v3908_v62 = vpop.eup %3907  ;;  %v2273_v1 = vadd.f32 1e-05, %v2222_v38 }
 0x35e   : > { %v2005_v47 = vpop.f32.mrb[70].mxu0  ;;  %2579 = vrot.lane.b32.xlu1 %v2473_v23, %s4010_s18  ;;  %2797 = vperm.xlu0 %3853, %v2422_v37   ;;  %v2423_v10 = vmul.f32 %v3908_v62, %v5185_v32  ;;  %v5197_v23 = vld [vmem:[%s5154_s17 + $0x38] sm:$0xff] }
 0x35f   : > { %3913 = vrsqrt.f32 %v2273_v1  ;;  %v2223_v39 = vmul.f32 0.0051020407, %v2005_v47  ;;  %v2007_v51 = vpop.f32.mrb[71].mxu0  ;;  %v6545_v47 = vld [vmem:[#allocation100_spill] sm:$0xff] }
 0x360   : > { %v2474_v59 = vmul.f32 %v2423_v10, %v6544_v50 }
 0x361   : > { %v3910_v6 = vpop.eup %3909  ;;  %v2274_v31 = vadd.f32 1e-05, %v2223_v39 }
 0x362   : > { %v2010_v46 = vpop.f32.mrb[72].mxu0  ;;  %2802 = vperm.xlu1 %3854, %v2423_v10   ;;  %2581 = vrot.lane.b32.xlu0 %v2474_v59, %s4010_s18  ;;  %v2424_v38 = vmul.f32 %v3910_v6, %v5191_v58  ;;  %v5203_v59 = vld [vmem:[%s5154_s17 + $0x40] sm:$0xff] }
 0x363   : > { %3915 = vrsqrt.f32 %v2274_v31  ;;  %v2224_v37 = vmul.f32 0.0051020407, %v2010_v46  ;;  %v2012_v30 = vpop.f32.mrb[73].mxu0  ;;  %v6546_v46 = vld [vmem:[#allocation101_spill] sm:$0xff] }
 0x364   : > { %v2475_v62 = vmul.f32 %v2424_v38, %v6545_v47 }
 0x365   : > { %v3912_v1 = vpop.eup %3911  ;;  %v2275_v51 = vadd.f32 1e-05, %v2224_v37 }
 0x366   : > { %v2015_v36 = vpop.f32.mrb[74].mxu0  ;;  %2583 = vrot.lane.b32.xlu1 %v2475_v62, %s4010_s18  ;;  %2807 = vperm.xlu0 %3853, %v2424_v38   ;;  %v2425_v10 = vmul.f32 %v3912_v1, %v5197_v23  ;;  %v5209_v62 = vld [vmem:[%s5154_s17 + $0x48] sm:$0xff] }
 0x367   : > { %3917 = vrsqrt.f32 %v2275_v51  ;;  %v2225_v39 = vmul.f32 0.0051020407, %v2015_v36  ;;  %v2017_v50 = vpop.f32.mrb[75].mxu0  ;;  %v6547_v36 = vld [vmem:[#allocation102_spill] sm:$0xff] }
 0x368   : > { %v2476_v6 = vmul.f32 %v2425_v10, %v6546_v46 }
 0x369   : > { %v3914_v31 = vpop.eup %3913  ;;  %v2276_v30 = vadd.f32 1e-05, %v2225_v39 }
 0x36a   : > { %v2020_v43 = vpop.f32.mrb[76].mxu0  ;;  %2812 = vperm.xlu1 %3854, %v2425_v10   ;;  %2585 = vrot.lane.b32.xlu0 %v2476_v6, %s4010_s18  ;;  %v2426_v37 = vmul.f32 %v3914_v31, %v5203_v59  ;;  %v5215_v6 = vld [vmem:[%s5154_s17 + $0x50] sm:$0xff] }
 0x36b   : > { %3919 = vrsqrt.f32 %v2276_v30  ;;  %v2226_v38 = vmul.f32 0.0051020407, %v2020_v43  ;;  %v2022_v47 = vpop.f32.mrb[77].mxu0  ;;  %v6548_v43 = vld [vmem:[#allocation103_spill] sm:$0xff] }
 0x36c   : > { %v2477_v1 = vmul.f32 %v2426_v37, %v6547_v36 }
 0x36d   : > { %v3916_v51 = vpop.eup %3915  ;;  %v2277_v50 = vadd.f32 1e-05, %v2226_v38 }
 0x36e   : > { %v2025_v35 = vpop.f32.mrb[78].mxu0  ;;  %2587 = vrot.lane.b32.xlu1 %v2477_v1, %s4010_s18  ;;  %2817 = vperm.xlu0 %3853, %v2426_v37   ;;  %v2427_v10 = vmul.f32 %v3916_v51, %v5209_v62  ;;  %v5221_v1 = vld [vmem:[%s5154_s17 + $0x58] sm:$0xff] }
 0x36f   : > { %3921 = vrsqrt.f32 %v2277_v50  ;;  %v2227_v39 = vmul.f32 0.0051020407, %v2025_v35  ;;  %v2027_v46 = vpop.f32.mrb[79].mxu0  ;;  %v6549_v35 = vld [vmem:[#allocation104_spill] sm:$0xff] }
 0x370   : > { %v2478_v31 = vmul.f32 %v2427_v10, %v6548_v43 }
 0x371   : > { %v3918_v30 = vpop.eup %3917  ;;  %v2278_v47 = vadd.f32 1e-05, %v2227_v39 }
 0x372   : > { %v2030_v15 = vpop.f32.mrb[80].mxu0  ;;  %2822 = vperm.xlu1 %3854, %v2427_v10   ;;  %2589 = vrot.lane.b32.xlu0 %v2478_v31, %s4010_s18  ;;  %v2428_v38 = vmul.f32 %v3918_v30, %v5215_v6  ;;  %v5227_v31 = vld [vmem:[%s5154_s17 + $0x60] sm:$0xff] }
 0x373   : > { %3923 = vrsqrt.f32 %v2278_v47  ;;  %v2228_v37 = vmul.f32 0.0051020407, %v2030_v15  ;;  %v2032_v36 = vpop.f32.mrb[81].mxu0  ;;  %v6550_v15 = vld [vmem:[#allocation105_spill] sm:$0xff] }
 0x374   : > { %v2479_v51 = vmul.f32 %v2428_v38, %v6549_v35 }
 0x375   : > { %v3920_v50 = vpop.eup %3919  ;;  %v2279_v46 = vadd.f32 1e-05, %v2228_v37 }
 0x376   : > { %v2035_v63 = vpop.f32.mrb[82].mxu0  ;;  %2591 = vrot.lane.b32.xlu1 %v2479_v51, %s4010_s18  ;;  %2827 = vperm.xlu0 %3853, %v2428_v38   ;;  %v2429_v10 = vmul.f32 %v3920_v50, %v5221_v1  ;;  %v5233_v51 = vld [vmem:[%s5154_s17 + $0x68] sm:$0xff] }
 0x377   : > { %3925 = vrsqrt.f32 %v2279_v46  ;;  %v2229_v39 = vmul.f32 0.0051020407, %v2035_v63  ;;  %v2037_v43 = vpop.f32.mrb[83].mxu0  ;;  %v6551_v63 = vld [vmem:[#allocation106_spill] sm:$0xff] }
 0x378   : > { %v2480_v30 = vmul.f32 %v2429_v10, %v6550_v15 }
 0x379   : > { %v3922_v47 = vpop.eup %3921  ;;  %v2280_v36 = vadd.f32 1e-05, %v2229_v39 }
 0x37a   : > { %v2040_v19 = vpop.f32.mrb[84].mxu0  ;;  %2832 = vperm.xlu1 %3854, %v2429_v10   ;;  %2593 = vrot.lane.b32.xlu0 %v2480_v30, %s4010_s18  ;;  %v2430_v37 = vmul.f32 %v3922_v47, %v5227_v31  ;;  %v5239_v30 = vld [vmem:[%s5154_s17 + $0x70] sm:$0xff] }
 0x37b   : > { %3927 = vrsqrt.f32 %v2280_v36  ;;  %v2230_v38 = vmul.f32 0.0051020407, %v2040_v19  ;;  %v2042_v35 = vpop.f32.mrb[85].mxu0  ;;  %v6552_v19 = vld [vmem:[#allocation107_spill] sm:$0xff] }
 0x37c   : > { %v2481_v50 = vmul.f32 %v2430_v37, %v6551_v63 }
 0x37d   : > { %v3924_v46 = vpop.eup %3923  ;;  %v2281_v43 = vadd.f32 1e-05, %v2230_v38 }
 0x37e   : > { %v2045_v14 = vpop.f32.mrb[86].mxu0  ;;  %2595 = vrot.lane.b32.xlu1 %v2481_v50, %s4010_s18  ;;  %2837 = vperm.xlu0 %3853, %v2430_v37   ;;  %v2431_v10 = vmul.f32 %v3924_v46, %v5233_v51  ;;  %v5245_v50 = vld [vmem:[%s5154_s17 + $0x78] sm:$0xff] }
 0x37f   : > { %3929 = vrsqrt.f32 %v2281_v43  ;;  %v2231_v39 = vmul.f32 0.0051020407, %v2045_v14  ;;  %v2047_v15 = vpop.f32.mrb[87].mxu0  ;;  %v6553_v14 = vld [vmem:[#allocation108_spill] sm:$0xff] }
 0x380   : > { %v2482_v47 = vmul.f32 %v2431_v10, %v6552_v19 }
 0x381   : > { %v3926_v36 = vpop.eup %3925  ;;  %v2282_v35 = vadd.f32 1e-05, %v2231_v39 }
 0x382   : > { %v2050_v26 = vpop.f32.mrb[88].mxu0  ;;  %2842 = vperm.xlu1 %3854, %v2431_v10   ;;  %2597 = vrot.lane.b32.xlu0 %v2482_v47, %s4010_s18  ;;  %v2432_v38 = vmul.f32 %v3926_v36, %v5239_v30  ;;  %v5251_v47 = vld [vmem:[%s5154_s17 + $0x80] sm:$0xff] }
 0x383   : > { %3931 = vrsqrt.f32 %v2282_v35  ;;  %v2232_v37 = vmul.f32 0.0051020407, %v2050_v26  ;;  %v2052_v63 = vpop.f32.mrb[89].mxu0  ;;  %v6554_v26 = vld [vmem:[#allocation109_spill] sm:$0xff] }
 0x384   : > { %v2483_v46 = vmul.f32 %v2432_v38, %v6553_v14 }
 0x385   : > { %v3928_v43 = vpop.eup %3927  ;;  %v2283_v15 = vadd.f32 1e-05, %v2232_v37 }
 0x386   : > { %v2055_v18 = vpop.f32.mrb[90].mxu0  ;;  %2599 = vrot.lane.b32.xlu1 %v2483_v46, %s4010_s18  ;;  %2847 = vperm.xlu0 %3853, %v2432_v38   ;;  %v2433_v10 = vmul.f32 %v3928_v43, %v5245_v50  ;;  %v5257_v46 = vld [vmem:[%s5154_s17 + $0x88] sm:$0xff] }
 0x387   : > { %3933 = vrsqrt.f32 %v2283_v15  ;;  %v2233_v39 = vmul.f32 0.0051020407, %v2055_v18  ;;  %v2057_v19 = vpop.f32.mrb[91].mxu0  ;;  %v6555_v18 = vld [vmem:[#allocation110_spill] sm:$0xff] }
 0x388   : > { %v2484_v36 = vmul.f32 %v2433_v10, %v6554_v26 }
 0x389   : > { %v3930_v35 = vpop.eup %3929  ;;  %v2284_v63 = vadd.f32 1e-05, %v2233_v39 }
 0x38a   : > { %v2060_v22 = vpop.f32.mrb[92].mxu0  ;;  %2852 = vperm.xlu1 %3854, %v2433_v10   ;;  %2601 = vrot.lane.b32.xlu0 %v2484_v36, %s4010_s18  ;;  %v2434_v37 = vmul.f32 %v3930_v35, %v5251_v47  ;;  %v5263_v36 = vld [vmem:[%s5154_s17 + $0x90] sm:$0xff] }
 0x38b   : > { %3935 = vrsqrt.f32 %v2284_v63  ;;  %v2234_v38 = vmul.f32 0.0051020407, %v2060_v22  ;;  %v2062_v14 = vpop.f32.mrb[93].mxu0  ;;  %v6556_v22 = vld [vmem:[#allocation111_spill] sm:$0xff] }
 0x38c   : > { %v2485_v43 = vmul.f32 %v2434_v37, %v6555_v18 }
 0x38d   : > { %v3932_v15 = vpop.eup %3931  ;;  %v2285_v19 = vadd.f32 1e-05, %v2234_v38 }
 0x38e   : > { %v2065_v29 = vpop.f32.mrb[94].mxu0  ;;  %2603 = vrot.lane.b32.xlu1 %v2485_v43, %s4010_s18  ;;  %2857 = vperm.xlu0 %3853, %v2434_v37   ;;  %v2435_v10 = vmul.f32 %v3932_v15, %v5257_v46  ;;  %v5269_v43 = vld [vmem:[%s5154_s17 + $0x98] sm:$0xff] }
 0x38f   : > { %3937 = vrsqrt.f32 %v2285_v19  ;;  %v2235_v39 = vmul.f32 0.0051020407, %v2065_v29  ;;  %v2067_v26 = vpop.f32.mrb[95].mxu0  ;;  %v6557_v29 = vld [vmem:[#allocation112_spill] sm:$0xff] }
 0x390   : > { %v2486_v35 = vmul.f32 %v2435_v10, %v6556_v22 }
 0x391   : > { %v3934_v63 = vpop.eup %3933  ;;  %v2286_v14 = vadd.f32 1e-05, %v2235_v39 }
 0x392   : > { %v2070_v28 = vpop.f32.mrb[96].mxu0  ;;  %2862 = vperm.xlu1 %3854, %v2435_v10   ;;  %2605 = vrot.lane.b32.xlu0 %v2486_v35, %s4010_s18  ;;  %v2436_v38 = vmul.f32 %v3934_v63, %v5263_v36  ;;  %v5275_v35 = vld [vmem:[%s5154_s17 + $0xa0] sm:$0xff] }
 0x393   : > { %3939 = vrsqrt.f32 %v2286_v14  ;;  %v2236_v37 = vmul.f32 0.0051020407, %v2070_v28  ;;  %v2072_v18 = vpop.f32.mrb[97].mxu0  ;;  %v6558_v28 = vld [vmem:[#allocation113_spill] sm:$0xff] }
 0x394   : > { %v2487_v15 = vmul.f32 %v2436_v38, %v6557_v29 }
 0x395   : > { %v3936_v19 = vpop.eup %3935  ;;  %v2287_v26 = vadd.f32 1e-05, %v2236_v37 }
 0x396   : > { %v2075_v25 = vpop.f32.mrb[98].mxu0  ;;  %2607 = vrot.lane.b32.xlu1 %v2487_v15, %s4010_s18  ;;  %2867 = vperm.xlu0 %3853, %v2436_v38   ;;  %v2437_v10 = vmul.f32 %v3936_v19, %v5269_v43  ;;  %v5281_v15 = vld [vmem:[%s5154_s17 + $0xa8] sm:$0xff] }
 0x397   : > { %3941 = vrsqrt.f32 %v2287_v26  ;;  %v2237_v39 = vmul.f32 0.0051020407, %v2075_v25  ;;  %v2077_v22 = vpop.f32.mrb[99].mxu0  ;;  %v6559_v25 = vld [vmem:[#allocation114_spill] sm:$0xff] }
 0x398   : > { %v2488_v63 = vmul.f32 %v2437_v10, %v6558_v28 }
 0x399   : > { %v3938_v14 = vpop.eup %3937  ;;  %v2288_v18 = vadd.f32 1e-05, %v2237_v39 }
 0x39a   : > { %v2080_v24 = vpop.f32.mrb[100].mxu0  ;;  %2872 = vperm.xlu1 %3854, %v2437_v10   ;;  %2609 = vrot.lane.b32.xlu0 %v2488_v63, %s4010_s18  ;;  %v2438_v37 = vmul.f32 %v3938_v14, %v5275_v35  ;;  %v5287_v63 = vld [vmem:[%s5154_s17 + $0xb0] sm:$0xff] }
 0x39b   : > { %3943 = vrsqrt.f32 %v2288_v18  ;;  %v2238_v38 = vmul.f32 0.0051020407, %v2080_v24  ;;  %v2082_v29 = vpop.f32.mrb[101].mxu0  ;;  %v6560_v24 = vld [vmem:[#allocation115_spill] sm:$0xff] }
 0x39c   : > { %v2489_v19 = vmul.f32 %v2438_v37, %v6559_v25 }
 0x39d   : > { %v3940_v26 = vpop.eup %3939  ;;  %v2289_v22 = vadd.f32 1e-05, %v2238_v38 }
 0x39e   : > { %v2085_v21 = vpop.f32.mrb[102].mxu0  ;;  %2611 = vrot.lane.b32.xlu1 %v2489_v19, %s4010_s18  ;;  %2877 = vperm.xlu0 %3853, %v2438_v37   ;;  %v2439_v10 = vmul.f32 %v3940_v26, %v5281_v15  ;;  %v5293_v19 = vld [vmem:[%s5154_s17 + $0xb8] sm:$0xff] }
 0x39f   : > { %3945 = vrsqrt.f32 %v2289_v22  ;;  %v2239_v39 = vmul.f32 0.0051020407, %v2085_v21  ;;  %v2087_v28 = vpop.f32.mrb[103].mxu0  ;;  %v6561_v21 = vld [vmem:[#allocation116_spill] sm:$0xff] }
 0x3a0   : > { %v2490_v14 = vmul.f32 %v2439_v10, %v6560_v24 }
 0x3a1   : > { %v3942_v18 = vpop.eup %3941  ;;  %v2290_v29 = vadd.f32 1e-05, %v2239_v39 }
 0x3a2   : > { %v2090_v20 = vpop.f32.mrb[104].mxu0  ;;  %2882 = vperm.xlu1 %3854, %v2439_v10   ;;  %2613 = vrot.lane.b32.xlu0 %v2490_v14, %s4010_s18  ;;  %v2440_v38 = vmul.f32 %v3942_v18, %v5287_v63  ;;  %v5299_v14 = vld [vmem:[%s5154_s17 + $0xc0] sm:$0xff] }
 0x3a3   : > { %3947 = vrsqrt.f32 %v2290_v29  ;;  %v2240_v37 = vmul.f32 0.0051020407, %v2090_v20  ;;  %v2092_v25 = vpop.f32.mrb[105].mxu0  ;;  %v6562_v20 = vld [vmem:[#allocation117_spill] sm:$0xff] }
 0x3a4   : > { %v2491_v26 = vmul.f32 %v2440_v38, %v6561_v21 }
 0x3a5   : > { %v3944_v22 = vpop.eup %3943  ;;  %v2291_v28 = vadd.f32 1e-05, %v2240_v37 }
 0x3a6   : > { %v2095_v17 = vpop.f32.mrb[106].mxu0  ;;  %2615 = vrot.lane.b32.xlu1 %v2491_v26, %s4010_s18  ;;  %2887 = vperm.xlu0 %3853, %v2440_v38   ;;  %v2441_v10 = vmul.f32 %v3944_v22, %v5293_v19  ;;  %v5305_v26 = vld [vmem:[%s5154_s17 + $0xc8] sm:$0xff] }
 0x3a7   : > { %3949 = vrsqrt.f32 %v2291_v28  ;;  %v2241_v39 = vmul.f32 0.0051020407, %v2095_v17  ;;  %v2097_v24 = vpop.f32.mrb[107].mxu0  ;;  %v6563_v17 = vld [vmem:[#allocation118_spill] sm:$0xff] }
 0x3a8   : > { %v2492_v18 = vmul.f32 %v2441_v10, %v6562_v20 }
 0x3a9   : > { %v3946_v29 = vpop.eup %3945  ;;  %v2292_v25 = vadd.f32 1e-05, %v2241_v39 }
 0x3aa   : > { %v2100_v16 = vpop.f32.mrb[108].mxu0  ;;  %2892 = vperm.xlu1 %3854, %v2441_v10   ;;  %2617 = vrot.lane.b32.xlu0 %v2492_v18, %s4010_s18  ;;  %v2442_v37 = vmul.f32 %v3946_v29, %v5299_v14  ;;  %v5311_v18 = vld [vmem:[%s5154_s17 + $0xd0] sm:$0xff] }
 0x3ab   : > { %3951 = vrsqrt.f32 %v2292_v25  ;;  %v2242_v38 = vmul.f32 0.0051020407, %v2100_v16  ;;  %v2102_v21 = vpop.f32.mrb[109].mxu0  ;;  %v6564_v16 = vld [vmem:[#allocation119_spill] sm:$0xff] }
 0x3ac   : > { %v2493_v22 = vmul.f32 %v2442_v37, %v6563_v17 }
 0x3ad   : > { %v3948_v28 = vpop.eup %3947  ;;  %v2293_v24 = vadd.f32 1e-05, %v2242_v38 }
 0x3ae   : > { %v2105_v13 = vpop.f32.mrb[110].mxu0  ;;  %2619 = vrot.lane.b32.xlu1 %v2493_v22, %s4010_s18  ;;  %2897 = vperm.xlu0 %3853, %v2442_v37   ;;  %v2443_v10 = vmul.f32 %v3948_v28, %v5305_v26  ;;  %v5317_v22 = vld [vmem:[%s5154_s17 + $0xd8] sm:$0xff] }
 0x3af   : > { %3953 = vrsqrt.f32 %v2293_v24  ;;  %v2243_v39 = vmul.f32 0.0051020407, %v2105_v13  ;;  %v2107_v20 = vpop.f32.mrb[111].mxu0  ;;  %6565 = vst [vmem:[#allocation94_spill] sm:$0xff] %v5317_v22  ;;  %v6566_v13 = vld [vmem:[#allocation120_spill] sm:$0xff] }
 0x3b0   : > { %v2494_v29 = vmul.f32 %v2443_v10, %v6564_v16 }
 0x3b1   : > { %v3950_v25 = vpop.eup %3949  ;;  %v2294_v21 = vadd.f32 1e-05, %v2243_v39 }
 0x3b2   : > { %v2110_v12 = vpop.f32.mrb[112].mxu0  ;;  %2902 = vperm.xlu1 %3854, %v2443_v10   ;;  %2621 = vrot.lane.b32.xlu0 %v2494_v29, %s4010_s18  ;;  %v2444_v38 = vmul.f32 %v3950_v25, %v5311_v18  ;;  %v5323_v29 = vld [vmem:[%s5154_s17 + $0xe0] sm:$0xff] }
 0x3b3   : > { %3955 = vrsqrt.f32 %v2294_v21  ;;  %v2244_v37 = vmul.f32 0.0051020407, %v2110_v12  ;;  %v2112_v17 = vpop.f32.mrb[113].mxu0  ;;  %v6567_v12 = vld [vmem:[#allocation121_spill] sm:$0xff] }
 0x3b4   : > { %v2495_v28 = vmul.f32 %v2444_v38, %v6566_v13 }
 0x3b5   : > { %v3952_v24 = vpop.eup %3951  ;;  %v2295_v20 = vadd.f32 1e-05, %v2244_v37 }
 0x3b6   : > { %v2115_v16 = vpop.f32.mrb[114].mxu0  ;;  %2623 = vrot.lane.b32.xlu1 %v2495_v28, %s4010_s18  ;;  %2907 = vperm.xlu0 %3853, %v2444_v38   ;;  %v2445_v10 = vmul.f32 %v3952_v24, %v5317_v22  ;;  %v5329_v28 = vld [vmem:[%s5154_s17 + $0xe8] sm:$0xff]  ;;  %v6569_v24 = vld [vmem:[#allocation122_spill] sm:$0xff] }
 0x3b7   : > { %3957 = vrsqrt.f32 %v2295_v20  ;;  %v2117_v39 = vpop.f32.mrb[115].mxu0  ;;  %v2245_v25 = vmul.f32 0.0051020407, %v2115_v16  ;;  %6568 = vst [vmem:[#allocation95_spill] sm:$0xff] %v5329_v28 }
 0x3b8   : > { %v2496_v21 = vmul.f32 %v2445_v10, %v6567_v12 }
 0x3b9   : > { %v3954_v17 = vpop.eup %3953  ;;  %v2296_v38 = vadd.f32 1e-05, %v2245_v25 }
 0x3ba   : > { %v2120_v9 = vpop.f32.mrb[116].mxu0  ;;  %2912 = vperm.xlu1 %3854, %v2445_v10   ;;  %2625 = vrot.lane.b32.xlu0 %v2496_v21, %s4010_s18  ;;  %v2446_v37 = vmul.f32 %v3954_v17, %v5323_v29  ;;  %v6570_v10 = vld [vmem:[#allocation123_spill] sm:$0xff]  ;;  %v5336_v17 = vld [vmem:[%s5154_s17 + $0xf0] sm:$0xff] }
 0x3bb   : > { %v2122_v13 = vpop.f32.mrb[117].mxu0  ;;  %3959 = vrsqrt.f32 %v2296_v38  ;;  %v2246_v5 = vmul.f32 0.0051020407, %v2120_v9  ;;  %6571 = vst [vmem:[#allocation96_spill] sm:$0xff] %v5336_v17 }
 0x3bc   : > { %v2497_v20 = vmul.f32 %v2446_v37, %v6569_v24 }
 0x3bd   : > { %v3956_v39 = vpop.eup %3955 }
 0x3be   : > { %v2125_v8 = vpop.f32.mrb[118].mxu0  ;;  %2627 = vrot.lane.b32.xlu1 %v2497_v20, %s4010_s18  ;;  %2917 = vperm.xlu0 %3853, %v2446_v37   ;;  %v2447_v16 = vmul.f32 %v3956_v39, %v5329_v28  ;;  %v2297_v20 = vadd.f32 1e-05, %v2246_v5 }
 0x3bf   : > { %v2127_v12 = vpop.f32.mrb[119].mxu0  ;;  %v2247_v25 = vmul.f32 0.0051020407, %v2125_v8 }
 0x3c0   : > { %v2498_v21 = vmul.f32 %v2447_v16, %v6570_v10  ;;  %v2572_v13 = vpop.permute.xlu1 %2571  ;;  %v6315_v12 = vmov 1   ;;  %3961 = vrsqrt.f32 %v2297_v20 }
 0x3c1   : > { %v3958_v0 = vpop.eup %3957  ;;  %v2724_v39 = vsub.f32 %v5157_v33, %v2572_v13  ;;  %v2298_v9 = vadd.f32 1e-05, %v2247_v25  ;;  %v6574_v33 = vmov 0  }
 0x3c2   : > { %v2130_v3 = vpop.f32.mrb[120].mxu0  ;;  %2922 = vperm.xlu1 %3854, %v2447_v16   ;;  %2629 = vrot.lane.b32.xlu0 %v2498_v21, %s4010_s18  ;;  %v2448_v37 = vmul.f32 %v3958_v0, %v5336_v17  ;;  %v6572_v16 = vld [vmem:[#allocation124_spill] sm:$0xff] }
 0x3c3   : > { %v2132_v24 = vpop.f32.mrb[121].mxu0  ;;  %3963 = vrsqrt.f32 %v2298_v9  ;;  %v2248_v25 = vmul.f32 0.0051020407, %v2130_v3 }
 0x3c4   : > { %v2499_v2 = vmul.f32 %v2448_v37, %v6572_v16 }
 0x3c5   : > { %v3960_v21 = vpop.eup %3959  ;;  %v2299_v16 = vadd.f32 1e-05, %v2248_v25 }
 0x3c6   : > { %v2135_v38 = vpop.f32.mrb[122].mxu0  ;;  %3855 = vset.pattern.permute.xlu1 %v6315_v12  ;;  %2927 = vperm.xlu0 %3853, %v2448_v37   ;;  %v2449_v13 = vmul.f32 %v3960_v21, %v5344_v61  ;;  %v5359_v21 = vld [vmem:[%s5154_s17 + $0x100] sm:$0xff] }
 0x3c7   : > { %v2137_v10 = vpop.f32.mrb[123].mxu0  ;;  %3134 = vperm.xlu1 %3855, %v2724_v39   ;;  %v2249_v39 = vmul.f32 0.0051020407, %v2135_v38  ;;  %6576 = vst [vmem:[#allocation98_spill] sm:$0xff] %v5359_v21  ;;  %3965 = vrsqrt.f32 %v2299_v16 }
 0x3c9   : > { %v2300_v3 = vadd.f32 1e-05, %v2249_v39 }
 0x3ca   : > { %v2140_v8 = vpop.f32.mrb[124].mxu0  ;;  %3856 = vset.pattern.permute.xlu0 %v6315_v12 }
 0x3cb   : > { %v2142_v5 = vpop.f32.mrb[125].mxu0  ;;  %2631 = vrot.lane.b32.xlu1 %v2499_v2, %s4010_s18  ;;  %v5348_v0 = vpop.permute.xlu0 %2777  ;;  %3967 = vrsqrt.f32 %v2300_v3 }
 0x3cc   : > { %3857 = vset.pattern.permute.xlu1 %v6574_v33  ;;  %v3962_v5 = vpop.eup %3961 }
 0x3cd   : > { %v3964_v28 = vpop.eup %3963 }
 0x3ce   : > { %v2145_v24 = vpop.f32.mrb[126].mxu0 }
 0x3cf   : > { %v2147_v37 = vpop.f32.mrb[127].mxu0  ;;  %2932 = vperm.xlu1 %3857, %v2449_v13   ;;  %v2574_v20 = vpop.permute.xlu0 %2573 }
 0x3d0   : > { %v2725_v10 = vsub.f32 %v5161_v11, %v2574_v20  ;;  %v6577_v37 = vld [vmem:[#allocation125_spill] sm:$0xff]  ;;  %v5365_v11 = vld [vmem:[%s5154_s17 + $0x108] sm:$0xff] }
 0x3d1   : > { %v5353_v9 = vpop.permute.xlu1 %2782  ;;  %v2500_v61 = vmul.f32 %v2449_v13, %v6577_v37  ;;  %6578 = vst [vmem:[#allocation99_spill] sm:$0xff] %v5365_v11  ;;  %v2451_v13 = vmul.f32 %v3964_v28, %v5365_v11 }
 0x3d2   : > { %v5355_v2 = vpop.f32.mrb[128].mxu0  ;;  %3139 = vperm.xlu0 %3856, %v2725_v10  }
 0x3d3   : > { %v2152_v12 = vpop.f32.mrb[129].mxu0  ;;  %3858 = vset.pattern.permute.xlu1 %v6575_v60  ;;  %v2502_v16 = vmul.f32 %v2451_v13, %v4894_v54  ;;  %v5388_v54 = vld [vmem:[%s5154_s17 + $0x110] sm:$0xff] }
 0x3d4   : > { %v2450_v12 = vmul.f32 %v3962_v5, %v5359_v21  ;;  %v2251_v5 = vmul.f32 0.0051020407, %v2145_v24  ;;  %v5395_v21 = vld [vmem:[%s5154_s17 + $0x118] sm:$0xff] }
 0x3d5   : > { %v2576_v17 = vpop.permute.xlu1 %2575  ;;  %v5362_v38 = vpop.permute.xlu0 %2787  ;;  %6580 = vst [vmem:[#allocation101_spill] sm:$0xff] %v5395_v21 }
 0x3d6   : > { %v2726_v25 = vsub.f32 %v5167_v4, %v2576_v17  ;;  %v2155_v20 = vpop.f32.mrb[130].mxu0  ;;  %2633 = vrot.lane.b32.xlu0 %v2500_v61, %s4010_s18  ;;  %v2501_v4 = vmul.f32 %v2450_v12, %v4888_v27  ;;  %v2250_v17 = vmul.f32 0.0051020407, %v2140_v8  ;;  %v3966_v8 = vpop.eup %3965  ;;  %v2302_v24 = vadd.f32 1e-05, %v2251_v5 }
 0x3d7   : > { %v2157_v10 = vpop.f32.mrb[131].mxu0  ;;  %3859 = vset.pattern.permute.xlu0 %v6574_v33 }
 0x3d8   : > { %3144 = vperm.xlu1 %3858, %v2726_v25   ;;  %v2301_v11 = vadd.f32 1e-05, %v2250_v17 }
 0x3d9   : > { %v5372_v39 = vpop.permute.xlu1 %2792  ;;  %v2578_v37 = vpop.permute.xlu0 %2577 }
 0x3da   : > { %v5374_v22 = vpop.f32.mrb[132].mxu0  ;;  %2937 = vperm.xlu0 %3859, %v2450_v12   ;;  %v2727_v28 = vsub.f32 %v5173_v55, %v2578_v37  ;;  %v3968_v55 = vpop.eup %3967  ;;  %3969 = vrsqrt.f32 %v2301_v11 }
 0x3db   : > { %v2162_v61 = vpop.f32.mrb[133].mxu0  ;;  %3971 = vrsqrt.f32 %v2302_v24  ;;  %v2453_v5 = vmul.f32 %v3968_v55, %v5395_v21 }
 0x3dc   : > { %2635 = vrot.lane.b32.xlu1 %v2501_v4, %s4010_s18 }
 0x3dd   : > { %v2580_v3 = vpop.permute.xlu1 %2579  ;;  %v5379_v25 = vpop.permute.xlu0 %2797  ;;  %v2504_v24 = vmul.f32 %v2453_v5, %v4908_v34 }
 0x3de   : > { %v5382_v10 = vpop.f32.mrb[134].mxu0  ;;  %2637 = vrot.lane.b32.xlu0 %v2502_v16, %s4010_s18  ;;  %v2728_v12 = vsub.f32 %v5179_v42, %v2580_v3  ;;  %v2452_v16 = vmul.f32 %v3966_v8, %v5388_v54 }
 0x3df   : > { %v2167_v27 = vpop.f32.mrb[135].mxu0  ;;  %3861 = vset.pattern.permute.xlu0 %v6575_v60 }
 0x3e0   : > { %3149 = vperm.xlu1 %3858, %v2727_v28   ;;  %v2503_v11 = vmul.f32 %v2452_v16, %v4901_v7 }
 0x3e1   : > { %v5390_v4 = vpop.permute.xlu1 %2802  ;;  %v2582_v61 = vpop.permute.xlu0 %2581 }
 0x3e2   : > { %6579 = vst [vmem:[#allocation100_spill] sm:$0xff] %v5390_v4  ;;  %v5392_v37 = vpop.f32.mrb[136].mxu0  ;;  %3154 = vperm.xlu0 %3861, %v2728_v12   ;;  %v2252_v12 = vmul.f32 0.0051020407, %v5355_v2 }
 0x3e3   : > { %v2172_v17 = vpop.f32.mrb[137].mxu0 }
 0x3e4   : > { %3860 = vset.pattern.permute.xlu1 %v6574_v33  ;;  %v2253_v17 = vmul.f32 0.0051020407, %v2155_v20  ;;  %v2303_v7 = vadd.f32 1e-05, %v2252_v12  ;;  %v3970_v2 = vpop.eup %3969  ;;  %v5421_v20 = vld [vmem:[%s5154_s17 + $0x120] sm:$0xff] }
 0x3e5   : > { %v2584_v42 = vpop.permute.xlu1 %2583  ;;  %2942 = vperm.xlu1 %3860, %v2451_v13   ;;  %v5399_v3 = vpop.permute.xlu0 %2807  ;;  %6584 = vst [vmem:[#allocation105_spill] sm:$0xff] %v5421_v20  ;;  %v2454_v12 = vmul.f32 %v3970_v2, %v5421_v20  ;;  %v2254_v2 = vmul.f32 0.0051020407, %v5374_v22 }
 0x3e6   : > { %6581 = vst [vmem:[#allocation102_spill] sm:$0xff] %v5399_v3  ;;  %v5402_v28 = vpop.f32.mrb[138].mxu0  ;;  %3862 = vset.pattern.permute.xlu0 %v6574_v33  ;;  %3973 = vrsqrt.f32 %v2303_v7 }
 0x3e7   : > { %v2177_v27 = vpop.f32.mrb[139].mxu0  ;;  %2947 = vperm.xlu0 %3862, %v2452_v16   ;;  %v2730_v16 = vsub.f32 %v5191_v58, %v2584_v42  ;;  %v2305_v22 = vadd.f32 1e-05, %v2254_v2 }
 0x3e8   : > { %v2729_v27 = vsub.f32 %v5185_v32, %v2582_v61  ;;  %v3972_v32 = vpop.eup %3971 }
 0x3e9   : > { %v5407_v8 = vpop.permute.xlu1 %2812  ;;  %2639 = vrot.lane.b32.xlu1 %v2503_v11, %s4010_s18  ;;  %v2586_v13 = vpop.permute.xlu0 %2585 }
 0x3ea   : > { %6582 = vst [vmem:[#allocation103_spill] sm:$0xff] %v5407_v8  ;;  %v5411_v55 = vpop.f32.mrb[140].mxu0  ;;  %3863 = vset.pattern.permute.xlu1 %v6575_v60  ;;  %v2304_v8 = vadd.f32 1e-05, %v2253_v17 }
 0x3eb   : > { %v2182_v21 = vpop.f32.mrb[141].mxu0  ;;  %2641 = vrot.lane.b32.xlu0 %v2504_v24, %s4010_s18 }
 0x3ec   : > { %3865 = vset.pattern.permute.xlu0 %v6575_v60  ;;  %v5426_v21 = vld [vmem:[%s5154_s17 + $0x128] sm:$0xff]  ;;  %3975 = vrsqrt.f32 %v2304_v8 }
 0x3ed   : > { %v2588_v11 = vpop.permute.xlu1 %2587  ;;  %3159 = vperm.xlu1 %3863, %v2729_v27   ;;  %v5418_v34 = vpop.permute.xlu0 %2817  ;;  %6585 = vst [vmem:[#allocation106_spill] sm:$0xff] %v5426_v21  ;;  %v2455_v17 = vmul.f32 %v3972_v32, %v5426_v21  ;;  %v6589_v8 = vld [vmem:[#allocation127_spill] sm:$0xff]  ;;  %v2255_v32 = vmul.f32 0.0051020407, %v5382_v10  ;;  %v5459_v10 = vld [vmem:[%s5154_s17 + $0x130] sm:$0xff]  ;;  %3977 = vrsqrt.f32 %v2305_v22 }
 0x3ee   : > { %6583 = vst [vmem:[#allocation104_spill] sm:$0xff] %v5418_v34  ;;  %v5423_v3 = vpop.f32.mrb[142].mxu0 }
 0x3ef   : > { %v2187_v61 = vpop.f32.mrb[143].mxu0  ;;  %3164 = vperm.xlu0 %3865, %v2730_v16   ;;  %v6587_v16 = vld [vmem:[#allocation126_spill] sm:$0xff] }
 0x3f0   : > { %v2505_v7 = vmul.f32 %v2454_v12, %v6587_v16 }
 0x3f1   : > { %v5429_v24 = vpop.permute.xlu1 %2822  ;;  %3864 = vset.pattern.permute.xlu1 %v6574_v33  ;;  %v5432_v58 = vpop.permute.xlu0 %2589 }
 0x3f2   : > { %6586 = vst [vmem:[#allocation107_spill] sm:$0xff] %v5429_v24  ;;  %v5434_v42 = vpop.f32.mrb[144].mxu0  ;;  %2952 = vperm.xlu1 %3864, %v2453_v5   ;;  %v2506_v5 = vmul.f32 %v2455_v17, %v6589_v8  ;;  %v2732_v8 = vsub.f32 %v5203_v59, %v2588_v11 }
 0x3f3   : > { %v2192_v27 = vpop.f32.mrb[145].mxu0  ;;  %3866 = vset.pattern.permute.xlu0 %v6574_v33 }
 0x3f4   : > { %2957 = vperm.xlu0 %3866, %v2454_v12   ;;  %v2731_v12 = vsub.f32 %v5197_v23, %v2586_v13  ;;  %v5462_v13 = vld [vmem:[%s5154_s17 + $0x138] sm:$0xff] }
 0x3f5   : > { %v2592_v61 = vpop.permute.xlu1 %2591  ;;  %v5440_v24 = vpop.permute.xlu0 %2827  ;;  %6591 = vst [vmem:[#allocation110_spill] sm:$0xff] %v5462_v13 }
 0x3f6   : > { %6588 = vst [vmem:[#allocation108_spill] sm:$0xff] %v5440_v24  ;;  %v5442_v34 = vpop.f32.mrb[146].mxu0  ;;  %2643 = vrot.lane.b32.xlu1 %v2505_v7, %s4010_s18  ;;  %v3974_v7 = vpop.eup %3973 }
 0x3f7   : > { %v2197_v27 = vpop.f32.mrb[147].mxu0  ;;  %3867 = vset.pattern.permute.xlu1 %v6575_v60  ;;  %v3976_v23 = vpop.eup %3975 }
 0x3f8   : > { %2645 = vrot.lane.b32.xlu0 %v2506_v5, %s4010_s18  ;;  %v2306_v27 = vadd.f32 1e-05, %v2255_v32  ;;  %v2457_v11 = vmul.f32 %v3976_v23, %v5462_v13  ;;  %v2257_v23 = vmul.f32 0.0051020407, %v5402_v28  ;;  %v5496_v28 = vld [vmem:[%s5154_s17 + $0x140] sm:$0xff] }
 0x3f9   : > { %v5450_v16 = vpop.permute.xlu1 %2832  ;;  %v5452_v24 = vpop.permute.xlu0 %2593  ;;  %3869 = vset.pattern.permute.xlu0 %v6575_v60 }
 0x3fa   : > { %6590 = vst [vmem:[#allocation109_spill] sm:$0xff] %v5450_v16  ;;  %v5456_v21 = vpop.f32.mrb[148].mxu0  ;;  %3169 = vperm.xlu1 %3867, %v2731_v12   ;;  %v2456_v16 = vmul.f32 %v3974_v7, %v5459_v10  ;;  %3979 = vrsqrt.f32 %v2306_v27  ;;  %v6594_v12 = vld [vmem:[#allocation128_spill] sm:$0xff]  ;;  %v2256_v7 = vmul.f32 0.0051020407, %v5392_v37 }
 0x3fb   : > { %v2202_v20 = vpop.f32.mrb[149].mxu0 }
 0x3fc   : > { %3174 = vperm.xlu0 %3869, %v2732_v8   ;;  %v2507_v22 = vmul.f32 %v2456_v16, %v6594_v12  ;;  %v2734_v12 = vsub.f32 %v5215_v6, %v2592_v61 }
 0x3fd   : > { %v5464_v2 = vpop.permute.xlu1 %2595  ;;  %v5466_v5 = vpop.permute.xlu0 %2837 }
 0x3fe   : > { %6592 = vst [vmem:[#allocation111_spill] sm:$0xff] %v5466_v5  ;;  %v5469_v4 = vpop.f32.mrb[150].mxu0  ;;  %3868 = vset.pattern.permute.xlu1 %v6574_v33 }
 0x3ff   : > { %v2207_v59 = vpop.f32.mrb[151].mxu0  ;;  %2962 = vperm.xlu1 %3868, %v2455_v17   ;;  %v6595_v17 = vld [vmem:[#allocation129_spill] sm:$0xff] }
 0x400   : > { %3870 = vset.pattern.permute.xlu0 %v6574_v33  ;;  %v2508_v27 = vmul.f32 %v2457_v11, %v6595_v17  ;;  %v2733_v59 = vsub.f32 %v5209_v62, %v5432_v58  ;;  %v5503_v58 = vld [vmem:[%s5154_s17 + $0x148] sm:$0xff] }
 0x401   : > { %v5474_v20 = vpop.permute.xlu1 %2842  ;;  %2967 = vperm.xlu0 %3870, %v2456_v16   ;;  %v5476_v32 = vpop.permute.xlu0 %2597  ;;  %v2307_v16 = vadd.f32 1e-05, %v2256_v7 }
 0x402   : > { %6593 = vst [vmem:[#allocation112_spill] sm:$0xff] %v5474_v20  ;;  %v5480_v8 = vpop.f32.mrb[152].mxu0 }
 0x403   : > { %v2212_v5 = vpop.f32.mrb[153].mxu0  ;;  %2647 = vrot.lane.b32.xlu1 %v2507_v22, %s4010_s18  ;;  %v2308_v22 = vadd.f32 1e-05, %v2257_v23  ;;  %3981 = vrsqrt.f32 %v2307_v16  ;;  %v6598_v23 = vld [vmem:[#allocation130_spill] sm:$0xff]  ;;  %v2258_v16 = vmul.f32 0.0051020407, %v5411_v55 }
 0x404   : > { %3871 = vset.pattern.permute.xlu1 %v6575_v60  ;;  %v3978_v5 = vpop.eup %3977 }
 0x405   : > { %v5488_v20 = vpop.permute.xlu1 %2599  ;;  %2649 = vrot.lane.b32.xlu0 %v2508_v27, %s4010_s18  ;;  %v5491_v37 = vpop.permute.xlu0 %2847  ;;  %v2458_v7 = vmul.f32 %v3978_v5, %v5496_v28  ;;  %3983 = vrsqrt.f32 %v2308_v22  ;;  %v6599_v5 = vld [vmem:[#allocation131_spill] sm:$0xff] }
 0x406   : > { %3873 = vset.pattern.permute.xlu0 %v6575_v60  ;;  %v3980_v17 = vpop.eup %3979 }
 0x407   : > { %3179 = vperm.xlu1 %3871, %v2733_v59   ;;  %v2459_v6 = vmul.f32 %v3980_v17, %v5503_v58  ;;  %v2509_v59 = vmul.f32 %v2458_v7, %v6598_v23  ;;  %v2736_v23 = vsub.f32 %v5227_v31, %v5464_v2 }
 0x409   : > { %v5498_v13 = vpop.permute.xlu1 %2852  ;;  %3184 = vperm.xlu0 %3873, %v2734_v12   ;;  %v5500_v62 = vpop.permute.xlu0 %2601  ;;  %v2510_v12 = vmul.f32 %v2459_v6, %v6599_v5 }
 0x40a   : > { %6596 = vst [vmem:[#allocation113_spill] sm:$0xff] %v5498_v13 }
 0x40b   : > { %3872 = vset.pattern.permute.xlu1 %v6574_v33 }
 0x40c   : > { %2972 = vperm.xlu1 %3872, %v2457_v11   ;;  %v2259_v11 = vmul.f32 0.0051020407, %v5423_v3  ;;  %v5530_v3 = vld [vmem:[%s5154_s17 + $0x150] sm:$0xff] }
 0x40d   : > { %v5508_v61 = vpop.permute.xlu1 %2603  ;;  %3874 = vset.pattern.permute.xlu0 %v6574_v33  ;;  %v5511_v27 = vpop.permute.xlu0 %2857 }
 0x40e   : > { %6597 = vst [vmem:[#allocation114_spill] sm:$0xff] %v5511_v27  ;;  %2977 = vperm.xlu0 %3874, %v2458_v7   ;;  %v2735_v27 = vsub.f32 %v5221_v1, %v5452_v24  ;;  %v2309_v7 = vadd.f32 1e-05, %v2258_v16  ;;  %v3982_v55 = vpop.eup %3981  ;;  %v5537_v1 = vld [vmem:[%s5154_s17 + $0x158] sm:$0xff] }
 0x40f   : > { %v3984_v13 = vpop.eup %3983  ;;  %v2460_v24 = vmul.f32 %v3982_v55, %v5530_v3 }
 0x410   : > { %2651 = vrot.lane.b32.xlu1 %v2509_v59, %s4010_s18  ;;  %v2310_v59 = vadd.f32 1e-05, %v2259_v11  ;;  %3985 = vrsqrt.f32 %v2309_v7  ;;  %v2461_v2 = vmul.f32 %v3984_v13, %v5537_v1  ;;  %v2260_v11 = vmul.f32 0.0051020407, %v5434_v42 }
 0x411   : > { %v5518_v22 = vpop.permute.xlu1 %2862  ;;  %v5520_v17 = vpop.permute.xlu0 %2605  ;;  %3875 = vset.pattern.permute.xlu1 %v6575_v60  ;;  %v2737_v13 = vsub.f32 %v5233_v51, %v5476_v32  ;;  %v5571_v51 = vld [vmem:[%s5154_s17 + $0x168] sm:$0xff] }
 0x412   : > { %6600 = vst [vmem:[#allocation115_spill] sm:$0xff] %v5518_v22  ;;  %2653 = vrot.lane.b32.xlu0 %v2510_v12, %s4010_s18  ;;  %3987 = vrsqrt.f32 %v2310_v59  ;;  %v2261_v59 = vmul.f32 0.0051020407, %v5442_v34  ;;  %v2311_v42 = vadd.f32 1e-05, %v2260_v11  ;;  %v5568_v34 = vld [vmem:[%s5154_s17 + $0x160] sm:$0xff] }
 0x413   : > { %3877 = vset.pattern.permute.xlu0 %v6575_v60 }
 0x414   : > { %3189 = vperm.xlu1 %3875, %v2735_v27   ;;  %v6602_v27 = vld [vmem:[#allocation132_spill] sm:$0xff]  ;;  %3989 = vrsqrt.f32 %v2311_v42 }
 0x415   : > { %v5532_v5 = vpop.permute.xlu1 %2607  ;;  %v5534_v22 = vpop.permute.xlu0 %2867  ;;  %v2511_v12 = vmul.f32 %v2460_v24, %v6602_v27  ;;  %v2738_v27 = vsub.f32 %v5239_v30, %v5488_v20 }
 0x416   : > { %3194 = vperm.xlu0 %3877, %v2736_v23   ;;  %v6604_v23 = vld [vmem:[#allocation133_spill] sm:$0xff] }
 0x418   : > { %3876 = vset.pattern.permute.xlu1 %v6574_v33 }
 0x419   : > { %v5541_v16 = vpop.permute.xlu1 %2872  ;;  %2982 = vperm.xlu1 %3876, %v2459_v6   ;;  %v5543_v31 = vpop.permute.xlu0 %2609  ;;  %v2512_v6 = vmul.f32 %v2461_v2, %v6604_v23 }
 0x41a   : > { %6601 = vst [vmem:[#allocation116_spill] sm:$0xff] %v5541_v16  ;;  %3878 = vset.pattern.permute.xlu0 %v6574_v33 }
 0x41b   : > { %2987 = vperm.xlu0 %3878, %v2460_v24   ;;  %v3986_v24 = vpop.eup %3985 }
 0x41c   : > { %v3988_v16 = vpop.eup %3987  ;;  %v2462_v32 = vmul.f32 %v3986_v24, %v5568_v34 }
 0x41d   : > { %v5549_v7 = vpop.permute.xlu1 %2611  ;;  %2655 = vrot.lane.b32.xlu1 %v2511_v12, %s4010_s18  ;;  %v5552_v55 = vpop.permute.xlu0 %2877  ;;  %v2463_v20 = vmul.f32 %v3988_v16, %v5571_v51  ;;  %v2739_v16 = vsub.f32 %v5245_v50, %v5500_v62  ;;  %v5605_v50 = vld [vmem:[%s5154_s17 + $0x178] sm:$0xff] }
 0x41e   : > { %6603 = vst [vmem:[#allocation117_spill] sm:$0xff] %v5552_v55  ;;  %3879 = vset.pattern.permute.xlu1 %v6575_v60  ;;  %v2312_v55 = vadd.f32 1e-05, %v2261_v59 }
 0x41f   : > { %2657 = vrot.lane.b32.xlu0 %v2512_v6, %s4010_s18  ;;  %v6606_v6 = vld [vmem:[#allocation134_spill] sm:$0xff] }
 0x420   : > { %3881 = vset.pattern.permute.xlu0 %v6575_v60  ;;  %3991 = vrsqrt.f32 %v2312_v55  ;;  %v2513_v59 = vmul.f32 %v2462_v32, %v6606_v6  ;;  %v3990_v6 = vpop.eup %3989 }
 0x421   : > { %v5563_v12 = vpop.permute.xlu1 %2882  ;;  %3199 = vperm.xlu1 %3879, %v2737_v13   ;;  %v5565_v23 = vpop.permute.xlu0 %2613  ;;  %v2262_v13 = vmul.f32 0.0051020407, %v5456_v21 }
 0x422   : > { %6605 = vst [vmem:[#allocation118_spill] sm:$0xff] %v5563_v12 }
 0x423   : > { %3204 = vperm.xlu0 %3881, %v2738_v27   ;;  %v6608_v27 = vld [vmem:[#allocation135_spill] sm:$0xff]  ;;  %v2313_v21 = vadd.f32 1e-05, %v2262_v13 }
 0x424   : > { %v2514_v12 = vmul.f32 %v2463_v20, %v6608_v27 }
 0x425   : > { %v5574_v11 = vpop.permute.xlu1 %2615  ;;  %3880 = vset.pattern.permute.xlu1 %v6574_v33  ;;  %v5577_v30 = vpop.permute.xlu0 %2887  ;;  %3993 = vrsqrt.f32 %v2313_v21 }
 0x426   : > { %2992 = vperm.xlu1 %3880, %v2461_v2   ;;  %v2263_v2 = vmul.f32 0.0051020407, %v5469_v4  ;;  %v5602_v4 = vld [vmem:[%s5154_s17 + $0x170] sm:$0xff] }
 0x427   : > { %3882 = vset.pattern.permute.xlu0 %v6574_v33  ;;  %v2464_v13 = vmul.f32 %v3990_v6, %v5602_v4  ;;  %v6613_v6 = vld [vmem:[#allocation137_spill] sm:$0xff] }
 0x428   : > { %2997 = vperm.xlu0 %3882, %v2462_v32   ;;  %v2314_v27 = vadd.f32 1e-05, %v2263_v2 }
 0x429   : > { %v5583_v42 = vpop.permute.xlu1 %2892  ;;  %v5585_v24 = vpop.permute.xlu0 %2617 }
 0x42a   : > { %6607 = vst [vmem:[#allocation119_spill] sm:$0xff] %v5583_v42  ;;  %2659 = vrot.lane.b32.xlu1 %v2513_v59, %s4010_s18  ;;  %v2740_v59 = vsub.f32 %v5251_v47, %v5508_v61  ;;  %v3992_v42 = vpop.eup %3991  ;;  %3995 = vrsqrt.f32 %v2314_v27 }
 0x42b   : > { %3883 = vset.pattern.permute.xlu1 %v6575_v60  ;;  %v2465_v47 = vmul.f32 %v3992_v42, %v5605_v50 }
 0x42c   : > { %2661 = vrot.lane.b32.xlu0 %v2514_v12, %s4010_s18 }
 0x42d   : > { %v5594_v55 = vpop.permute.xlu1 %2619  ;;  %v5596_v32 = vpop.permute.xlu0 %2897  ;;  %3885 = vset.pattern.permute.xlu0 %v6575_v60 }
 0x42e   : > { %6609 = vst [vmem:[#allocation120_spill] sm:$0xff] %v5596_v32  ;;  %3209 = vperm.xlu1 %3883, %v2739_v16   ;;  %v6612_v16 = vld [vmem:[#allocation136_spill] sm:$0xff] }
 0x42f   : > { %v2515_v21 = vmul.f32 %v2464_v13, %v6612_v16  ;;  %v5635_v16 = vld [vmem:[%s5154_s17 + $0x180] sm:$0xff] }
 0x430   : > { %3214 = vperm.xlu0 %3885, %v2740_v59   ;;  %v2264_v59 = vmul.f32 0.0051020407, %v5480_v8  ;;  %v3994_v8 = vpop.eup %3993 }
 0x431   : > { %v5607_v62 = vpop.permute.xlu1 %2902  ;;  %v5609_v12 = vpop.permute.xlu0 %2621 }
 0x432   : > { %6610 = vst [vmem:[#allocation121_spill] sm:$0xff] %v5607_v62  ;;  %3884 = vset.pattern.permute.xlu1 %v6574_v33  ;;  %v2516_v62 = vmul.f32 %v2465_v47, %v6613_v6 }
 0x433   : > { %3002 = vperm.xlu1 %3884, %v2463_v20   ;;  %v2741_v20 = vsub.f32 %v5257_v46, %v5520_v17  ;;  %v5640_v17 = vld [vmem:[%s5154_s17 + $0x188] sm:$0xff] }
 0x434   : > { %3886 = vset.pattern.permute.xlu0 %v6574_v33 }
 0x435   : > { %v5615_v61 = vpop.permute.xlu1 %2623  ;;  %3007 = vperm.xlu0 %3886, %v2464_v13   ;;  %v5617_v2 = vpop.permute.xlu0 %2907  ;;  %v2742_v13 = vsub.f32 %v5263_v36, %v5532_v5 }
 0x436   : > { %6611 = vst [vmem:[#allocation122_spill] sm:$0xff] %v5617_v2  ;;  %v2315_v2 = vadd.f32 1e-05, %v2264_v59 }
 0x437   : > { %2663 = vrot.lane.b32.xlu1 %v2515_v21, %s4010_s18  ;;  %v3996_v21 = vpop.eup %3995 }
 0x438   : > { %3887 = vset.pattern.permute.xlu1 %v6575_v60  ;;  %3997 = vrsqrt.f32 %v2315_v2  ;;  %v2467_v36 = vmul.f32 %v3996_v21, %v5640_v17 }
 0x439   : > { %v5626_v42 = vpop.permute.xlu1 %2912  ;;  %2665 = vrot.lane.b32.xlu0 %v2516_v62, %s4010_s18  ;;  %v5629_v27 = vpop.permute.xlu0 %2625 }
 0x43a   : > { %6614 = vst [vmem:[#allocation123_spill] sm:$0xff] %v5626_v42  ;;  %3889 = vset.pattern.permute.xlu0 %v6575_v60  ;;  %v2466_v42 = vmul.f32 %v3994_v8, %v5635_v16 }
 0x43b   : > { %3219 = vperm.xlu1 %3887, %v2741_v20  }
 0x43d   : > { %v5637_v6 = vpop.permute.xlu1 %2627  ;;  %3224 = vperm.xlu0 %3889, %v2742_v13   ;;  %v2918_v46 = vpop.permute.xlu0 %2917  ;;  %v6618_v13 = vld [vmem:[#allocation139_spill] sm:$0xff] }
 0x43e   : > { %v5643_v62 = vmul.f32 %v2918_v46, %v4507_v40  ;;  %v5646_v59 = vmul.f32 %v2918_v46, %v4510_v41  ;;  %v6617_v41 = vld [vmem:[#allocation138_spill] sm:$0xff] }
 0x43f   : > { %3888 = vset.pattern.permute.xlu1 %v6574_v33  ;;  %v2517_v8 = vmul.f32 %v2466_v42, %v6617_v41  ;;  %v6619_v46 = vld [vmem:[#allocation2_spill] sm:$0xff] }
 0x440   : > { %6615 = vst [vmem:[#allocation124_spill] sm:$0xff] %v5643_v62  ;;  %6616 = vst [vmem:[#allocation125_spill] sm:$0xff] %v5646_v59  ;;  %3012 = vperm.xlu1 %3888, %v2465_v47   ;;  %v2518_v47 = vmul.f32 %v2467_v36, %v6618_v13  ;;  %v3030_v21 = vmul.f32 %v5348_v0, %v6619_v46  ;;  %v6620_v59 = vld [vmem:[#allocation3_spill] sm:$0xff]  ;;  %v5688_v13 = vld [vmem:[%s5154_s17 + $0x190] sm:$0xff] }
 0x441   : > { %v2923_v5 = vpop.permute.xlu1 %2922  ;;  %3890 = vset.pattern.permute.xlu0 %v6574_v33  ;;  %v5652_v20 = vpop.permute.xlu0 %2629  ;;  %v3031_v62 = vmul.f32 %v5348_v0, %v6620_v59  ;;  %v6623_v46 = vld [vmem:[#allocation7_spill] sm:$0xff] }
 0x442   : > { %v5655_v2 = vmul.f32 %v2923_v5, %v4517_v44  ;;  %v5658_v40 = vmul.f32 %v2923_v5, %v4520_v45  ;;  %3017 = vperm.xlu0 %3890, %v2466_v42   ;;  %v2743_v44 = vsub.f32 %v5269_v43, %v5543_v31  ;;  %v3998_v41 = vpop.eup %3997 }
 0x444   : > { %2667 = vrot.lane.b32.xlu1 %v2517_v8, %s4010_s18  ;;  %v2744_v8 = vsub.f32 %v5275_v35, %v5549_v7  ;;  %v6621_v7 = vld [vmem:[#allocation140_spill] sm:$0xff] }
 0x445   : > { %v2928_v32 = vpop.permute.xlu0 %2927  ;;  %3891 = vset.pattern.permute.xlu1 %v6575_v60 }
 0x446   : > { %v5678_v45 = vmul.f32 %v2928_v32, %v4527_v48  ;;  %v5681_v42 = vmul.f32 %v2928_v32, %v4530_v49  ;;  %v3135_v0 = vpop.permute.xlu1 %3134  ;;  %2669 = vrot.lane.b32.xlu0 %v2518_v47, %s4010_s18  ;;  %v2468_v49 = vmul.f32 %v3998_v41, %v5688_v13 }
 0x447   : > { %v3387_v59 = vadd.f32 %v3135_v0, %v3030_v21  ;;  %v3388_v5 = vadd.f32 %v3135_v0, %v3031_v62  ;;  %3893 = vset.pattern.permute.xlu0 %v6575_v60  ;;  %v6622_v62 = vld [vmem:[#allocation6_spill] sm:$0xff] }
 0x448   : > { %3229 = vperm.xlu1 %3891, %v2743_v44   ;;  %v2519_v32 = vmul.f32 %v2468_v49, %v6621_v7  ;;  %v3032_v47 = vmul.f32 %v5353_v9, %v6622_v62  ;;  %v6624_v0 = vld [vmem:[#allocation10_spill] sm:$0xff] }
 0x449   : > { %3489 = vst [vmem:[%s5673_s22] sm:$0xff] %v3387_v59  ;;  %3490 = vst [vmem:[%s5673_s22 + $0x8] sm:$0xff] %v3388_v5  ;;  %v3034_v59 = vmul.f32 %v5362_v38, %v6624_v0  ;;  %v2748_v5 = vsub.f32 %v5299_v14, %v5594_v55  ;;  %v6626_v55 = vld [vmem:[#allocation12_spill] sm:$0xff] }
 0x44a   : > { %v5692_v48 = vpop.permute.xlu1 %2631  ;;  %3234 = vperm.xlu0 %3893, %v2744_v8  }
 0x44c   : > { %3892 = vset.pattern.permute.xlu1 %v6574_v33 }
 0x44d   : > { %3022 = vperm.xlu1 %3892, %v2467_v36   ;;  %v3033_v36 = vmul.f32 %v5353_v9, %v6623_v46 }
 0x44e   : > { %v2933_v43 = vpop.permute.xlu1 %2932  ;;  %3894 = vset.pattern.permute.xlu0 %v6574_v33  ;;  %v2746_v33 = vsub.f32 %v5287_v63, %v5574_v11  ;;  %v6625_v63 = vld [vmem:[#allocation11_spill] sm:$0xff] }
 0x44f   : > { %v5698_v35 = vmul.f32 %v2933_v43, %v4537_v52  ;;  %v5701_v31 = vmul.f32 %v2933_v43, %v4540_v53  ;;  %3027 = vperm.xlu0 %3894, %v2468_v49   ;;  %v2745_v53 = vsub.f32 %v5281_v15, %v5565_v23  ;;  %v3035_v11 = vmul.f32 %v5362_v38, %v6625_v63 }
 0x450   : > { %v2747_v15 = vsub.f32 %v5293_v19, %v5585_v24  ;;  %v2750_v49 = vsub.f32 %v5311_v18, %v5615_v61  ;;  %v2749_v19 = vsub.f32 %v5305_v26, %v5609_v12  ;;  %v3036_v18 = vmul.f32 %v5372_v39, %v6626_v55  ;;  %v6627_v61 = vld [vmem:[#allocation13_spill] sm:$0xff]  ;;  %v6629_v12 = vld [vmem:[#allocation14_spill] sm:$0xff] }
 0x451   : > { %2671 = vrot.lane.b32.xlu1 %v2519_v32, %s4010_s18  ;;  %v3140_v21 = vpop.permute.xlu0 %3139  ;;  %v3037_v7 = vmul.f32 %v5372_v39, %v6627_v61  ;;  %v3038_v62 = vmul.f32 %v5379_v25, %v6629_v12  ;;  %v6640_v61 = vld [vmem:[#allocation100_spill] sm:$0xff]  ;;  %v6644_v12 = vld [vmem:[#allocation102_spill] sm:$0xff] }
 0x452   : > { %v3389_v52 = vadd.f32 %v3140_v21, %v3032_v47  ;;  %v3390_v44 = vadd.f32 %v3140_v21, %v3033_v36  ;;  %3895 = vset.pattern.permute.xlu1 %v6575_v60  ;;  %v6630_v47 = vld [vmem:[#allocation15_spill] sm:$0xff] }
 0x453   : > { %3896 = vset.pattern.permute.xlu0 %v6575_v60  ;;  %v3039_v46 = vmul.f32 %v5379_v25, %v6630_v47  ;;  %v6633_v25 = vld [vmem:[#allocation22_spill] sm:$0xff]  ;;  %v6645_v47 = vld [vmem:[#allocation19_spill] sm:$0xff] }
 0x454   : > { %3491 = vst [vmem:[%s5673_s22 + $0x10] sm:$0xff] %v3389_v52  ;;  %3492 = vst [vmem:[%s5673_s22 + $0x18] sm:$0xff] %v3390_v44  ;;  %3244 = vperm.xlu0 %3896, %v2746_v33   ;;  %v6631_v33 = vld [vmem:[#allocation96_spill] sm:$0xff]  ;;  %v6632_v52 = vld [vmem:[#allocation95_spill] sm:$0xff] }
 0x455   : > { %3239 = vperm.xlu1 %3895, %v2745_v53   ;;  %v2634_v9 = vpop.permute.xlu0 %2633  ;;  %v2753_v44 = vsub.f32 %v6632_v52, %v5652_v20  ;;  %v6638_v20 = vld [vmem:[#allocation27_spill] sm:$0xff] }
 0x457   : > { %v3145_v60 = vpop.permute.xlu1 %3144 }
 0x458   : > { %v3391_v23 = vadd.f32 %v3145_v60, %v3034_v59  ;;  %v3392_v41 = vadd.f32 %v3145_v60, %v3035_v11  ;;  %3254 = vperm.xlu0 %3896, %v2748_v5   ;;  %v6634_v59 = vld [vmem:[#allocation23_spill] sm:$0xff]  ;;  %v6635_v11 = vld [vmem:[#allocation98_spill] sm:$0xff] }
 0x459   : > { %3249 = vperm.xlu1 %3895, %v2747_v15   ;;  %v2938_v8 = vpop.permute.xlu0 %2937  ;;  %v6636_v15 = vld [vmem:[#allocation97_spill] sm:$0xff] }
 0x45a   : > { %3493 = vst [vmem:[%s5673_s22 + $0x20] sm:$0xff] %v3391_v23  ;;  %3494 = vst [vmem:[%s5673_s22 + $0x28] sm:$0xff] %v3392_v41  ;;  %v5730_v43 = vmul.f32 %v2938_v8, %v4547_v56  ;;  %v5733_v38 = vmul.f32 %v2938_v8, %v4550_v57  ;;  %v2752_v56 = vsub.f32 %v5323_v29, %v5637_v6  ;;  %v6628_v57 = vld [vmem:[#allocation94_spill] sm:$0xff] }
 0x45b   : > { %v2636_v14 = vpop.permute.xlu1 %2635  ;;  %v2751_v32 = vsub.f32 %v6628_v57, %v5629_v27  ;;  %v2754_v29 = vsub.f32 %v6631_v33, %v5692_v48  ;;  %v2755_v60 = vsub.f32 %v6636_v15, %v2634_v9  ;;  %v6637_v23 = vld [vmem:[#allocation26_spill] sm:$0xff] }
 0x45c   : > { %3264 = vperm.xlu0 %3896, %v2750_v49   ;;  %v2756_v48 = vsub.f32 %v6635_v11, %v2636_v14 }
 0x45d   : > { %3259 = vperm.xlu1 %3895, %v2749_v19   ;;  %v2638_v24 = vpop.permute.xlu0 %2637 }
 0x45f   : > { %v3150_v26 = vpop.permute.xlu1 %3149 }
 0x460   : > { %v3393_v36 = vadd.f32 %v3150_v26, %v3036_v18  ;;  %v3394_v21 = vadd.f32 %v3150_v26, %v3037_v7  ;;  %3274 = vperm.xlu0 %3896, %v2752_v56   ;;  %v6639_v18 = vld [vmem:[#allocation16_spill] sm:$0xff]  ;;  %v6641_v7 = vld [vmem:[#allocation17_spill] sm:$0xff]  ;;  %v6642_v56 = vld [vmem:[#allocation99_spill] sm:$0xff] }
 0x461   : > { %3269 = vperm.xlu1 %3895, %v2751_v32   ;;  %v3155_v39 = vpop.permute.xlu0 %3154  ;;  %v3040_v14 = vmul.f32 %v6640_v61, %v6639_v18  ;;  %v3041_v9 = vmul.f32 %v6640_v61, %v6641_v7  ;;  %v2757_v57 = vsub.f32 %v6642_v56, %v2638_v24  ;;  %v6643_v26 = vld [vmem:[#allocation18_spill] sm:$0xff]  ;;  %v6654_v18 = vld [vmem:[#allocation21_spill] sm:$0xff]  ;;  %v6656_v56 = vld [vmem:[#allocation24_spill] sm:$0xff] }
 0x462   : > { %3495 = vst [vmem:[%s5673_s22 + $0x30] sm:$0xff] %v3393_v36  ;;  %3496 = vst [vmem:[%s5673_s22 + $0x38] sm:$0xff] %v3394_v21  ;;  %v3395_v6 = vadd.f32 %v3155_v39, %v3038_v62  ;;  %v3396_v27 = vadd.f32 %v3155_v39, %v3039_v46  ;;  %v3042_v62 = vmul.f32 %v6644_v12, %v6643_v26  ;;  %v6646_v39 = vld [vmem:[#allocation101_spill] sm:$0xff] }
 0x463   : > { %v6658_v26 = vld [vmem:[#allocation25_spill] sm:$0xff] }
 0x464   : > { %3497 = vst [vmem:[%s5673_s22 + $0x40] sm:$0xff] %v3395_v6  ;;  %3498 = vst [vmem:[%s5673_s22 + $0x48] sm:$0xff] %v3396_v27  ;;  %v2943_v53 = vpop.permute.xlu1 %2942  ;;  %3284 = vperm.xlu0 %3896, %v2754_v29   ;;  %v6647_v27 = vld [vmem:[#allocation30_spill] sm:$0xff] }
 0x465   : > { %v5758_v0 = vmul.f32 %v2943_v53, %v6633_v25  ;;  %v5761_v63 = vmul.f32 %v2943_v53, %v6634_v59  ;;  %3279 = vperm.xlu1 %3895, %v2753_v44   ;;  %v6648_v44 = vld [vmem:[#allocation31_spill] sm:$0xff]  ;;  %v6649_v59 = vld [vmem:[#allocation34_spill] sm:$0xff] }
 0x466   : > { %v2948_v5 = vpop.permute.xlu0 %2947 }
 0x467   : > { %v5766_v41 = vmul.f32 %v2948_v5, %v6637_v23  ;;  %v5769_v8 = vmul.f32 %v2948_v5, %v6638_v20 }
 0x468   : > { %v2640_v49 = vpop.permute.xlu1 %2639  ;;  %3294 = vperm.xlu0 %3896, %v2756_v48   ;;  %v6650_v48 = vld [vmem:[#allocation35_spill] sm:$0xff] }
 0x469   : > { %v2758_v19 = vsub.f32 %v5388_v54, %v2640_v49  ;;  %3289 = vperm.xlu1 %3895, %v2755_v60   ;;  %v3043_v54 = vmul.f32 %v6644_v12, %v6645_v47  ;;  %v6651_v60 = vld [vmem:[#allocation105_spill] sm:$0xff]  ;;  %v6652_v49 = vld [vmem:[#allocation20_spill] sm:$0xff] }
 0x46a   : > { %v2642_v55 = vpop.permute.xlu0 %2641 }
 0x46b   : > { %v2759_v33 = vsub.f32 %v6646_v39, %v2642_v55  ;;  %v6659_v39 = vld [vmem:[#allocation38_spill] sm:$0xff] }
 0x46c   : > { %v3160_v32 = vpop.permute.xlu1 %3159  ;;  %3304 = vperm.xlu0 %3896, %v2758_v19   ;;  %v6653_v19 = vld [vmem:[#allocation103_spill] sm:$0xff] }
 0x46d   : > { %v3397_v46 = vadd.f32 %v3160_v32, %v3040_v14  ;;  %v3398_v36 = vadd.f32 %v3160_v32, %v3041_v9  ;;  %3299 = vperm.xlu1 %3895, %v2757_v57   ;;  %v3044_v55 = vmul.f32 %v6653_v19, %v6652_v49  ;;  %v3045_v61 = vmul.f32 %v6653_v19, %v6654_v18  ;;  %v6655_v14 = vld [vmem:[#allocation106_spill] sm:$0xff]  ;;  %v6657_v57 = vld [vmem:[#allocation104_spill] sm:$0xff]  ;;  %v6665_v19 = vld [vmem:[#allocation29_spill] sm:$0xff] }
 0x46e   : > { %v3165_v21 = vpop.permute.xlu0 %3164  ;;  %v3046_v32 = vmul.f32 %v6657_v57, %v6656_v56  ;;  %v3047_v12 = vmul.f32 %v6657_v57, %v6658_v26  ;;  %v6666_v18 = vld [vmem:[#allocation110_spill] sm:$0xff]  ;;  %v6669_v57 = vld [vmem:[#allocation33_spill] sm:$0xff] }
 0x46f   : > { %3499 = vst [vmem:[%s5673_s22 + $0x50] sm:$0xff] %v3397_v46  ;;  %3500 = vst [vmem:[%s5673_s22 + $0x58] sm:$0xff] %v3398_v36  ;;  %v3399_v29 = vadd.f32 %v3165_v21, %v3042_v62  ;;  %v3400_v6 = vadd.f32 %v3165_v21, %v3043_v54 }
 0x471   : > { %3501 = vst [vmem:[%s5673_s22 + $0x60] sm:$0xff] %v3399_v29  ;;  %3502 = vst [vmem:[%s5673_s22 + $0x68] sm:$0xff] %v3400_v6  ;;  %v2953_v24 = vpop.permute.xlu1 %2952  ;;  %3309 = vperm.xlu1 %3895, %v2759_v33   ;;  %v6660_v29 = vld [vmem:[#allocation39_spill] sm:$0xff] }
 0x472   : > { %v5787_v52 = vmul.f32 %v2953_v24, %v6647_v27  ;;  %v5790_v53 = vmul.f32 %v2953_v24, %v6648_v44  ;;  %v6661_v27 = vld [vmem:[#allocation42_spill] sm:$0xff] }
 0x473   : > { %v2958_v25 = vpop.permute.xlu0 %2957 }
 0x474   : > { %v5793_v11 = vmul.f32 %v2958_v25, %v6649_v59  ;;  %v5796_v5 = vmul.f32 %v2958_v25, %v6650_v48  ;;  %v6662_v25 = vld [vmem:[#allocation43_spill] sm:$0xff] }
 0x475   : > { %v2644_v15 = vpop.permute.xlu1 %2643 }
 0x476   : > { %v2760_v23 = vsub.f32 %v6651_v60, %v2644_v15 }
 0x477   : > { %v2646_v20 = vpop.permute.xlu0 %2645 }
 0x478   : > { %v2761_v7 = vsub.f32 %v6655_v14, %v2646_v20  ;;  %3314 = vperm.xlu0 %3896, %v2760_v23   ;;  %v6663_v23 = vld [vmem:[#allocation28_spill] sm:$0xff]  ;;  %v6664_v20 = vld [vmem:[#allocation107_spill] sm:$0xff] }
 0x479   : > { %v3170_v9 = vpop.permute.xlu1 %3169  ;;  %v3048_v49 = vmul.f32 %v6664_v20, %v6663_v23 }
 0x47a   : > { %v3401_v62 = vadd.f32 %v3170_v9, %v3044_v55  ;;  %v3402_v47 = vadd.f32 %v3170_v9, %v3045_v61  ;;  %3319 = vperm.xlu1 %3895, %v2761_v7   ;;  %v3049_v55 = vmul.f32 %v6664_v20, %v6665_v19  ;;  %v6667_v7 = vld [vmem:[#allocation32_spill] sm:$0xff] }
 0x47b   : > { %v3175_v54 = vpop.permute.xlu0 %3174  ;;  %v6668_v9 = vld [vmem:[#allocation108_spill] sm:$0xff] }
 0x47c   : > { %3503 = vst [vmem:[%s5673_s22 + $0x70] sm:$0xff] %v3401_v62  ;;  %3504 = vst [vmem:[%s5673_s22 + $0x78] sm:$0xff] %v3402_v47  ;;  %v3403_v46 = vadd.f32 %v3175_v54, %v3046_v32  ;;  %v3404_v36 = vadd.f32 %v3175_v54, %v3047_v12  ;;  %v3050_v56 = vmul.f32 %v6668_v9, %v6667_v7  ;;  %v6674_v20 = vld [vmem:[#allocation36_spill] sm:$0xff] }
 0x47d   : > { %v3051_v32 = vmul.f32 %v6668_v9, %v6669_v57  ;;  %v6677_v7 = vld [vmem:[#allocation40_spill] sm:$0xff]  ;;  %v6678_v9 = vld [vmem:[#allocation111_spill] sm:$0xff]  ;;  %v6679_v57 = vld [vmem:[#allocation41_spill] sm:$0xff] }
 0x47e   : > { %3505 = vst [vmem:[%s5673_s22 + $0x80] sm:$0xff] %v3403_v46  ;;  %3506 = vst [vmem:[%s5673_s22 + $0x88] sm:$0xff] %v3404_v36  ;;  %v2963_v21 = vpop.permute.xlu1 %2962  ;;  %v6670_v46 = vld [vmem:[#allocation46_spill] sm:$0xff] }
 0x47f   : > { %v5813_v33 = vmul.f32 %v2963_v21, %v6659_v39  ;;  %v5816_v6 = vmul.f32 %v2963_v21, %v6660_v29  ;;  %v6671_v21 = vld [vmem:[#allocation47_spill] sm:$0xff] }
 0x480   : > { %v2968_v24 = vpop.permute.xlu0 %2967 }
 0x481   : > { %v5819_v44 = vmul.f32 %v2968_v24, %v6661_v27  ;;  %v5822_v59 = vmul.f32 %v2968_v24, %v6662_v25  ;;  %v6672_v24 = vld [vmem:[#allocation50_spill] sm:$0xff]  ;;  %v6673_v25 = vld [vmem:[#allocation51_spill] sm:$0xff] }
 0x482   : > { %v2648_v48 = vpop.permute.xlu1 %2647 }
 0x483   : > { %v2762_v15 = vsub.f32 %v5459_v10, %v2648_v48 }
 0x484   : > { %v2650_v60 = vpop.permute.xlu0 %2649 }
 0x485   : > { %v2763_v61 = vsub.f32 %v6666_v18, %v2650_v60  ;;  %3324 = vperm.xlu0 %3896, %v2762_v15  }
 0x486   : > { %v3180_v14 = vpop.permute.xlu1 %3179 }
 0x487   : > { %v3405_v10 = vadd.f32 %v3180_v14, %v3048_v49  ;;  %v3406_v26 = vadd.f32 %v3180_v14, %v3049_v55  ;;  %3329 = vperm.xlu1 %3895, %v2763_v61   ;;  %v6675_v49 = vld [vmem:[#allocation109_spill] sm:$0xff] }
 0x488   : > { %v3185_v12 = vpop.permute.xlu0 %3184  ;;  %v3052_v19 = vmul.f32 %v6675_v49, %v6674_v20  ;;  %v6676_v55 = vld [vmem:[#allocation37_spill] sm:$0xff] }
 0x489   : > { %3507 = vst [vmem:[%s5673_s22 + $0x90] sm:$0xff] %v3405_v10  ;;  %3508 = vst [vmem:[%s5673_s22 + $0x98] sm:$0xff] %v3406_v26  ;;  %v3407_v62 = vadd.f32 %v3185_v12, %v3050_v56  ;;  %v3408_v47 = vadd.f32 %v3185_v12, %v3051_v32  ;;  %v3053_v18 = vmul.f32 %v6675_v49, %v6676_v55  ;;  %v6685_v55 = vld [vmem:[#allocation112_spill] sm:$0xff] }
 0x48a   : > { %v3054_v56 = vmul.f32 %v6678_v9, %v6677_v7  ;;  %v3055_v32 = vmul.f32 %v6678_v9, %v6679_v57 }
 0x48b   : > { %3509 = vst [vmem:[%s5673_s22 + $0xa0] sm:$0xff] %v3407_v62  ;;  %3510 = vst [vmem:[%s5673_s22 + $0xa8] sm:$0xff] %v3408_v47  ;;  %v2973_v54 = vpop.permute.xlu1 %2972 }
 0x48c   : > { %v5839_v36 = vmul.f32 %v2973_v54, %v6670_v46  ;;  %v5842_v39 = vmul.f32 %v2973_v54, %v6671_v21  ;;  %v6681_v46 = vld [vmem:[#allocation55_spill] sm:$0xff] }
 0x48d   : > { %v2978_v29 = vpop.permute.xlu0 %2977 }
 0x48e   : > { %v5845_v27 = vmul.f32 %v2978_v29, %v6672_v24  ;;  %v5848_v48 = vmul.f32 %v2978_v29, %v6673_v25  ;;  %v6682_v24 = vld [vmem:[#allocation58_spill] sm:$0xff] }
 0x48f   : > { %v2652_v15 = vpop.permute.xlu1 %2651 }
 0x490   : > { %v2764_v60 = vsub.f32 %v5496_v28, %v2652_v15  ;;  %v6683_v15 = vld [vmem:[#allocation59_spill] sm:$0xff] }
 0x491   : > { %v2654_v23 = vpop.permute.xlu0 %2653 }
 0x492   : > { %v2765_v61 = vsub.f32 %v5503_v58, %v2654_v23  ;;  %3334 = vperm.xlu0 %3896, %v2764_v60   ;;  %v6680_v58 = vld [vmem:[#allocation54_spill] sm:$0xff] }
 0x493   : > { %v3190_v14 = vpop.permute.xlu1 %3189 }
 0x494   : > { %v3409_v28 = vadd.f32 %v3190_v14, %v3052_v19  ;;  %v3410_v10 = vadd.f32 %v3190_v14, %v3053_v18  ;;  %3339 = vperm.xlu1 %3895, %v2765_v61   ;;  %v6684_v19 = vld [vmem:[#allocation44_spill] sm:$0xff]  ;;  %v6686_v61 = vld [vmem:[#allocation45_spill] sm:$0xff] }
 0x495   : > { %v3195_v26 = vpop.permute.xlu0 %3194  ;;  %v3056_v18 = vmul.f32 %v6685_v55, %v6684_v19  ;;  %v3057_v14 = vmul.f32 %v6685_v55, %v6686_v61  ;;  %v6694_v61 = vld [vmem:[#allocation113_spill] sm:$0xff] }
 0x496   : > { %3511 = vst [vmem:[%s5673_s22 + $0xb0] sm:$0xff] %v3409_v28  ;;  %3512 = vst [vmem:[%s5673_s22 + $0xb8] sm:$0xff] %v3410_v10  ;;  %v3411_v12 = vadd.f32 %v3195_v26, %v3054_v56  ;;  %v3412_v62 = vadd.f32 %v3195_v26, %v3055_v32  ;;  %v6687_v56 = vld [vmem:[#allocation48_spill] sm:$0xff]  ;;  %v6688_v32 = vld [vmem:[#allocation49_spill] sm:$0xff] }
 0x497   : > { %v3058_v57 = vmul.f32 %v5491_v37, %v6687_v56  ;;  %v3059_v28 = vmul.f32 %v5491_v37, %v6688_v32  ;;  %v6696_v32 = vld [vmem:[#allocation56_spill] sm:$0xff] }
 0x498   : > { %3513 = vst [vmem:[%s5673_s22 + $0xc0] sm:$0xff] %v3411_v12  ;;  %3514 = vst [vmem:[%s5673_s22 + $0xc8] sm:$0xff] %v3412_v62  ;;  %v2983_v47 = vpop.permute.xlu1 %2982 }
 0x499   : > { %v5865_v54 = vmul.f32 %v2983_v47, %v6680_v58  ;;  %v5868_v21 = vmul.f32 %v2983_v47, %v6681_v46  ;;  %v6690_v46 = vld [vmem:[#allocation63_spill] sm:$0xff] }
 0x49a   : > { %v2988_v29 = vpop.permute.xlu0 %2987 }
 0x49b   : > { %v5871_v25 = vmul.f32 %v2988_v29, %v6682_v24  ;;  %v5874_v60 = vmul.f32 %v2988_v29, %v6683_v15  ;;  %v6691_v15 = vld [vmem:[#allocation66_spill] sm:$0xff] }
 0x49c   : > { %v2656_v23 = vpop.permute.xlu1 %2655 }
 0x49d   : > { %v2766_v20 = vsub.f32 %v5530_v3, %v2656_v23  ;;  %v6692_v23 = vld [vmem:[#allocation67_spill] sm:$0xff] }
 0x49e   : > { %v2658_v49 = vpop.permute.xlu0 %2657 }
 0x49f   : > { %v2767_v7 = vsub.f32 %v5537_v1, %v2658_v49  ;;  %3344 = vperm.xlu0 %3896, %v2766_v20   ;;  %v6689_v1 = vld [vmem:[#allocation62_spill] sm:$0xff] }
 0x4a0   : > { %v3200_v9 = vpop.permute.xlu1 %3199 }
 0x4a1   : > { %v3413_v3 = vadd.f32 %v3200_v9, %v3056_v18  ;;  %v3414_v10 = vadd.f32 %v3200_v9, %v3057_v14  ;;  %3349 = vperm.xlu1 %3895, %v2767_v7   ;;  %v6693_v18 = vld [vmem:[#allocation52_spill] sm:$0xff]  ;;  %v6695_v7 = vld [vmem:[#allocation53_spill] sm:$0xff] }
 0x4a2   : > { %v3205_v26 = vpop.permute.xlu0 %3204  ;;  %v3060_v14 = vmul.f32 %v6694_v61, %v6693_v18  ;;  %v3061_v9 = vmul.f32 %v6694_v61, %v6695_v7  ;;  %v6702_v18 = vld [vmem:[#allocation75_spill] sm:$0xff] }
 0x4a3   : > { %3515 = vst [vmem:[%s5673_s22 + $0xd0] sm:$0xff] %v3413_v3  ;;  %3516 = vst [vmem:[%s5673_s22 + $0xd8] sm:$0xff] %v3414_v10  ;;  %v3415_v12 = vadd.f32 %v3205_v26, %v3058_v57  ;;  %v3416_v62 = vadd.f32 %v3205_v26, %v3059_v28  ;;  %v6697_v28 = vld [vmem:[#allocation114_spill] sm:$0xff]  ;;  %v6698_v10 = vld [vmem:[#allocation57_spill] sm:$0xff] }
 0x4a4   : > { %v3062_v3 = vmul.f32 %v6697_v28, %v6696_v32  ;;  %v3063_v26 = vmul.f32 %v6697_v28, %v6698_v10  ;;  %v6705_v28 = vld [vmem:[#allocation61_spill] sm:$0xff] }
 0x4a5   : > { %3517 = vst [vmem:[%s5673_s22 + $0xe0] sm:$0xff] %v3415_v12  ;;  %3518 = vst [vmem:[%s5673_s22 + $0xe8] sm:$0xff] %v3416_v62  ;;  %v2993_v47 = vpop.permute.xlu1 %2992 }
 0x4a6   : > { %v5891_v58 = vmul.f32 %v2993_v47, %v6689_v1  ;;  %v5894_v29 = vmul.f32 %v2993_v47, %v6690_v46 }
 0x4a7   : > { %v2998_v24 = vpop.permute.xlu0 %2997 }
 0x4a8   : > { %v5897_v37 = vmul.f32 %v2998_v24, %v6691_v15  ;;  %v5900_v20 = vmul.f32 %v2998_v24, %v6692_v23  ;;  %v6700_v15 = vld [vmem:[#allocation71_spill] sm:$0xff] }
 0x4a9   : > { %v2660_v49 = vpop.permute.xlu1 %2659 }
 0x4aa   : > { %v2768_v19 = vsub.f32 %v5568_v34, %v2660_v49 }
 0x4ab   : > { %v2662_v55 = vpop.permute.xlu0 %2661 }
 0x4ac   : > { %v2769_v56 = vsub.f32 %v5571_v51, %v2662_v55  ;;  %3354 = vperm.xlu0 %3896, %v2768_v19   ;;  %v6699_v51 = vld [vmem:[#allocation70_spill] sm:$0xff] }
 0x4ad   : > { %v3210_v57 = vpop.permute.xlu1 %3209  ;;  %v6701_v19 = vld [vmem:[#allocation74_spill] sm:$0xff] }
 0x4ae   : > { %v3417_v34 = vadd.f32 %v3210_v57, %v3060_v14  ;;  %v3418_v12 = vadd.f32 %v3210_v57, %v3061_v9  ;;  %3359 = vperm.xlu1 %3895, %v2769_v56   ;;  %v6703_v56 = vld [vmem:[#allocation60_spill] sm:$0xff]  ;;  %v6704_v57 = vld [vmem:[#allocation115_spill] sm:$0xff] }
 0x4af   : > { %v3215_v62 = vpop.permute.xlu0 %3214  ;;  %v3064_v32 = vmul.f32 %v6704_v57, %v6703_v56  ;;  %v6711_v56 = vld [vmem:[#allocation83_spill] sm:$0xff] }
 0x4b0   : > { %3519 = vst [vmem:[%s5673_s22 + $0xf0] sm:$0xff] %v3417_v34  ;;  %3520 = vst [vmem:[%s5673_s22 + $0xf8] sm:$0xff] %v3418_v12  ;;  %v3419_v47 = vadd.f32 %v3215_v62, %v3062_v3  ;;  %v3420_v1 = vadd.f32 %v3215_v62, %v3063_v26  ;;  %v3065_v3 = vmul.f32 %v6704_v57, %v6705_v28  ;;  %v6706_v34 = vld [vmem:[#allocation64_spill] sm:$0xff]  ;;  %v6707_v62 = vld [vmem:[#allocation65_spill] sm:$0xff] }
 0x4b1   : > { %v3066_v12 = vmul.f32 %v5534_v22, %v6706_v34 }
 0x4b2   : > { %3521 = vst [vmem:[%s5673_s22 + $0x100] sm:$0xff] %v3419_v47  ;;  %3522 = vst [vmem:[%s5673_s22 + $0x108] sm:$0xff] %v3420_v1  ;;  %v3003_v46 = vpop.permute.xlu1 %3002  ;;  %v3067_v47 = vmul.f32 %v5534_v22, %v6707_v62 }
 0x4b3   : > { %v5917_v24 = vmul.f32 %v3003_v46, %v6699_v51  ;;  %v5920_v23 = vmul.f32 %v3003_v46, %v6700_v15 }
 0x4b4   : > { %v3008_v49 = vpop.permute.xlu0 %3007 }
 0x4b5   : > { %v5923_v55 = vmul.f32 %v3008_v49, %v6701_v19  ;;  %v5926_v61 = vmul.f32 %v3008_v49, %v6702_v18  ;;  %v6709_v18 = vld [vmem:[#allocation79_spill] sm:$0xff] }
 0x4b6   : > { %v2664_v14 = vpop.permute.xlu1 %2663 }
 0x4b7   : > { %v2770_v7 = vsub.f32 %v5602_v4, %v2664_v14 }
 0x4b8   : > { %v2666_v9 = vpop.permute.xlu0 %2665 }
 0x4b9   : > { %v2771_v10 = vsub.f32 %v5605_v50, %v2666_v9  ;;  %3364 = vperm.xlu0 %3896, %v2770_v7   ;;  %v6708_v50 = vld [vmem:[#allocation78_spill] sm:$0xff] }
 0x4ba   : > { %v3220_v26 = vpop.permute.xlu1 %3219  ;;  %v6710_v9 = vld [vmem:[#allocation82_spill] sm:$0xff] }
 0x4bb   : > { %v3421_v4 = vadd.f32 %v3220_v26, %v3064_v32  ;;  %v3422_v1 = vadd.f32 %v3220_v26, %v3065_v3  ;;  %3369 = vperm.xlu1 %3895, %v2771_v10   ;;  %v6712_v10 = vld [vmem:[#allocation68_spill] sm:$0xff] }
 0x4bc   : > { %v3225_v46 = vpop.permute.xlu0 %3224  ;;  %v6713_v26 = vld [vmem:[#allocation116_spill] sm:$0xff] }
 0x4bd   : > { %3523 = vst [vmem:[%s5673_s22 + $0x110] sm:$0xff] %v3421_v4  ;;  %3524 = vst [vmem:[%s5673_s22 + $0x118] sm:$0xff] %v3422_v1  ;;  %v3423_v51 = vadd.f32 %v3225_v46, %v3066_v12  ;;  %v3424_v15 = vadd.f32 %v3225_v46, %v3067_v47  ;;  %v3068_v34 = vmul.f32 %v6713_v26, %v6712_v10  ;;  %v6714_v12 = vld [vmem:[#allocation69_spill] sm:$0xff]  ;;  %v6715_v1 = vld [vmem:[#allocation72_spill] sm:$0xff] }
 0x4be   : > { %v3069_v62 = vmul.f32 %v6713_v26, %v6714_v12  ;;  %v6716_v46 = vld [vmem:[#allocation117_spill] sm:$0xff]  ;;  %v6720_v26 = vld [vmem:[#allocation90_spill] sm:$0xff] }
 0x4bf   : > { %3525 = vst [vmem:[%s5673_s22 + $0x120] sm:$0xff] %v3423_v51  ;;  %3526 = vst [vmem:[%s5673_s22 + $0x128] sm:$0xff] %v3424_v15  ;;  %v3013_v49 = vpop.permute.xlu1 %3012  ;;  %v3070_v51 = vmul.f32 %v6716_v46, %v6715_v1  ;;  %v6717_v15 = vld [vmem:[#allocation73_spill] sm:$0xff]  ;;  %v6722_v1 = vld [vmem:[#allocation80_spill] sm:$0xff] }
 0x4c0   : > { %v5943_v19 = vmul.f32 %v3013_v49, %v6708_v50  ;;  %v5946_v14 = vmul.f32 %v3013_v49, %v6709_v18  ;;  %v3071_v49 = vmul.f32 %v6716_v46, %v6717_v15  ;;  %v3074_v46 = vmul.f32 %v5577_v30, %v6722_v1  ;;  %v6729_v1 = vld [vmem:[#allocation89_spill] sm:$0xff] }
 0x4c1   : > { %v3018_v7 = vpop.permute.xlu0 %3017 }
 0x4c2   : > { %v5949_v22 = vmul.f32 %v3018_v7, %v6710_v9  ;;  %v5952_v57 = vmul.f32 %v3018_v7, %v6711_v56 }
 0x4c3   : > { %v2668_v32 = vpop.permute.xlu1 %2667 }
 0x4c4   : > { %v2772_v28 = vsub.f32 %v5635_v16, %v2668_v32 }
 0x4c5   : > { %v2670_v3 = vpop.permute.xlu0 %2669 }
 0x4c6   : > { %v2773_v47 = vsub.f32 %v5640_v17, %v2670_v3  ;;  %3374 = vperm.xlu0 %3896, %v2772_v28   ;;  %v6718_v17 = vld [vmem:[#allocation86_spill] sm:$0xff]  ;;  %v6719_v28 = vld [vmem:[#allocation87_spill] sm:$0xff] }
 0x4c7   : > { %v3230_v4 = vpop.permute.xlu1 %3229 }
 0x4c8   : > { %v3425_v16 = vadd.f32 %v3230_v4, %v3068_v34  ;;  %v3426_v50 = vadd.f32 %v3230_v4, %v3069_v62  ;;  %3379 = vperm.xlu1 %3895, %v2773_v47   ;;  %v6721_v34 = vld [vmem:[#allocation91_spill] sm:$0xff] }
 0x4c9   : > { %v3235_v18 = vpop.permute.xlu0 %3234 }
 0x4ca   : > { %3527 = vst [vmem:[%s5673_s22 + $0x130] sm:$0xff] %v3425_v16  ;;  %3528 = vst [vmem:[%s5673_s22 + $0x138] sm:$0xff] %v3426_v50  ;;  %v3427_v7 = vadd.f32 %v3235_v18, %v3070_v51  ;;  %v3428_v9 = vadd.f32 %v3235_v18, %v3071_v49  ;;  %v6723_v51 = vld [vmem:[#allocation81_spill] sm:$0xff]  ;;  %v6724_v49 = vld [vmem:[#allocation76_spill] sm:$0xff] }
 0x4cb   : > { %v3075_v15 = vmul.f32 %v5577_v30, %v6723_v51  ;;  %v6725_v16 = vld [vmem:[#allocation118_spill] sm:$0xff]  ;;  %v6726_v18 = vld [vmem:[#allocation77_spill] sm:$0xff]  ;;  %v6730_v51 = vld [vmem:[#allocation84_spill] sm:$0xff] }
 0x4cc   : > { %3529 = vst [vmem:[%s5673_s22 + $0x140] sm:$0xff] %v3427_v7  ;;  %3530 = vst [vmem:[%s5673_s22 + $0x148] sm:$0xff] %v3428_v9  ;;  %v3023_v56 = vpop.permute.xlu1 %3022  ;;  %v3072_v50 = vmul.f32 %v6725_v16, %v6724_v49  ;;  %v3073_v7 = vmul.f32 %v6725_v16, %v6726_v18  ;;  %v6731_v49 = vld [vmem:[#allocation119_spill] sm:$0xff] }
 0x4cd   : > { %v5969_v32 = vmul.f32 %v3023_v56, %v6718_v17  ;;  %v5972_v3 = vmul.f32 %v3023_v56, %v6719_v28  ;;  %v3076_v16 = vmul.f32 %v6731_v49, %v6730_v51  ;;  %v6736_v51 = vld [vmem:[#allocation92_spill] sm:$0xff] }
 0x4ce   : > { %v3028_v10 = vpop.permute.xlu0 %3027 }
 0x4cf   : > { %v5975_v12 = vmul.f32 %v3028_v10, %v6720_v26  ;;  %v5978_v62 = vmul.f32 %v3028_v10, %v6721_v34  ;;  %v6727_v26 = vld [vmem:[#allocation88_spill] sm:$0xff] }
 0x4d0   : > { %v2672_v47 = vpop.permute.xlu1 %2671  ;;  %v6728_v34 = vld [vmem:[#allocation120_spill] sm:$0xff] }
 0x4d1   : > { %v2774_v4 = vsub.f32 %v5688_v13, %v2672_v47  ;;  %v3078_v47 = vmul.f32 %v6728_v34, %v6727_v26  ;;  %v3079_v30 = vmul.f32 %v6728_v34, %v6729_v1  ;;  %v6733_v26 = vld [vmem:[#allocation4_spill] sm:$0xff]  ;;  %v6735_v34 = vld [vmem:[#allocation5_spill] sm:$0xff] }
 0x4d3   : > { %3384 = vperm.xlu0 %3896, %v2774_v4   ;;  %v3245_v9 = vpop.permute.xlu0 %3244  ;;  %v6732_v4 = vld [vmem:[#allocation85_spill] sm:$0xff] }
 0x4d4   : > { %v3431_v56 = vadd.f32 %v3245_v9, %v3074_v46  ;;  %v3432_v17 = vadd.f32 %v3245_v9, %v3075_v15  ;;  %v3240_v28 = vpop.permute.xlu1 %3239  ;;  %v3077_v46 = vmul.f32 %v6731_v49, %v6732_v4 }
 0x4d5   : > { %v3429_v13 = vadd.f32 %v3240_v28, %v3072_v50  ;;  %v3430_v10 = vadd.f32 %v3240_v28, %v3073_v7 }
 0x4d6   : > { %3533 = vst [vmem:[%s5673_s22 + $0x160] sm:$0xff] %v3431_v56  ;;  %3534 = vst [vmem:[%s5673_s22 + $0x168] sm:$0xff] %v3432_v17  ;;  %v6734_v56 = vld [vmem:[#allocation122_spill] sm:$0xff] }
 0x4d7   : > { %3531 = vst [vmem:[%s5673_s22 + $0x150] sm:$0xff] %v3429_v13  ;;  %3532 = vst [vmem:[%s5673_s22 + $0x158] sm:$0xff] %v3430_v10  ;;  %v3255_v15 = vpop.permute.xlu0 %3254  ;;  %v3082_v17 = vmul.f32 %v6734_v56, %v6733_v26  ;;  %v3083_v1 = vmul.f32 %v6734_v56, %v6735_v34  ;;  %v6737_v13 = vld [vmem:[#allocation121_spill] sm:$0xff] }
 0x4d8   : > { %v3435_v50 = vadd.f32 %v3255_v15, %v3078_v47  ;;  %v3436_v18 = vadd.f32 %v3255_v15, %v3079_v30  ;;  %v3250_v7 = vpop.permute.xlu1 %3249  ;;  %v3080_v10 = vmul.f32 %v6737_v13, %v6736_v51  ;;  %v6738_v47 = vld [vmem:[#allocation93_spill] sm:$0xff] }
 0x4d9   : > { %v3433_v9 = vadd.f32 %v3250_v7, %v3076_v16  ;;  %v3434_v28 = vadd.f32 %v3250_v7, %v3077_v46  ;;  %v3081_v30 = vmul.f32 %v6737_v13, %v6738_v47  ;;  %v6740_v7 = vld [vmem:[#allocation123_spill] sm:$0xff]  ;;  %v6741_v56 = vld [vmem:[#allocation9_spill] sm:$0xff] }
 0x4da   : > { %3537 = vst [vmem:[%s5673_s22 + $0x180] sm:$0xff] %v3435_v50  ;;  %3538 = vst [vmem:[%s5673_s22 + $0x188] sm:$0xff] %v3436_v18  ;;  %v6739_v18 = vld [vmem:[#allocation8_spill] sm:$0xff]  ;;  %v3085_v34 = vmul.f32 %v6740_v7, %v6741_v56 }
 0x4db   : > { %3535 = vst [vmem:[%s5673_s22 + $0x170] sm:$0xff] %v3433_v9  ;;  %3536 = vst [vmem:[%s5673_s22 + $0x178] sm:$0xff] %v3434_v28  ;;  %v3265_v49 = vpop.permute.xlu0 %3264  ;;  %v3084_v26 = vmul.f32 %v6740_v7, %v6739_v18  ;;  %v6742_v28 = vld [vmem:[#allocation124_spill] sm:$0xff] }
 0x4dc   : > { %v3439_v16 = vadd.f32 %v3265_v49, %v3082_v17  ;;  %v3440_v4 = vadd.f32 %v3265_v49, %v3083_v1  ;;  %v3260_v46 = vpop.permute.xlu1 %3259  ;;  %v6743_v1 = vld [vmem:[#allocation125_spill] sm:$0xff] }
 0x4dd   : > { %v3437_v15 = vadd.f32 %v3260_v46, %v3080_v10  ;;  %v3438_v50 = vadd.f32 %v3260_v46, %v3081_v30 }
 0x4de   : > { %3541 = vst [vmem:[%s5673_s22 + $0x1a0] sm:$0xff] %v3439_v16  ;;  %3542 = vst [vmem:[%s5673_s22 + $0x1a8] sm:$0xff] %v3440_v4 }
 0x4df   : > { %3539 = vst [vmem:[%s5673_s22 + $0x190] sm:$0xff] %v3437_v15  ;;  %3540 = vst [vmem:[%s5673_s22 + $0x198] sm:$0xff] %v3438_v50  ;;  %v3275_v9 = vpop.permute.xlu0 %3274 }
 0x4e0   : > { %v3443_v17 = vadd.f32 %v3275_v9, %v6742_v28  ;;  %v3444_v51 = vadd.f32 %v3275_v9, %v6743_v1  ;;  %v3270_v13 = vpop.permute.xlu1 %3269 }
 0x4e1   : > { %v3441_v10 = vadd.f32 %v3270_v13, %v3084_v26  ;;  %v3442_v47 = vadd.f32 %v3270_v13, %v3085_v34 }
 0x4e2   : > { %3545 = vst [vmem:[%s5673_s22 + $0x1c0] sm:$0xff] %v3443_v17  ;;  %3546 = vst [vmem:[%s5673_s22 + $0x1c8] sm:$0xff] %v3444_v51 }
 0x4e3   : > { %3543 = vst [vmem:[%s5673_s22 + $0x1b0] sm:$0xff] %v3441_v10  ;;  %3544 = vst [vmem:[%s5673_s22 + $0x1b8] sm:$0xff] %v3442_v47  ;;  %v3285_v30 = vpop.permute.xlu0 %3284 }
 0x4e4   : > { %v3447_v49 = vadd.f32 %v3285_v30, %v5678_v45  ;;  %v3448_v16 = vadd.f32 %v3285_v30, %v5681_v42  ;;  %v3280_v4 = vpop.permute.xlu1 %3279 }
 0x4e5   : > { %v3445_v46 = vadd.f32 %v3280_v4, %v5655_v2  ;;  %v3446_v15 = vadd.f32 %v3280_v4, %v5658_v40 }
 0x4e6   : > { %3549 = vst [vmem:[%s5673_s22 + $0x1e0] sm:$0xff] %v3447_v49  ;;  %3550 = vst [vmem:[%s5673_s22 + $0x1e8] sm:$0xff] %v3448_v16 }
 0x4e7   : > { %3547 = vst [vmem:[%s5673_s22 + $0x1d0] sm:$0xff] %v3445_v46  ;;  %3548 = vst [vmem:[%s5673_s22 + $0x1d8] sm:$0xff] %v3446_v15  ;;  %v3295_v50 = vpop.permute.xlu0 %3294 }
 0x4e8   : > { %v3451_v18 = vadd.f32 %v3295_v50, %v5730_v43  ;;  %v3452_v45 = vadd.f32 %v3295_v50, %v5733_v38  ;;  %v3290_v42 = vpop.permute.xlu1 %3289 }
 0x4e9   : > { %v3449_v7 = vadd.f32 %v3290_v42, %v5698_v35  ;;  %v3450_v2 = vadd.f32 %v3290_v42, %v5701_v31 }
 0x4ea   : > { %3553 = vst [vmem:[%s5673_s22 + $0x200] sm:$0xff] %v3451_v18  ;;  %3554 = vst [vmem:[%s5673_s22 + $0x208] sm:$0xff] %v3452_v45 }
 0x4eb   : > { %3551 = vst [vmem:[%s5673_s22 + $0x1f0] sm:$0xff] %v3449_v7  ;;  %3552 = vst [vmem:[%s5673_s22 + $0x1f8] sm:$0xff] %v3450_v2  ;;  %v3305_v40 = vpop.permute.xlu0 %3304 }
 0x4ec   : > { %v3455_v26 = vadd.f32 %v3305_v40, %v5766_v41  ;;  %v3456_v43 = vadd.f32 %v3305_v40, %v5769_v8  ;;  %v3300_v56 = vpop.permute.xlu1 %3299 }
 0x4ed   : > { %v3453_v38 = vadd.f32 %v3300_v56, %v5758_v0  ;;  %v3454_v35 = vadd.f32 %v3300_v56, %v5761_v63 }
 0x4ee   : > { %3557 = vst [vmem:[%s5673_s22 + $0x220] sm:$0xff] %v3455_v26  ;;  %3558 = vst [vmem:[%s5673_s22 + $0x228] sm:$0xff] %v3456_v43 }
 0x4ef   : > { %3555 = vst [vmem:[%s5673_s22 + $0x210] sm:$0xff] %v3453_v38  ;;  %3556 = vst [vmem:[%s5673_s22 + $0x218] sm:$0xff] %v3454_v35 }
 0x4f0   : > { %v3310_v31 = vpop.permute.xlu1 %3309 }
 0x4f1   : > { %v3457_v34 = vadd.f32 %v3310_v31, %v5787_v52  ;;  %v3458_v41 = vadd.f32 %v3310_v31, %v5790_v53 }
 0x4f3   : > { %3559 = vst [vmem:[%s5673_s22 + $0x230] sm:$0xff] %v3457_v34  ;;  %3560 = vst [vmem:[%s5673_s22 + $0x238] sm:$0xff] %v3458_v41 }
 0x4f7   : > { %v3315_v8 = vpop.permute.xlu0 %3314 }
 0x4f8   : > { %v3459_v0 = vadd.f32 %v3315_v8, %v5793_v11  ;;  %v3460_v63 = vadd.f32 %v3315_v8, %v5796_v5 }
 0x4f9   : > { %v3320_v9 = vpop.permute.xlu1 %3319 }
 0x4fa   : > { %3561 = vst [vmem:[%s5673_s22 + $0x240] sm:$0xff] %v3459_v0  ;;  %3562 = vst [vmem:[%s5673_s22 + $0x248] sm:$0xff] %v3460_v63  ;;  %v3461_v28 = vadd.f32 %v3320_v9, %v5813_v33  ;;  %v3462_v52 = vadd.f32 %v3320_v9, %v5816_v6 }
 0x4fc   : > { %3563 = vst [vmem:[%s5673_s22 + $0x250] sm:$0xff] %v3461_v28  ;;  %3564 = vst [vmem:[%s5673_s22 + $0x258] sm:$0xff] %v3462_v52 }
 0x504   : > { %v3325_v53 = vpop.permute.xlu0 %3324 }
 0x505   : > { %v3463_v17 = vadd.f32 %v3325_v53, %v5819_v44  ;;  %v3464_v11 = vadd.f32 %v3325_v53, %v5822_v59 }
 0x506   : > { %v3330_v5 = vpop.permute.xlu1 %3329 }
 0x507   : > { %3565 = vst [vmem:[%s5673_s22 + $0x260] sm:$0xff] %v3463_v17  ;;  %3566 = vst [vmem:[%s5673_s22 + $0x268] sm:$0xff] %v3464_v11  ;;  %v3465_v1 = vadd.f32 %v3330_v5, %v5839_v36  ;;  %v3466_v33 = vadd.f32 %v3330_v5, %v5842_v39 }
 0x509   : > { %3567 = vst [vmem:[%s5673_s22 + $0x270] sm:$0xff] %v3465_v1  ;;  %3568 = vst [vmem:[%s5673_s22 + $0x278] sm:$0xff] %v3466_v33 }
 0x511   : > { %v3335_v6 = vpop.permute.xlu0 %3334 }
 0x512   : > { %v3467_v51 = vadd.f32 %v3335_v6, %v5845_v27  ;;  %v3468_v44 = vadd.f32 %v3335_v6, %v5848_v48 }
 0x513   : > { %v3340_v59 = vpop.permute.xlu1 %3339 }
 0x514   : > { %3569 = vst [vmem:[%s5673_s22 + $0x280] sm:$0xff] %v3467_v51  ;;  %3570 = vst [vmem:[%s5673_s22 + $0x288] sm:$0xff] %v3468_v44  ;;  %v3469_v13 = vadd.f32 %v3340_v59, %v5865_v54  ;;  %v3470_v36 = vadd.f32 %v3340_v59, %v5868_v21 }
 0x516   : > { %3571 = vst [vmem:[%s5673_s22 + $0x290] sm:$0xff] %v3469_v13  ;;  %3572 = vst [vmem:[%s5673_s22 + $0x298] sm:$0xff] %v3470_v36 }
 0x51e   : > { %v3345_v39 = vpop.permute.xlu0 %3344 }
 0x51f   : > { %v3471_v10 = vadd.f32 %v3345_v39, %v5871_v25  ;;  %v3472_v27 = vadd.f32 %v3345_v39, %v5874_v60 }
 0x520   : > { %v3350_v48 = vpop.permute.xlu1 %3349 }
 0x521   : > { %3573 = vst [vmem:[%s5673_s22 + $0x2a0] sm:$0xff] %v3471_v10  ;;  %3574 = vst [vmem:[%s5673_s22 + $0x2a8] sm:$0xff] %v3472_v27  ;;  %v3473_v47 = vadd.f32 %v3350_v48, %v5891_v58  ;;  %v3474_v54 = vadd.f32 %v3350_v48, %v5894_v29 }
 0x523   : > { %3575 = vst [vmem:[%s5673_s22 + $0x2b0] sm:$0xff] %v3473_v47  ;;  %3576 = vst [vmem:[%s5673_s22 + $0x2b8] sm:$0xff] %v3474_v54 }
 0x52b   : > { %v3355_v21 = vpop.permute.xlu0 %3354 }
 0x52c   : > { %v3475_v30 = vadd.f32 %v3355_v21, %v5897_v37  ;;  %v3476_v25 = vadd.f32 %v3355_v21, %v5900_v20 }
 0x52d   : > { %v3360_v60 = vpop.permute.xlu1 %3359 }
 0x52e   : > { %3577 = vst [vmem:[%s5673_s22 + $0x2c0] sm:$0xff] %v3475_v30  ;;  %3578 = vst [vmem:[%s5673_s22 + $0x2c8] sm:$0xff] %v3476_v25  ;;  %v3477_v49 = vadd.f32 %v3360_v60, %v5917_v24  ;;  %v3478_v58 = vadd.f32 %v3360_v60, %v5920_v23 }
 0x530   : > { %3579 = vst [vmem:[%s5673_s22 + $0x2d0] sm:$0xff] %v3477_v49  ;;  %3580 = vst [vmem:[%s5673_s22 + $0x2d8] sm:$0xff] %v3478_v58 }
 0x538   : > { %v3365_v29 = vpop.permute.xlu0 %3364 }
 0x539   : > { %v3479_v16 = vadd.f32 %v3365_v29, %v5923_v55  ;;  %v3480_v37 = vadd.f32 %v3365_v29, %v5926_v61 }
 0x53a   : > { %v3370_v20 = vpop.permute.xlu1 %3369 }
 0x53b   : > { %3581 = vst [vmem:[%s5673_s22 + $0x2e0] sm:$0xff] %v3479_v16  ;;  %3582 = vst [vmem:[%s5673_s22 + $0x2e8] sm:$0xff] %v3480_v37  ;;  %v3481_v4 = vadd.f32 %v3370_v20, %v5943_v19  ;;  %v3482_v24 = vadd.f32 %v3370_v20, %v5946_v14 }
 0x53d   : > { %3583 = vst [vmem:[%s5673_s22 + $0x2f0] sm:$0xff] %v3481_v4  ;;  %3584 = vst [vmem:[%s5673_s22 + $0x2f8] sm:$0xff] %v3482_v24 }
 0x545   : > { %v3375_v23 = vpop.permute.xlu0 %3374 }
 0x546   : > { %v3483_v46 = vadd.f32 %v3375_v23, %v5949_v22  ;;  %v3484_v55 = vadd.f32 %v3375_v23, %v5952_v57 }
 0x547   : > { %v3380_v15 = vpop.permute.xlu1 %3379 }
 0x548   : > { %3585 = vst [vmem:[%s5673_s22 + $0x300] sm:$0xff] %v3483_v46  ;;  %3586 = vst [vmem:[%s5673_s22 + $0x308] sm:$0xff] %v3484_v55  ;;  %v3485_v61 = vadd.f32 %v3380_v15, %v5969_v32  ;;  %v3486_v50 = vadd.f32 %v3380_v15, %v5972_v3 }
 0x54a   : > { %3587 = vst [vmem:[%s5673_s22 + $0x310] sm:$0xff] %v3485_v61  ;;  %3588 = vst [vmem:[%s5673_s22 + $0x318] sm:$0xff] %v3486_v50 }
 0x552   : > { %v3385_v19 = vpop.permute.xlu0 %3384 }
 0x553   : > { %v3487_v14 = vadd.f32 %v3385_v19, %v5975_v12  ;;  %v3488_v18 = vadd.f32 %v3385_v19, %v5978_v62 }
 0x555   : > { %3589 = vst [vmem:[%s5673_s22 + $0x320] sm:$0xff] %v3487_v14  ;;  %3590 = vst [vmem:[%s5673_s22 + $0x328] sm:$0xff] %v3488_v18 }
 0x556 PF: > { %s14_s15 = sadd.s32 1, %s4005_s15  }
 0x557   : > { %p11_p4 = scmp.ge.s32.totalorder %s14_s15, 4  }
 0x559   :  { %13 = sbr.rel (!%p11_p4) target bundleno = 1 (0x1), region = 69 }

</bundles_post_ra>
